<compile_context>
chip_gen: v6e
topology: v6e:2x2x1
jax: 0.10.0
libtpu: 0.0.40
codegen_flags: <defaults>
</compile_context>

<pallas_src>
import functools

import jax
import jax.numpy as jnp
from jax import lax
from jax.experimental import pallas as pl
from jax.experimental.pallas import tpu as pltpu


# ----------------------------------------------------------------------------
# Kernel 1: fused (im2col-matmul conv3x3) + folded-BN bias + ReLU
# ----------------------------------------------------------------------------
def _conv_bn_relu_kernel(p_ref, w_ref, b_ref, o_ref):
    # p_ref: [TM, 9*Cin]   w_ref: [9*Cin, Cout] (BN scale pre-folded)
    # b_ref: [1, Cout]     (conv-bias * scale + shift)   o_ref: [TM, Cout]
    acc = jnp.dot(p_ref[...], w_ref[...], preferred_element_type=jnp.float32)
    o_ref[...] = jnp.maximum(acc + b_ref[...], 0.0)


def _im2col3x3(x_nhwc):
    # x: [B, H, W, C] -> patches [B, H, W, 9*C]  (order: dy, dx, cin)
    B, H, W, C = x_nhwc.shape
    xp = jnp.pad(x_nhwc, ((0, 0), (1, 1), (1, 1), (0, 0)))
    cols = [xp[:, dy:dy + H, dx:dx + W, :] for dy in range(3) for dx in range(3)]
    return jnp.concatenate(cols, axis=-1)


def _pick_tile(m, cap=256):
    for t in (256, 128, 64, 32, 16, 8):
        if t <= cap and m % t == 0:
            return t
    return m  # fall back to full extent (always legal for a BlockSpec)


def conv3x3_bn_relu(x_nhwc, w_hwio, bias, bn_scale, bn_shift):
    """w_hwio: [3, 3, Cin, Cout]; conv stride=1, padding=1, then affine-BN + ReLU."""
    B, H, W, Cin = x_nhwc.shape
    Cout = w_hwio.shape[-1]
    K = 9 * Cin
    M = B * H * W
    tm = _pick_tile(M)

    # Fold BN:  (conv(x) + b) * s + t  ==  x @ (w * s) + (b * s + t)
    w_fold = (w_hwio * bn_scale).reshape(K, Cout).astype(jnp.float32)
    b_fold = (bias * bn_scale + bn_shift).reshape(1, Cout).astype(jnp.float32)
    patches = _im2col3x3(x_nhwc).reshape(M, K)

    out = pl.pallas_call(
        _conv_bn_relu_kernel,
        out_shape=jax.ShapeDtypeStruct((M, Cout), jnp.float32),
        grid_spec=pltpu.PrefetchScalarGridSpec(
            num_scalar_prefetch=0,
            grid=(M // tm,),
            in_specs=[
                pl.BlockSpec((tm, K), lambda i: (i, 0)),
                pl.BlockSpec((K, Cout), lambda i: (0, 0)),   # resident (const index)
                pl.BlockSpec((1, Cout), lambda i: (0, 0)),
            ],
            out_specs=pl.BlockSpec((tm, Cout), lambda i: (i, 0)),
        ),
        compiler_params=pltpu.CompilerParams(dimension_semantics=("parallel",)),
    )(patches, w_fold, b_fold)
    return out.reshape(B, H, W, Cout)


# ----------------------------------------------------------------------------
# Kernel 2: fused position-attention core (per batch element)
#   Q/K/V 1x1 convs as matmuls, energy = Q K^T, softmax, out = attn V,
#   out_feat = gamma * out + x     (normalization deferred past the PV matmul)
# ----------------------------------------------------------------------------
def _attention_kernel(x_ref, wq_ref, bq_ref, wk_ref, bk_ref, wv_ref, bv_ref,
                      g_ref, o_ref):
    x = x_ref[0]                                                    # [HW, C]
    q = jnp.dot(x, wq_ref[...], preferred_element_type=jnp.float32) + bq_ref[...]
    k = jnp.dot(x, wk_ref[...], preferred_element_type=jnp.float32) + bk_ref[...]
    v = jnp.dot(x, wv_ref[...], preferred_element_type=jnp.float32) + bv_ref[...]
    # energy[i, j] = sum_c q[i, c] * k[j, c]   -> [HW, HW]
    energy = lax.dot_general(q, k, (((1,), (1,)), ((), ())),
                             preferred_element_type=jnp.float32)
    m = jnp.max(energy, axis=-1, keepdims=True)                     # stability
    p = jnp.exp(energy - m)                                         # unnormalized
    denom = jnp.sum(p, axis=-1, keepdims=True)                      # [HW, 1]
    pv = jnp.dot(p, v, preferred_element_type=jnp.float32)          # [HW, C]
    out = pv / denom                                                # == softmax(e) @ v
    o_ref[0] = g_ref[0] * out + x


def attention_core(x_flat, wq, bq, wk, bk, wv, bv, gamma):
    """x_flat: [B, HW, C] -> [B, HW, C] = gamma * attention(x) + x."""
    B, HW, C = x_flat.shape
    Cq = wq.shape[-1]
    return pl.pallas_call(
        _attention_kernel,
        out_shape=jax.ShapeDtypeStruct((B, HW, C), jnp.float32),
        grid_spec=pltpu.PrefetchScalarGridSpec(
            num_scalar_prefetch=0,
            grid=(B,),
            in_specs=[
                pl.BlockSpec((1, HW, C), lambda b: (b, 0, 0)),
                pl.BlockSpec((C, Cq), lambda b: (0, 0)),
                pl.BlockSpec((1, Cq), lambda b: (0, 0)),
                pl.BlockSpec((C, Cq), lambda b: (0, 0)),
                pl.BlockSpec((1, Cq), lambda b: (0, 0)),
                pl.BlockSpec((C, C), lambda b: (0, 0)),
                pl.BlockSpec((1, C), lambda b: (0, 0)),
                pl.BlockSpec(memory_space=pltpu.MemorySpace.SMEM),
            ],
            out_specs=pl.BlockSpec((1, HW, C), lambda b: (b, 0, 0)),
        ),
        compiler_params=pltpu.CompilerParams(dimension_semantics=("parallel",)),
    )(x_flat, wq, bq.reshape(1, Cq), wk, bk.reshape(1, Cq), wv,
      bv.reshape(1, C), gamma)


# ----------------------------------------------------------------------------
# Full AttentionLayer forward (pos=None)
# ----------------------------------------------------------------------------
def attention_layer_forward(x_nchw, params):
    x = jnp.transpose(x_nchw, (0, 2, 3, 1))                         # NCHW -> NHWC
    # pre_conv: conv3x3(stride=1, pad=1) + BN + ReLU
    x = conv3x3_bn_relu(x, params["w_pre"], params["b_pre"],
                        params["bn_pre_scale"], params["bn_pre_shift"])
    B, H, W, C = x.shape
    x_flat = x.reshape(B, H * W, C)
    # fused attention (query/key/value 1x1 convs, bmm, softmax, bmm, gamma*out + x)
    feat = attention_core(x_flat, params["wq"], params["bq"], params["wk"],
                          params["bk"], params["wv"], params["bv"],
                          params["gamma"])
    feat = feat.reshape(B, H, W, C)
    # final_conv: conv3x3(pad=1) + BN + ReLU
    out = conv3x3_bn_relu(feat, params["w_fin"], params["b_fin"],
                          params["bn_fin_scale"], params["bn_fin_shift"])
    return jnp.transpose(out, (0, 3, 1, 2))                         # NHWC -> NCHW


# ----------------------------------------------------------------------------
# Pure-JAX reference (lax.conv + jax.nn.softmax, independent of the kernels)
# ----------------------------------------------------------------------------
def attention_layer_reference(x_nchw, params):
    def conv_bn_relu(x, w, b, s, t):
        y = lax.conv_general_dilated(x, w, (1, 1), "SAME",
                                     dimension_numbers=("NHWC", "HWIO", "NHWC"))
        return jnp.maximum((y + b) * s + t, 0.0)

    x = jnp.transpose(x_nchw, (0, 2, 3, 1))
    x = conv_bn_relu(x, params["w_pre"], params["b_pre"],
                     params["bn_pre_scale"], params["bn_pre_shift"])
    B, H, W, C = x.shape
    xf = x.reshape(B, H * W, C)
    q = xf @ params["wq"] + params["bq"]
    k = xf @ params["wk"] + params["bk"]
    v = xf @ params["wv"] + params["bv"]
    energy = jnp.einsum("bic,bjc->bij", q, k)
    attn = jax.nn.softmax(energy, axis=-1)
    out = jnp.einsum("bij,bjc->bic", attn, v)
    feat = (params["gamma"][0] * out + xf).reshape(B, H, W, C)
    out = conv_bn_relu(feat, params["w_fin"], params["b_fin"],
                       params["bn_fin_scale"], params["bn_fin_shift"])
    return jnp.transpose(out, (0, 3, 1, 2))


# ----------------------------------------------------------------------------
def make_params(key, in_dim, out_dim, ratio):
    ks = jax.random.split(key, 10)
    qk = out_dim // ratio
    f32 = jnp.float32
    return {
        # pre_conv (ConvModule: conv has no bias when norm present -> zeros)
        "w_pre": 0.2 * jax.random.normal(ks[0], (3, 3, in_dim, out_dim), f32),
        "b_pre": jnp.zeros((out_dim,), f32),
        "bn_pre_scale": 1.0 + 0.1 * jax.random.normal(ks[1], (out_dim,), f32),
        "bn_pre_shift": 0.1 * jax.random.normal(ks[2], (out_dim,), f32),
        # 1x1 convs (weights stored as [Cin, Cout])
        "wq": 0.2 * jax.random.normal(ks[3], (out_dim, qk), f32),
        "bq": 0.05 * jax.random.normal(ks[4], (qk,), f32),
        "wk": 0.2 * jax.random.normal(ks[5], (out_dim, qk), f32),
        "bk": 0.05 * jax.random.normal(ks[6], (qk,), f32),
        "wv": 0.2 * jax.random.normal(ks[7], (out_dim, out_dim), f32),
        "bv": 0.05 * jax.random.normal(ks[8], (out_dim,), f32),
        # gamma (nn.Parameter(torch.zeros(1)) in the module; nonzero here so the
        # attention path is actually exercised numerically)
        "gamma": jnp.array([0.5], f32),
        # final_conv
        "w_fin": 0.2 * jax.random.normal(ks[9], (3, 3, out_dim, out_dim), f32),
        "b_fin": jnp.zeros((out_dim,), f32),
        "bn_fin_scale": jnp.ones((out_dim,), f32),
        "bn_fin_shift": jnp.zeros((out_dim,), f32),
    }


if __name__ == "__main__":
    B, in_dim, out_dim, ratio, H, W = 2, 4, 32, 4, 16, 16
    key = jax.random.PRNGKey(0)
    kx, kp = jax.random.split(key)
    x = jax.random.normal(kx, (B, in_dim, H, W), jnp.float32)   # NCHW like PyTorch
    params = make_params(kp, in_dim, out_dim, ratio)

    fwd = jax.jit(functools.partial(attention_layer_forward))
    out = fwd(x, params)
    out = jax.block_until_ready(out)

    ref = attention_layer_reference(x, params)
    assert out.shape == (B, out_dim, H, W)
    assert jnp.allclose(out, ref, rtol=1e-3, atol=1e-3), (
        float(jnp.max(jnp.abs(out - ref))))
    print("KERNEL_OK")
</pallas_src>

<mosaic_0001>
module attributes {stable_mosaic.version = 11 : i64} {
  func.func @_conv_bn_relu_kernel(%arg0: i32, %arg1: memref<256x36xf32, #tpu.memory_space<vmem>>, %arg2: memref<36x32xf32, #tpu.memory_space<vmem>>, %arg3: memref<1x32xf32, #tpu.memory_space<vmem>>, %arg4: memref<256x32xf32, #tpu.memory_space<vmem>>) attributes {dimension_semantics = [#tpu.dimension_semantics<parallel>], iteration_bounds = array<i64: 2>, scalar_prefetch = 0 : i64, scratch_operands = 0 : i64, tpu.core_type = #tpu.core_type<tc>, window_params = [{transform_indices = @transform_0, window_bounds = array<i64: 256, 36>}, {pipeline_mode = #tpu.pipeline_mode<synchronous>, transform_indices = @transform_1, window_bounds = array<i64: 36, 32>}, {pipeline_mode = #tpu.pipeline_mode<synchronous>, transform_indices = @transform_2, window_bounds = array<i64: 1, 32>}, {transform_indices = @transform_3, window_bounds = array<i64: 256, 32>}]} {
    %c0 = arith.constant 0 : index
    %c0_0 = arith.constant 0 : index
    %0 = vector.load %arg1[%c0, %c0_0] : memref<256x36xf32, #tpu.memory_space<vmem>>, vector<256x36xf32>
    %c0_1 = arith.constant 0 : index
    %c0_2 = arith.constant 0 : index
    %1 = vector.load %arg2[%c0_1, %c0_2] : memref<36x32xf32, #tpu.memory_space<vmem>>, vector<36x32xf32>
    %cst = arith.constant dense<0.000000e+00> : vector<256x32xf32>
    %2 = tpu.matmul %0, %1, %cst {dimension_numbers = #tpu.dot_dimension_numbers<[1], [0], [0], [1], [0, 0, 1, 1], [], []>} : vector<256x36xf32>, vector<36x32xf32>, vector<256x32xf32> -> vector<256x32xf32>
    %c0_3 = arith.constant 0 : index
    %c0_4 = arith.constant 0 : index
    %3 = vector.load %arg3[%c0_3, %c0_4] : memref<1x32xf32, #tpu.memory_space<vmem>>, vector<1x32xf32>
    %4 = vector.broadcast %3 : vector<1x32xf32> to vector<256x32xf32>
    %5 = arith.addf %2, %4 : vector<256x32xf32>
    %cst_5 = arith.constant 0.000000e+00 : f32
    %6 = vector.broadcast %cst_5 : f32 to vector<256x32xf32>
    %7 = arith.maximumf %5, %6 : vector<256x32xf32>
    %c0_6 = arith.constant 0 : index
    %c0_7 = arith.constant 0 : index
    %8 = vector.load %arg4[%c0_6, %c0_7] : memref<256x32xf32, #tpu.memory_space<vmem>>, vector<256x32xf32>
    tpu.vector_store %arg4[%c0_6, %c0_7], %7 {strides = array<i32>} : memref<256x32xf32, #tpu.memory_space<vmem>>, vector<256x32xf32>,
    return
  }
  func.func @transform_0(%arg0: i32) -> (i32, i32) {
    %c0_i32 = arith.constant 0 : i32
    %c0_i32_0 = arith.constant 0 : i32
    return %arg0, %c0_i32 : i32, i32
  }
  func.func @transform_1(%arg0: i32) -> (i32, i32) {
    %c0_i32 = arith.constant 0 : i32
    %c0_i32_0 = arith.constant 0 : i32
    %c0_i32_1 = arith.constant 0 : i32
    return %c0_i32, %c0_i32_0 : i32, i32
  }
  func.func @transform_2(%arg0: i32) -> (i32, i32) {
    %c0_i32 = arith.constant 0 : i32
    %c0_i32_0 = arith.constant 0 : i32
    %c0_i32_1 = arith.constant 0 : i32
    return %c0_i32, %c0_i32_0 : i32, i32
  }
  func.func @transform_3(%arg0: i32) -> (i32, i32) {
    %c0_i32 = arith.constant 0 : i32
    %c0_i32_0 = arith.constant 0 : i32
    return %arg0, %c0_i32 : i32, i32
  }
}

module attributes {stable_mosaic.version = 11 : i64} {
  func.func @_attention_kernel(%arg0: i32, %arg1: memref<1x256x32xf32, #tpu.memory_space<vmem>>, %arg2: memref<32x8xf32, #tpu.memory_space<vmem>>, %arg3: memref<1x8xf32, #tpu.memory_space<vmem>>, %arg4: memref<32x8xf32, #tpu.memory_space<vmem>>, %arg5: memref<1x8xf32, #tpu.memory_space<vmem>>, %arg6: memref<32x32xf32, #tpu.memory_space<vmem>>, %arg7: memref<1x32xf32, #tpu.memory_space<vmem>>, %arg8: memref<1xf32, #tpu.memory_space<smem>>, %arg9: memref<1x256x32xf32, #tpu.memory_space<vmem>>) attributes {dimension_semantics = [#tpu.dimension_semantics<parallel>], iteration_bounds = array<i64: 2>, scalar_prefetch = 0 : i64, scratch_operands = 0 : i64, tpu.core_type = #tpu.core_type<tc>, window_params = [{transform_indices = @transform_0, window_bounds = array<i64: 1, 256, 32>}, {pipeline_mode = #tpu.pipeline_mode<synchronous>, transform_indices = @transform_1, window_bounds = array<i64: 32, 8>}, {pipeline_mode = #tpu.pipeline_mode<synchronous>, transform_indices = @transform_2, window_bounds = array<i64: 1, 8>}, {pipeline_mode = #tpu.pipeline_mode<synchronous>, transform_indices = @transform_3, window_bounds = array<i64: 32, 8>}, {pipeline_mode = #tpu.pipeline_mode<synchronous>, transform_indices = @transform_4, window_bounds = array<i64: 1, 8>}, {pipeline_mode = #tpu.pipeline_mode<synchronous>, transform_indices = @transform_5, window_bounds = array<i64: 32, 32>}, {pipeline_mode = #tpu.pipeline_mode<synchronous>, transform_indices = @transform_6, window_bounds = array<i64: 1, 32>}, {transform_indices = @transform_7, window_bounds = array<i64: 1>}, {transform_indices = @transform_8, window_bounds = array<i64: 1, 256, 32>}]} {
    %c0 = arith.constant 0 : index
    %c0_0 = arith.constant 0 : index
    %c0_1 = arith.constant 0 : index
    %0 = vector.load %arg1[%c0, %c0_0, %c0_1] : memref<1x256x32xf32, #tpu.memory_space<vmem>>, vector<1x256x32xf32>
    %1 = vector.shape_cast %0 : vector<1x256x32xf32> to vector<256x32xf32>
    %c0_2 = arith.constant 0 : index
    %c0_3 = arith.constant 0 : index
    %2 = vector.load %arg2[%c0_2, %c0_3] : memref<32x8xf32, #tpu.memory_space<vmem>>, vector<32x8xf32>
    %cst = arith.constant dense<0.000000e+00> : vector<256x8xf32>
    %3 = tpu.matmul %1, %2, %cst {dimension_numbers = #tpu.dot_dimension_numbers<[1], [0], [0], [1], [0, 0, 1, 1], [], []>} : vector<256x32xf32>, vector<32x8xf32>, vector<256x8xf32> -> vector<256x8xf32>
    %c0_4 = arith.constant 0 : index
    %c0_5 = arith.constant 0 : index
    %4 = vector.load %arg3[%c0_4, %c0_5] : memref<1x8xf32, #tpu.memory_space<vmem>>, vector<1x8xf32>
    %5 = vector.broadcast %4 : vector<1x8xf32> to vector<256x8xf32>
    %6 = arith.addf %3, %5 : vector<256x8xf32>
    %c0_6 = arith.constant 0 : index
    %c0_7 = arith.constant 0 : index
    %7 = vector.load %arg4[%c0_6, %c0_7] : memref<32x8xf32, #tpu.memory_space<vmem>>, vector<32x8xf32>
    %cst_8 = arith.constant dense<0.000000e+00> : vector<256x8xf32>
    %8 = tpu.matmul %1, %7, %cst_8 {dimension_numbers = #tpu.dot_dimension_numbers<[1], [0], [0], [1], [0, 0, 1, 1], [], []>} : vector<256x32xf32>, vector<32x8xf32>, vector<256x8xf32> -> vector<256x8xf32>
    %c0_9 = arith.constant 0 : index
    %c0_10 = arith.constant 0 : index
    %9 = vector.load %arg5[%c0_9, %c0_10] : memref<1x8xf32, #tpu.memory_space<vmem>>, vector<1x8xf32>
    %10 = vector.broadcast %9 : vector<1x8xf32> to vector<256x8xf32>
    %11 = arith.addf %8, %10 : vector<256x8xf32>
    %c0_11 = arith.constant 0 : index
    %c0_12 = arith.constant 0 : index
    %12 = vector.load %arg6[%c0_11, %c0_12] : memref<32x32xf32, #tpu.memory_space<vmem>>, vector<32x32xf32>
    %cst_13 = arith.constant dense<0.000000e+00> : vector<256x32xf32>
    %13 = tpu.matmul %1, %12, %cst_13 {dimension_numbers = #tpu.dot_dimension_numbers<[1], [0], [0], [1], [0, 0, 1, 1], [], []>} : vector<256x32xf32>, vector<32x32xf32>, vector<256x32xf32> -> vector<256x32xf32>
    %c0_14 = arith.constant 0 : index
    %c0_15 = arith.constant 0 : index
    %14 = vector.load %arg7[%c0_14, %c0_15] : memref<1x32xf32, #tpu.memory_space<vmem>>, vector<1x32xf32>
    %15 = vector.broadcast %14 : vector<1x32xf32> to vector<256x32xf32>
    %16 = arith.addf %13, %15 : vector<256x32xf32>
    %cst_16 = arith.constant dense<0.000000e+00> : vector<256x256xf32>
    %17 = tpu.matmul %6, %11, %cst_16 {dimension_numbers = #tpu.dot_dimension_numbers<[1], [1], [0], [0], [0, 0, 1, 0], [], []>} : vector<256x8xf32>, vector<256x8xf32>, vector<256x256xf32> -> vector<256x256xf32>
    %cst_17 = arith.constant dense<0xFF800000> : vector<256xf32>
    %18 = vector.multi_reduction <maximumf>, %17, %cst_17 [1] : vector<256x256xf32> to vector<256xf32>
    %19 = vector.shape_cast %18 : vector<256xf32> to vector<256x1xf32>
    %20 = vector.broadcast %19 : vector<256x1xf32> to vector<256x256xf32>
    %21 = arith.subf %17, %20 : vector<256x256xf32>
    %22 = math.exp %21 : vector<256x256xf32>
    %cst_18 = arith.constant dense<0.000000e+00> : vector<256xf32>
    %23 = vector.multi_reduction <add>, %22, %cst_18 [1] : vector<256x256xf32> to vector<256xf32>
    %24 = vector.shape_cast %23 : vector<256xf32> to vector<256x1xf32>
    %cst_19 = arith.constant dense<0.000000e+00> : vector<256x32xf32>
    %25 = tpu.matmul %22, %16, %cst_19 {dimension_numbers = #tpu.dot_dimension_numbers<[1], [0], [0], [1], [0, 0, 1, 1], [], []>} : vector<256x256xf32>, vector<256x32xf32>, vector<256x32xf32> -> vector<256x32xf32>
    %26 = vector.broadcast %24 : vector<256x1xf32> to vector<256x32xf32>
    %27 = arith.divf %25, %26 : vector<256x32xf32>
    %c0_20 = arith.constant 0 : index
    %28 = memref.load %arg8[%c0_20] : memref<1xf32, #tpu.memory_space<smem>>
    %29 = vector.broadcast %28 : f32 to vector<256x32xf32>
    %30 = arith.mulf %29, %27 : vector<256x32xf32>
    %31 = arith.addf %30, %1 : vector<256x32xf32>
    %c0_21 = arith.constant 0 : index
    %c0_22 = arith.constant 0 : index
    %c0_23 = arith.constant 0 : index
    %32 = vector.load %arg9[%c0_21, %c0_22, %c0_23] : memref<1x256x32xf32, #tpu.memory_space<vmem>>, vector<1x256x32xf32>
    %33 = vector.shape_cast %32 : vector<1x256x32xf32> to vector<256x32xf32>
    %34 = vector.shape_cast %31 : vector<256x32xf32> to vector<1x256x32xf32>
    tpu.vector_store %arg9[%c0_21, %c0_22, %c0_23], %34 {strides = array<i32>} : memref<1x256x32xf32, #tpu.memory_space<vmem>>, vector<1x256x32xf32>,
    return
  }
  func.func @transform_0(%arg0: i32) -> (i32, i32, i32) {
    %c0_i32 = arith.constant 0 : i32
    %c0_i32_0 = arith.constant 0 : i32
    %c0_i32_1 = arith.constant 0 : i32
    return %arg0, %c0_i32, %c0_i32_0 : i32, i32, i32
  }
  func.func @transform_1(%arg0: i32) -> (i32, i32) {
    %c0_i32 = arith.constant 0 : i32
    %c0_i32_0 = arith.constant 0 : i32
    %c0_i32_1 = arith.constant 0 : i32
    return %c0_i32, %c0_i32_0 : i32, i32
  }
  func.func @transform_2(%arg0: i32) -> (i32, i32) {
    %c0_i32 = arith.constant 0 : i32
    %c0_i32_0 = arith.constant 0 : i32
    %c0_i32_1 = arith.constant 0 : i32
    return %c0_i32, %c0_i32_0 : i32, i32
  }
  func.func @transform_3(%arg0: i32) -> (i32, i32) {
    %c0_i32 = arith.constant 0 : i32
    %c0_i32_0 = arith.constant 0 : i32
    %c0_i32_1 = arith.constant 0 : i32
    return %c0_i32, %c0_i32_0 : i32, i32
  }
  func.func @transform_4(%arg0: i32) -> (i32, i32) {
    %c0_i32 = arith.constant 0 : i32
    %c0_i32_0 = arith.constant 0 : i32
    %c0_i32_1 = arith.constant 0 : i32
    return %c0_i32, %c0_i32_0 : i32, i32
  }
  func.func @transform_5(%arg0: i32) -> (i32, i32) {
    %c0_i32 = arith.constant 0 : i32
    %c0_i32_0 = arith.constant 0 : i32
    %c0_i32_1 = arith.constant 0 : i32
    return %c0_i32, %c0_i32_0 : i32, i32
  }
  func.func @transform_6(%arg0: i32) -> (i32, i32) {
    %c0_i32 = arith.constant 0 : i32
    %c0_i32_0 = arith.constant 0 : i32
    %c0_i32_1 = arith.constant 0 : i32
    return %c0_i32, %c0_i32_0 : i32, i32
  }
  func.func @transform_7(%arg0: i32) -> i32 {
    %c0_i32 = arith.constant 0 : i32
    %c0_i32_0 = arith.constant 0 : i32
    return %c0_i32 : i32
  }
  func.func @transform_8(%arg0: i32) -> (i32, i32, i32) {
    %c0_i32 = arith.constant 0 : i32
    %c0_i32_0 = arith.constant 0 : i32
    %c0_i32_1 = arith.constant 0 : i32
    return %arg0, %c0_i32, %c0_i32_0 : i32, i32, i32
  }
}

module attributes {stable_mosaic.version = 11 : i64} {
  func.func @_conv_bn_relu_kernel(%arg0: i32, %arg1: memref<256x288xf32, #tpu.memory_space<vmem>>, %arg2: memref<288x32xf32, #tpu.memory_space<vmem>>, %arg3: memref<1x32xf32, #tpu.memory_space<vmem>>, %arg4: memref<256x32xf32, #tpu.memory_space<vmem>>) attributes {dimension_semantics = [#tpu.dimension_semantics<parallel>], iteration_bounds = array<i64: 2>, scalar_prefetch = 0 : i64, scratch_operands = 0 : i64, tpu.core_type = #tpu.core_type<tc>, window_params = [{transform_indices = @transform_0, window_bounds = array<i64: 256, 288>}, {pipeline_mode = #tpu.pipeline_mode<synchronous>, transform_indices = @transform_1, window_bounds = array<i64: 288, 32>}, {pipeline_mode = #tpu.pipeline_mode<synchronous>, transform_indices = @transform_2, window_bounds = array<i64: 1, 32>}, {transform_indices = @transform_3, window_bounds = array<i64: 256, 32>}]} {
    %c0 = arith.constant 0 : index
    %c0_0 = arith.constant 0 : index
    %0 = vector.load %arg1[%c0, %c0_0] : memref<256x288xf32, #tpu.memory_space<vmem>>, vector<256x288xf32>
    %c0_1 = arith.constant 0 : index
    %c0_2 = arith.constant 0 : index
    %1 = vector.load %arg2[%c0_1, %c0_2] : memref<288x32xf32, #tpu.memory_space<vmem>>, vector<288x32xf32>
    %cst = arith.constant dense<0.000000e+00> : vector<256x32xf32>
    %2 = tpu.matmul %0, %1, %cst {dimension_numbers = #tpu.dot_dimension_numbers<[1], [0], [0], [1], [0, 0, 1, 1], [], []>} : vector<256x288xf32>, vector<288x32xf32>, vector<256x32xf32> -> vector<256x32xf32>
    %c0_3 = arith.constant 0 : index
    %c0_4 = arith.constant 0 : index
    %3 = vector.load %arg3[%c0_3, %c0_4] : memref<1x32xf32, #tpu.memory_space<vmem>>, vector<1x32xf32>
    %4 = vector.broadcast %3 : vector<1x32xf32> to vector<256x32xf32>
    %5 = arith.addf %2, %4 : vector<256x32xf32>
    %cst_5 = arith.constant 0.000000e+00 : f32
    %6 = vector.broadcast %cst_5 : f32 to vector<256x32xf32>
    %7 = arith.maximumf %5, %6 : vector<256x32xf32>
    %c0_6 = arith.constant 0 : index
    %c0_7 = arith.constant 0 : index
    %8 = vector.load %arg4[%c0_6, %c0_7] : memref<256x32xf32, #tpu.memory_space<vmem>>, vector<256x32xf32>
    tpu.vector_store %arg4[%c0_6, %c0_7], %7 {strides = array<i32>} : memref<256x32xf32, #tpu.memory_space<vmem>>, vector<256x32xf32>,
    return
  }
  func.func @transform_0(%arg0: i32) -> (i32, i32) {
    %c0_i32 = arith.constant 0 : i32
    %c0_i32_0 = arith.constant 0 : i32
    return %arg0, %c0_i32 : i32, i32
  }
  func.func @transform_1(%arg0: i32) -> (i32, i32) {
    %c0_i32 = arith.constant 0 : i32
    %c0_i32_0 = arith.constant 0 : i32
    %c0_i32_1 = arith.constant 0 : i32
    return %c0_i32, %c0_i32_0 : i32, i32
  }
  func.func @transform_2(%arg0: i32) -> (i32, i32) {
    %c0_i32 = arith.constant 0 : i32
    %c0_i32_0 = arith.constant 0 : i32
    %c0_i32_1 = arith.constant 0 : i32
    return %c0_i32, %c0_i32_0 : i32, i32
  }
  func.func @transform_3(%arg0: i32) -> (i32, i32) {
    %c0_i32 = arith.constant 0 : i32
    %c0_i32_0 = arith.constant 0 : i32
    return %arg0, %c0_i32 : i32, i32
  }
}

</mosaic_0001>

<bundles_post_ra>
// kernel: attention_layer_forward.3
= control target key start
LH: loop header
LB: loop body
LE: loop exit
PB: predicated region body
PF: predicated region fallthrough
CT: control target
= control target key end

     0   :  { %s851_s12 = smov 0   ;;  %s1059_s0 = inlined_call_operand.vmem [shape: f32[512,36], index: 0, kind: input, shape index: {}]   ;;  %s1060_s1 = inlined_call_operand.vmem [shape: f32[36,32], index: 1, kind: input, shape index: {}]   ;;  %s1061_s2 = inlined_call_operand.vmem [shape: f32[1,32], index: 2, kind: input, shape index: {}]   ;;  %s1062_s3 = inlined_call_operand.vmem [shape: f32[512,32], index: 3, kind: output, shape index: {}]  }
   0x1 LB: > { %s665_s13 = sadd.s32 4294967295, %s829_s12   ;;  %p669_p0 = scmp.ge.s32.totalorder %s829_s12, 1  ;;  %s829_s12 = sphi %s851_s12, %s13_s12  }
   0x2   : > { %p138_p1 = scmp.lt.s32.totalorder %s829_s12, 3 }
   0x4   : > { %p139_p2 = pnand %p669_p0, %p138_p1 }
   0x5   : > { %s670_s18 = sshll.u32 (!%p139_p2), %s665_s13, 5 }
   0x6   : > { %142 = sbr.rel (%p139_p2) target bundleno = 251 (0xfb), region = 32  ;;  %p163_p3 = scmp.lt.s32.totalorder (!%p139_p2), %s670_s18, 63 }
   0xb   : > { %v210_v0 = vld [vmem:[%s1060_s1 + $0x20] sm:$0xf]  ;;  %vm315_vm0 = vcmask 1043456   ;;  %v209_v1 = vld [vmem:[%s1060_s1 + $0x18] sm:$0xff]  ;;  %v208_v2 = vld [vmem:[%s1060_s1 + $0x10] sm:$0xff]  ;;  %s1064_s18 = smov (!%p163_p3, %s670_s18), 63 }
   0xc   : > { %747 = vmatprep.subr.msk.mxu0 %vm315_vm0, %v210_v0  ;;  %805 = vmatprep.subr.msk.mxu1 %vm315_vm0, %v210_v0  ;;  %v207_v3 = vld [vmem:[%s1060_s1 + $0x8] sm:$0xff]  ;;  %s671_s23 = sshll.u32 %s1064_s18, 3  ;;  %v206_v4 = vld [vmem:[%s1060_s1] sm:$0xff]  ;;  %vm218_vm1 = vcmask 293888   ;;  %vm576_vm2 = vcmask 261120  }
   0xd   : > { %748 = vmatpush3.msk.msra.mxu0 %vm315_vm0, %v210_v0  ;;  %810 = vmatpush3.msk.msra.mxu1 %vm315_vm0, %v210_v0  ;;  %s882_s28 = scalar_lea.vmem %s1059_s0, %s671_s23  ;;  %v951_v37 = vld [vmem:[%s1061_s2] ss:$0 sm:$0xff]  ;;  %s960_s6 = scalar_lea.vmem %s1062_s3, %s671_s23 }
   0xe   : > { %749 = vmatprep.subr.mxu0 %v209_v1  ;;  %806 = vmatprep.subr.mxu1 %v209_v1  ;;  %v174_v5 = vld [vmem:[%s882_s28] sm:$0xff]  ;;  %v175_v7 = vld [vmem:[%s882_s28 + $0x8] sm:$0xff]  ;;  %v176_v9 = vld [vmem:[%s882_s28 + $0x10] sm:$0xff] }
   0xf   : > { %750 = vmatpush3.msra.mxu0 %v209_v1  ;;  %811 = vmatpush3.msra.mxu1 %v209_v1  ;;  %v190_v6 = vld [vmem:[%s882_s28 + $0x80] sm:$0xff]  ;;  %v191_v8 = vld [vmem:[%s882_s28 + $0x88] sm:$0xff]  ;;  %v192_v10 = vld [vmem:[%s882_s28 + $0x90] sm:$0xff] }
  0x10   : > { %751 = vmatprep.subr.mxu0 %v208_v2  ;;  %807 = vmatprep.subr.mxu1 %v208_v2  ;;  %v177_v11 = vld [vmem:[%s882_s28 + $0x18] sm:$0xff]  ;;  %v178_v13 = vld [vmem:[%s882_s28 + $0x20] sm:$0xff]  ;;  %v179_v15 = vld [vmem:[%s882_s28 + $0x28] sm:$0xff] }
  0x11   : > { %752 = vmatpush3.msra.mxu0 %v208_v2  ;;  %812 = vmatpush3.msra.mxu1 %v208_v2  ;;  %v193_v12 = vld [vmem:[%s882_s28 + $0x98] sm:$0xff]  ;;  %v194_v14 = vld [vmem:[%s882_s28 + $0xa0] sm:$0xff]  ;;  %v195_v16 = vld [vmem:[%s882_s28 + $0xa8] sm:$0xff] }
  0x12   : > { %753 = vmatprep.subr.mxu0 %v207_v3  ;;  %808 = vmatprep.subr.mxu1 %v207_v3  ;;  %v180_v17 = vld [vmem:[%s882_s28 + $0x30] sm:$0xff]  ;;  %v181_v19 = vld [vmem:[%s882_s28 + $0x38] sm:$0xff]  ;;  %v182_v21 = vld [vmem:[%s882_s28 + $0x40] sm:$0xff] }
  0x13   : > { %754 = vmatpush3.msra.mxu0 %v207_v3  ;;  %813 = vmatpush3.msra.mxu1 %v207_v3  ;;  %v196_v18 = vld [vmem:[%s882_s28 + $0xb0] sm:$0xff]  ;;  %v197_v20 = vld [vmem:[%s882_s28 + $0xb8] sm:$0xff]  ;;  %v198_v22 = vld [vmem:[%s882_s28 + $0xc0] sm:$0xff] }
  0x14   : > { %755 = vmatprep.subr.mxu0 %v206_v4  ;;  %809 = vmatprep.subr.mxu1 %v206_v4  ;;  %v183_v23 = vld [vmem:[%s882_s28 + $0x48] sm:$0xff]  ;;  %v184_v25 = vld [vmem:[%s882_s28 + $0x50] sm:$0xff]  ;;  %v185_v27 = vld [vmem:[%s882_s28 + $0x58] sm:$0xff] }
  0x15   : > { %756 = vmatpush3.msra.mxu0 %v206_v4  ;;  %814 = vmatpush3.msra.mxu1 %v206_v4  ;;  %v199_v24 = vld [vmem:[%s882_s28 + $0xc8] sm:$0xff]  ;;  %v200_v26 = vld [vmem:[%s882_s28 + $0xd0] sm:$0xff]  ;;  %v201_v28 = vld [vmem:[%s882_s28 + $0xd8] sm:$0xff] }
  0x16   : > { %757 = vmatprep.mubr.msk.f32.mxu0 %vm218_vm1, %v174_v5  ;;  %781 = vmatprep.mubr.msk.f32.mxu1 %vm218_vm1, %v190_v6  ;;  %v186_v29 = vld [vmem:[%s882_s28 + $0x60] sm:$0xff]  ;;  %v187_v31 = vld [vmem:[%s882_s28 + $0x68] sm:$0xff]  ;;  %v188_v33 = vld [vmem:[%s882_s28 + $0x70] sm:$0xff] }
  0x17   : > { %758 = vmatmul.mubr.msk.f32.vlgmr.msra.gmra.mxu0 %vm218_vm1, %v175_v7  ;;  %782 = vmatmul.mubr.msk.f32.vlgmr.msra.gmra.mxu1 %vm218_vm1, %v191_v8  ;;  %v202_v30 = vld [vmem:[%s882_s28 + $0xe0] sm:$0xff]  ;;  %v203_v32 = vld [vmem:[%s882_s28 + $0xe8] sm:$0xff]  ;;  %v204_v34 = vld [vmem:[%s882_s28 + $0xf0] sm:$0xff] }
  0x18   : > { %760 = vmatprep.mubr.msk.f32.mxu0 %vm218_vm1, %v176_v9  ;;  %784 = vmatprep.mubr.msk.f32.mxu1 %vm218_vm1, %v192_v10  ;;  %v189_v35 = vld [vmem:[%s882_s28 + $0x78] sm:$0xff] }
  0x19   : > { %v205_v36 = vld [vmem:[%s882_s28 + $0xf8] sm:$0xff] }
  0x1b   : > { %761 = vmatmul.mubr.msk.f32.gmra.mxu0 %vm218_vm1, %v177_v11  ;;  %785 = vmatmul.mubr.msk.f32.gmra.mxu1 %vm218_vm1, %v193_v12 }
  0x1c   : > { %763 = vmatprep.mubr.msk.f32.mxu0 %vm218_vm1, %v178_v13  ;;  %787 = vmatprep.mubr.msk.f32.mxu1 %vm218_vm1, %v194_v14 }
  0x1f   : > { %764 = vmatmul.mubr.msk.f32.gmra.mxu0 %vm218_vm1, %v179_v15  ;;  %788 = vmatmul.mubr.msk.f32.gmra.mxu1 %vm218_vm1, %v195_v16 }
  0x20   : > { %766 = vmatprep.mubr.msk.f32.mxu0 %vm218_vm1, %v180_v17  ;;  %790 = vmatprep.mubr.msk.f32.mxu1 %vm218_vm1, %v196_v18 }
  0x23   : > { %767 = vmatmul.mubr.msk.f32.gmra.mxu0 %vm218_vm1, %v181_v19  ;;  %791 = vmatmul.mubr.msk.f32.gmra.mxu1 %vm218_vm1, %v197_v20 }
  0x24   : > { %769 = vmatprep.mubr.msk.f32.mxu0 %vm218_vm1, %v182_v21  ;;  %793 = vmatprep.mubr.msk.f32.mxu1 %vm218_vm1, %v198_v22 }
  0x27   : > { %770 = vmatmul.mubr.msk.f32.gmra.mxu0 %vm218_vm1, %v183_v23  ;;  %794 = vmatmul.mubr.msk.f32.gmra.mxu1 %vm218_vm1, %v199_v24 }
  0x28   : > { %772 = vmatprep.mubr.msk.f32.mxu0 %vm218_vm1, %v184_v25  ;;  %796 = vmatprep.mubr.msk.f32.mxu1 %vm218_vm1, %v200_v26 }
  0x2b   : > { %773 = vmatmul.mubr.msk.f32.gmra.mxu0 %vm218_vm1, %v185_v27  ;;  %797 = vmatmul.mubr.msk.f32.gmra.mxu1 %vm218_vm1, %v201_v28 }
  0x2c   : > { %775 = vmatprep.mubr.msk.f32.mxu0 %vm218_vm1, %v186_v29  ;;  %799 = vmatprep.mubr.msk.f32.mxu1 %vm218_vm1, %v202_v30 }
  0x2f   : > { %776 = vmatmul.mubr.msk.f32.gmra.mxu0 %vm218_vm1, %v187_v31  ;;  %800 = vmatmul.mubr.msk.f32.gmra.mxu1 %vm218_vm1, %v203_v32 }
  0x30   : > { %778 = vmatprep.mubr.msk.f32.mxu0 %vm218_vm1, %v188_v33  ;;  %802 = vmatprep.mubr.msk.f32.mxu1 %vm218_vm1, %v204_v34 }
  0x33   : > { %779 = vmatmul.mubr.msk.f32.gmra.mxu0 %vm218_vm1, %v189_v35  ;;  %803 = vmatmul.mubr.msk.f32.gmra.mxu1 %vm218_vm1, %v205_v36 }
  0xd7   : > { %v759_v38 = vpop.f32.mrf.mxu0  ;;  %v783_v39 = vpop.f32.mrf.mxu1 }
  0xd8   : > { %v391_v40 = vadd.f32 %v759_v38, %v951_v37  ;;  %v471_v41 = vadd.f32 %v783_v39, %v951_v37 }
  0xd9   : > { %v385_v42 = vpop.f32.mrf.mxu0  ;;  %v465_v43 = vpop.f32.mrf.mxu1 }
  0xda   : > { %v545_v44 = vmax.f32 %v391_v40, 0.0  ;;  %v561_v45 = vmax.f32 %v471_v41, 0.0  ;;  %v386_v46 = vadd.f32 %v951_v37, %v385_v42  ;;  %v466_v47 = vadd.f32 %v951_v37, %v465_v43 }
  0xdb   : > { %v762_v48 = vpop.f32.mrf.mxu0  ;;  %v786_v49 = vpop.f32.mrf.mxu1 }
  0xdc   : > { %578 = vst.msk [vmem:[%s960_s6 + $0x8] sm:$0xff] %vm576_vm2, %v545_v44  ;;  %594 = vst.msk [vmem:[%s960_s6 + $0x88] sm:$0xff] %vm576_vm2, %v561_v45  ;;  %v544_v50 = vmax.f32 %v386_v46, 0.0  ;;  %v560_v51 = vmax.f32 %v466_v47, 0.0  ;;  %v401_v52 = vadd.f32 %v762_v48, %v951_v37  ;;  %v481_v53 = vadd.f32 %v786_v49, %v951_v37 }
  0xdd   : > { %v395_v54 = vpop.f32.mrf.mxu0  ;;  %v475_v55 = vpop.f32.mrf.mxu1 }
  0xde   : > { %577 = vst.msk [vmem:[%s960_s6] sm:$0xff] %vm576_vm2, %v544_v50  ;;  %593 = vst.msk [vmem:[%s960_s6 + $0x80] sm:$0xff] %vm576_vm2, %v560_v51  ;;  %v547_v56 = vmax.f32 %v401_v52, 0.0  ;;  %v563_v57 = vmax.f32 %v481_v53, 0.0  ;;  %v396_v58 = vadd.f32 %v951_v37, %v395_v54  ;;  %v476_v59 = vadd.f32 %v951_v37, %v475_v55 }
  0xdf   : > { %v765_v60 = vpop.f32.mrf.mxu0  ;;  %v789_v61 = vpop.f32.mrf.mxu1 }
  0xe0   : > { %580 = vst.msk [vmem:[%s960_s6 + $0x18] sm:$0xff] %vm576_vm2, %v547_v56  ;;  %596 = vst.msk [vmem:[%s960_s6 + $0x98] sm:$0xff] %vm576_vm2, %v563_v57  ;;  %v546_v62 = vmax.f32 %v396_v58, 0.0  ;;  %v562_v63 = vmax.f32 %v476_v59, 0.0  ;;  %v411_v0 = vadd.f32 %v765_v60, %v951_v37  ;;  %v491_v1 = vadd.f32 %v789_v61, %v951_v37 }
  0xe1   : > { %v405_v2 = vpop.f32.mrf.mxu0  ;;  %v485_v3 = vpop.f32.mrf.mxu1 }
  0xe2   : > { %579 = vst.msk [vmem:[%s960_s6 + $0x10] sm:$0xff] %vm576_vm2, %v546_v62  ;;  %595 = vst.msk [vmem:[%s960_s6 + $0x90] sm:$0xff] %vm576_vm2, %v562_v63  ;;  %v549_v4 = vmax.f32 %v411_v0, 0.0  ;;  %v565_v5 = vmax.f32 %v491_v1, 0.0  ;;  %v406_v6 = vadd.f32 %v951_v37, %v405_v2  ;;  %v486_v7 = vadd.f32 %v951_v37, %v485_v3 }
  0xe3   : > { %v768_v8 = vpop.f32.mrf.mxu0  ;;  %v792_v9 = vpop.f32.mrf.mxu1 }
  0xe4   : > { %582 = vst.msk [vmem:[%s960_s6 + $0x28] sm:$0xff] %vm576_vm2, %v549_v4  ;;  %598 = vst.msk [vmem:[%s960_s6 + $0xa8] sm:$0xff] %vm576_vm2, %v565_v5  ;;  %v548_v10 = vmax.f32 %v406_v6, 0.0  ;;  %v564_v11 = vmax.f32 %v486_v7, 0.0  ;;  %v421_v12 = vadd.f32 %v768_v8, %v951_v37  ;;  %v501_v13 = vadd.f32 %v792_v9, %v951_v37 }
  0xe5   : > { %v415_v14 = vpop.f32.mrf.mxu0  ;;  %v495_v15 = vpop.f32.mrf.mxu1 }
  0xe6   : > { %581 = vst.msk [vmem:[%s960_s6 + $0x20] sm:$0xff] %vm576_vm2, %v548_v10  ;;  %597 = vst.msk [vmem:[%s960_s6 + $0xa0] sm:$0xff] %vm576_vm2, %v564_v11  ;;  %v551_v16 = vmax.f32 %v421_v12, 0.0  ;;  %v567_v17 = vmax.f32 %v501_v13, 0.0  ;;  %v416_v18 = vadd.f32 %v951_v37, %v415_v14  ;;  %v496_v19 = vadd.f32 %v951_v37, %v495_v15 }
  0xe7   : > { %v771_v20 = vpop.f32.mrf.mxu0  ;;  %v795_v21 = vpop.f32.mrf.mxu1 }
  0xe8   : > { %584 = vst.msk [vmem:[%s960_s6 + $0x38] sm:$0xff] %vm576_vm2, %v551_v16  ;;  %600 = vst.msk [vmem:[%s960_s6 + $0xb8] sm:$0xff] %vm576_vm2, %v567_v17  ;;  %v550_v22 = vmax.f32 %v416_v18, 0.0  ;;  %v566_v23 = vmax.f32 %v496_v19, 0.0  ;;  %v431_v24 = vadd.f32 %v771_v20, %v951_v37  ;;  %v511_v25 = vadd.f32 %v795_v21, %v951_v37 }
  0xe9   : > { %v425_v26 = vpop.f32.mrf.mxu0  ;;  %v505_v27 = vpop.f32.mrf.mxu1 }
  0xea   : > { %583 = vst.msk [vmem:[%s960_s6 + $0x30] sm:$0xff] %vm576_vm2, %v550_v22  ;;  %599 = vst.msk [vmem:[%s960_s6 + $0xb0] sm:$0xff] %vm576_vm2, %v566_v23  ;;  %v553_v28 = vmax.f32 %v431_v24, 0.0  ;;  %v569_v29 = vmax.f32 %v511_v25, 0.0  ;;  %v426_v30 = vadd.f32 %v951_v37, %v425_v26  ;;  %v506_v31 = vadd.f32 %v951_v37, %v505_v27 }
  0xeb   : > { %v774_v32 = vpop.f32.mrf.mxu0  ;;  %v798_v33 = vpop.f32.mrf.mxu1 }
  0xec   : > { %586 = vst.msk [vmem:[%s960_s6 + $0x48] sm:$0xff] %vm576_vm2, %v553_v28  ;;  %602 = vst.msk [vmem:[%s960_s6 + $0xc8] sm:$0xff] %vm576_vm2, %v569_v29  ;;  %v552_v34 = vmax.f32 %v426_v30, 0.0  ;;  %v568_v35 = vmax.f32 %v506_v31, 0.0  ;;  %v441_v36 = vadd.f32 %v774_v32, %v951_v37  ;;  %v521_v38 = vadd.f32 %v798_v33, %v951_v37 }
  0xed   : > { %v435_v39 = vpop.f32.mrf.mxu0  ;;  %v515_v40 = vpop.f32.mrf.mxu1 }
  0xee   : > { %585 = vst.msk [vmem:[%s960_s6 + $0x40] sm:$0xff] %vm576_vm2, %v552_v34  ;;  %601 = vst.msk [vmem:[%s960_s6 + $0xc0] sm:$0xff] %vm576_vm2, %v568_v35  ;;  %v555_v41 = vmax.f32 %v441_v36, 0.0  ;;  %v571_v42 = vmax.f32 %v521_v38, 0.0  ;;  %v436_v43 = vadd.f32 %v951_v37, %v435_v39  ;;  %v516_v44 = vadd.f32 %v951_v37, %v515_v40 }
  0xef   : > { %v777_v45 = vpop.f32.mrf.mxu0  ;;  %v801_v46 = vpop.f32.mrf.mxu1 }
  0xf0   : > { %588 = vst.msk [vmem:[%s960_s6 + $0x58] sm:$0xff] %vm576_vm2, %v555_v41  ;;  %604 = vst.msk [vmem:[%s960_s6 + $0xd8] sm:$0xff] %vm576_vm2, %v571_v42  ;;  %v554_v47 = vmax.f32 %v436_v43, 0.0  ;;  %v570_v48 = vmax.f32 %v516_v44, 0.0  ;;  %v451_v49 = vadd.f32 %v777_v45, %v951_v37  ;;  %v531_v50 = vadd.f32 %v801_v46, %v951_v37 }
  0xf1   : > { %v445_v51 = vpop.f32.mrf.mxu0  ;;  %v525_v52 = vpop.f32.mrf.mxu1 }
  0xf2   : > { %587 = vst.msk [vmem:[%s960_s6 + $0x50] sm:$0xff] %vm576_vm2, %v554_v47  ;;  %603 = vst.msk [vmem:[%s960_s6 + $0xd0] sm:$0xff] %vm576_vm2, %v570_v48  ;;  %v557_v53 = vmax.f32 %v451_v49, 0.0  ;;  %v573_v54 = vmax.f32 %v531_v50, 0.0  ;;  %v446_v55 = vadd.f32 %v951_v37, %v445_v51  ;;  %v526_v56 = vadd.f32 %v951_v37, %v525_v52 }
  0xf3   : > { %v780_v57 = vpop.f32.mrf.mxu0  ;;  %v804_v58 = vpop.f32.mrf.mxu1 }
  0xf4   : > { %590 = vst.msk [vmem:[%s960_s6 + $0x68] sm:$0xff] %vm576_vm2, %v557_v53  ;;  %606 = vst.msk [vmem:[%s960_s6 + $0xe8] sm:$0xff] %vm576_vm2, %v573_v54  ;;  %v556_v59 = vmax.f32 %v446_v55, 0.0  ;;  %v572_v60 = vmax.f32 %v526_v56, 0.0  ;;  %v461_v61 = vadd.f32 %v780_v57, %v951_v37  ;;  %v541_v62 = vadd.f32 %v804_v58, %v951_v37 }
  0xf5   : > { %v455_v63 = vpop.f32.mrf.mxu0  ;;  %v535_v0 = vpop.f32.mrf.mxu1 }
  0xf6   : > { %589 = vst.msk [vmem:[%s960_s6 + $0x60] sm:$0xff] %vm576_vm2, %v556_v59  ;;  %605 = vst.msk [vmem:[%s960_s6 + $0xe0] sm:$0xff] %vm576_vm2, %v572_v60  ;;  %v559_v1 = vmax.f32 %v461_v61, 0.0  ;;  %v575_v2 = vmax.f32 %v541_v62, 0.0  ;;  %v456_v3 = vadd.f32 %v951_v37, %v455_v63  ;;  %v536_v4 = vadd.f32 %v951_v37, %v535_v0 }
  0xf8   : > { %592 = vst.msk [vmem:[%s960_s6 + $0x78] sm:$0xff] %vm576_vm2, %v559_v1  ;;  %608 = vst.msk [vmem:[%s960_s6 + $0xf8] sm:$0xff] %vm576_vm2, %v575_v2  ;;  %v558_v5 = vmax.f32 %v456_v3, 0.0  ;;  %v574_v6 = vmax.f32 %v536_v4, 0.0 }
  0xfa   : > { %591 = vst.msk [vmem:[%s960_s6 + $0x70] sm:$0xff] %vm576_vm2, %v558_v5  ;;  %607 = vst.msk [vmem:[%s960_s6 + $0xf0] sm:$0xff] %vm576_vm2, %v574_v6 }
  0xfb PF: > { %s13_s12 = sadd.s32 1, %s829_s12  }
  0xfc   : > { %p10_p4 = scmp.ge.s32.totalorder %s13_s12, 4  }
  0xfe   :  { %12 = sbr.rel (!%p10_p4) target bundleno = 1 (0x1), region = 62 }

// kernel: attention_layer_forward.5
= control target key start
LH: loop header
LB: loop body
LE: loop exit
PB: predicated region body
PF: predicated region fallthrough
CT: control target
= control target key end

     0   :  { %8 = vsyncpa [#allocation3], 0  ;;  %s1870_s0 = inlined_call_operand.vmem [shape: f32[512,288], index: 0, kind: input, shape index: {}]   ;;  %s1871_s1 = inlined_call_operand.vmem [shape: f32[288,32], index: 1, kind: input, shape index: {}]   ;;  %s1872_s2 = inlined_call_operand.vmem [shape: f32[1,32], index: 2, kind: input, shape index: {}]   ;;  %s1873_s3 = inlined_call_operand.hbm [shape: f32[512,32], index: 3, kind: output, shape index: {}]  }
   0x1   :  { %10 = vsyncpa [#allocation3 + $0x1], 0  ;;  %s1332_s12 = smov 0   ;;  %s1334_s13 = smov 0  }
   0x2   :  { %s1336_s14 = smov 0   ;;  %s1338_s15 = smov 0  }
   0x3 LB: > { %s1353_s16 = sadd.s32 4294967295, %s1306_s15   ;;  %s1001_s17 = sadd.s32 4294967294, %s1306_s15   ;;  %s1306_s15 = sphi %s1338_s15, %s1879_s15   ;;  %s1302_s14 = sphi %s1336_s14, %s1878_s14   ;;  %s1298_s13 = sphi %s1334_s13, %s1877_s13   ;;  %s1294_s12 = sphi %s1332_s12, %s1876_s12  }
   0x4   : > { %s1357_s18 = sadd.s32 1, %s1306_s15   ;;  %s91_s19 = sadd.s32 1, %s1302_s14 }
   0x5   : > { %s88_s20 = ssub.s32 %s1306_s15, %s1357_s18  ;;  %p101_p0 = scmp.ne.s32.totalorder %s1302_s14, %s1298_s13 }
   0x6   : > { %p89_p1 = scmp.eq.s32.totalorder %s88_s20, 0  ;;  %p102_p2 = scmp.eq.s32.totalorder %s1353_s16, 1 }
   0x7   : > { %p107_p3 = scmp.ne.s32.totalorder %s1298_s13, %s1294_s12  ;;  %p108_p4 = scmp.eq.s32.totalorder %s1001_s17, 1 }
   0x8   : > { %s1368_s21 = scalar_select %p89_p1, %s1302_s14, %s91_s19  }
   0x9   : > { %p1370_p5 = por %p102_p2, %p101_p0  ;;  %p1374_p6 = por %p108_p4, %p107_p3 }
   0xa   : > { %p1004_p7 = scmp.ge.s32.totalorder %s1306_s15, 1  ;;  %p142_p8 = scmp.lt.s32.totalorder %s1306_s15, 3 }
   0xc   : > { %p143_p9 = pnand %p1004_p7, %p142_p8 }
   0xd   : > { %s1006_s7 = sshll.u32 (!%p143_p9), %s1353_s16, 5  ;;  %s1309_s19 = smov (!%p143_p9), [#allocation2]  }
   0xe   : > { %146 = sbr.rel (%p143_p9) target bundleno = 390 (0x186), region = 32  ;;  %p168_p10 = scmp.lt.s32.totalorder (!%p143_p9), %s1006_s7, 63 }
   0xf   : > { %s1250_s20 = sshll.u32 (!%p143_p9), %s1309_s19, 4  ;;  %s1251_s20 = int_to_ptr.vmem [resolvable:$false] %s1250_s20 }
  0x10   : > { %s1252_s24 = scalar_lea.vmem (!%p143_p9), %s1251_s20, 8192 }
  0x13   : > { %v286_v0 = vld [vmem:[%s1871_s1 + $0x78] sm:$0xff]  ;;  %v1308_v1 = vmov 0.0   ;;  %v285_v2 = vld [vmem:[%s1871_s1 + $0x70] sm:$0xff]  ;;  %v284_v3 = vld [vmem:[%s1871_s1 + $0x68] sm:$0xff]  ;;  %s1881_s7 = smov (!%p168_p10, %s1006_s7), 63  ;;  %vm314_vm0 = vcmask 261120  }
  0x14   : > { %411 = vmatprep.subr.mxu0 %v1308_v1  ;;  %1139 = vmatprep.subr.mxu1 %v1308_v1  ;;  %v283_v4 = vld [vmem:[%s1871_s1 + $0x60] sm:$0xff]  ;;  %v282_v5 = vld [vmem:[%s1871_s1 + $0x58] sm:$0xff]  ;;  %v281_v6 = vld [vmem:[%s1871_s1 + $0x50] sm:$0xff]  ;;  %s1203_s29 = smul.u32 24, %s1881_s7  ;;  %s1046_s7 = sshll.u32 %s1353_s16, 12 }
  0x15   : > { %412 = vmatpush1.msra.mxu0 %v286_v0  ;;  %1171 = vmatpush1.msra.mxu1 %v286_v0  ;;  %v280_v7 = vld [vmem:[%s1871_s1 + $0x48] sm:$0xff]  ;;  %v279_v8 = vld [vmem:[%s1871_s1 + $0x40] sm:$0xff]  ;;  %v278_v9 = vld [vmem:[%s1871_s1 + $0x38] sm:$0xff]  ;;  %s1818_s11 = scalar_lea.hbm %s1873_s3, %s1046_s7 }
  0x16   : > { %413 = vmatprep.subr.mxu0 %v1308_v1  ;;  %1140 = vmatprep.subr.mxu1 %v1308_v1  ;;  %v277_v10 = vld [vmem:[%s1871_s1 + $0x30] sm:$0xff]  ;;  %v276_v11 = vld [vmem:[%s1871_s1 + $0x28] sm:$0xff]  ;;  %v275_v12 = vld [vmem:[%s1871_s1 + $0x20] sm:$0xff]  ;;  %s1537_s9 = scalar_lea.vmem %s1870_s0, %s1203_s29  ;;  %s164_s29 = sand.u32 1, %s1298_s13  }
  0x17   : > { %414 = vmatpush1.msra.mxu0 %v285_v2  ;;  %1172 = vmatpush1.msra.mxu1 %v285_v2  ;;  %v274_v13 = vld [vmem:[%s1871_s1 + $0x18] sm:$0xff]  ;;  %v273_v14 = vld [vmem:[%s1871_s1 + $0x10] sm:$0xff]  ;;  %v272_v15 = vld [vmem:[%s1871_s1 + $0x8] sm:$0xff]  ;;  %s1005_s5 = sshll.u32 %s164_s29, 8  ;;  %s1830_s16 = scalar_lea.sflag [#allocation3], %s164_s29 }
  0x18   : > { %415 = vmatprep.subr.mxu0 %v1308_v1  ;;  %1141 = vmatprep.subr.mxu1 %v1308_v1  ;;  %v271_v16 = vld [vmem:[%s1871_s1] sm:$0xff]  ;;  %v302_v17 = vld [vmem:[%s1871_s1 + $0xf8] sm:$0xff]  ;;  %v301_v18 = vld [vmem:[%s1871_s1 + $0xf0] sm:$0xff]  ;;  %s1714_s6 = scalar_lea.vmem [#allocation2], %s1005_s5 }
  0x19   : > { %416 = vmatpush1.msra.mxu0 %v284_v3  ;;  %1173 = vmatpush1.msra.mxu1 %v284_v3  ;;  %v300_v19 = vld [vmem:[%s1871_s1 + $0xe8] sm:$0xff]  ;;  %v299_v20 = vld [vmem:[%s1871_s1 + $0xe0] sm:$0xff]  ;;  %v298_v21 = vld [vmem:[%s1871_s1 + $0xd8] sm:$0xff]  ;;  %s939_s8 = sshll.u32 %s1714_s6, 4  ;;  %s1820_s8 = int_to_ptr.vmem [resolvable:$true] %s939_s8 }
  0x1a   : > { %417 = vmatprep.subr.mxu0 %v1308_v1  ;;  %1142 = vmatprep.subr.mxu1 %v1308_v1  ;;  %v297_v22 = vld [vmem:[%s1871_s1 + $0xd0] sm:$0xff]  ;;  %v296_v23 = vld [vmem:[%s1871_s1 + $0xc8] sm:$0xff]  ;;  %v295_v24 = vld [vmem:[%s1871_s1 + $0xc0] sm:$0xff]  ;;  %s1246_s17 = scalar_lea.vmem %s1820_s8, 4096  ;;  %p1253_p0 = scmp.lt.s32.totalorder %s1820_s8, %s1251_s20 }
  0x1b   : > { %418 = vmatpush1.msra.mxu0 %v283_v4  ;;  %1174 = vmatpush1.msra.mxu1 %v283_v4  ;;  %v294_v25 = vld [vmem:[%s1871_s1 + $0xb8] sm:$0xff]  ;;  %v293_v26 = vld [vmem:[%s1871_s1 + $0xb0] sm:$0xff]  ;;  %v292_v27 = vld [vmem:[%s1871_s1 + $0xa8] sm:$0xff]  ;;  %p1247_p11 = scmp.ne.s32.totalorder %s1820_s8, %s1246_s17  ;;  %p1254_p1 = scmp.lt.s32.totalorder %s1252_s24, %s1246_s17 }
  0x1c   : > { %419 = vmatprep.subr.mxu0 %v1308_v1  ;;  %1143 = vmatprep.subr.mxu1 %v1308_v1  ;;  %v291_v28 = vld [vmem:[%s1871_s1 + $0xa0] sm:$0xff]  ;;  %v290_v29 = vld [vmem:[%s1871_s1 + $0x98] sm:$0xff]  ;;  %v289_v30 = vld [vmem:[%s1871_s1 + $0x90] sm:$0xff] }
  0x1d   : > { %420 = vmatpush1.msra.mxu0 %v282_v5  ;;  %1175 = vmatpush1.msra.mxu1 %v282_v5  ;;  %v288_v31 = vld [vmem:[%s1871_s1 + $0x88] sm:$0xff]  ;;  %v287_v32 = vld [vmem:[%s1871_s1 + $0x80] sm:$0xff]  ;;  %v306_v37 = vld [vmem:[%s1871_s1 + $0x118] sm:$0xff]  ;;  %p1248_p12 = pnand %p1247_p11, %p1370_p5  ;;  %p1255_p2 = por %p1254_p1, %p1253_p0 }
  0x1e   : > { %421 = vmatprep.subr.mxu0 %v1308_v1  ;;  %1144 = vmatprep.subr.mxu1 %v1308_v1  ;;  %v176_v33 = vld [vmem:[%s1537_s9 + $0x8] sm:$0xff]  ;;  %v175_v35 = vld [vmem:[%s1537_s9] sm:$0xff]  ;;  %v305_v40 = vld [vmem:[%s1871_s1 + $0x110] sm:$0xff] }
  0x1f   : > { %422 = vmatpush1.msra.mxu0 %v281_v6  ;;  %1176 = vmatpush1.msra.mxu1 %v281_v6  ;;  %v248_v34 = vld [vmem:[%s1537_s9 + $0x248] sm:$0xff]  ;;  %v247_v36 = vld [vmem:[%s1537_s9 + $0x240] sm:$0xff]  ;;  %v178_v41 = vld [vmem:[%s1537_s9 + $0x18] sm:$0xff]  ;;  %p1249_p13 = pneg %p1248_p12 }
  0x20   : > { %423 = vmatprep.subr.mxu0 %v1308_v1  ;;  %1145 = vmatprep.subr.mxu1 %v1308_v1  ;;  %v179_v38 = vld [vmem:[%s1537_s9 + $0x20] sm:$0xff]  ;;  %v250_v42 = vld [vmem:[%s1537_s9 + $0x258] sm:$0xff]  ;;  %v304_v45 = vld [vmem:[%s1871_s1 + $0x108] sm:$0xff] }
  0x21   : > { %424 = vmatpush1.msra.mxu0 %v280_v7  ;;  %1177 = vmatpush1.msra.mxu1 %v280_v7  ;;  %v251_v39 = vld [vmem:[%s1537_s9 + $0x260] sm:$0xff]  ;;  %v182_v43 = vld [vmem:[%s1537_s9 + $0x38] sm:$0xff]  ;;  %v181_v46 = vld [vmem:[%s1537_s9 + $0x30] sm:$0xff]  ;;  %p1256_p3 = pnand %p1255_p2, %p1249_p13 }
  0x22   : > { %425 = vmatprep.subr.mxu0 %v1308_v1  ;;  %1146 = vmatprep.subr.mxu1 %v1308_v1  ;;  %v254_v44 = vld [vmem:[%s1537_s9 + $0x278] sm:$0xff]  ;;  %v253_v47 = vld [vmem:[%s1537_s9 + $0x270] sm:$0xff]  ;;  %v303_v50 = vld [vmem:[%s1871_s1 + $0x100] sm:$0xff] }
  0x23   : > { %426 = vmatpush1.msra.mxu0 %v279_v8  ;;  %1178 = vmatpush1.msra.mxu1 %v279_v8  ;;  %v185_v48 = vld [vmem:[%s1537_s9 + $0x50] sm:$0xff]  ;;  %v184_v51 = vld [vmem:[%s1537_s9 + $0x48] sm:$0xff]  ;;  %v187_v55 = vld [vmem:[%s1537_s9 + $0x60] sm:$0xff] }
  0x24   : > { %427 = vmatprep.subr.mxu0 %v1308_v1  ;;  %1147 = vmatprep.subr.mxu1 %v1308_v1  ;;  %v257_v49 = vld [vmem:[%s1537_s9 + $0x290] sm:$0xff]  ;;  %v256_v52 = vld [vmem:[%s1537_s9 + $0x288] sm:$0xff]  ;;  %v259_v56 = vld [vmem:[%s1537_s9 + $0x2a0] sm:$0xff] }
  0x25   : > { %428 = vmatpush1.msra.mxu0 %v278_v9  ;;  %1179 = vmatpush1.msra.mxu1 %v278_v9  ;;  %v188_v53 = vld [vmem:[%s1537_s9 + $0x68] sm:$0xff]  ;;  %v191_v57 = vld [vmem:[%s1537_s9 + $0x80] sm:$0xff]  ;;  %v190_v59 = vld [vmem:[%s1537_s9 + $0x78] sm:$0xff] }
  0x26   : > { %429 = vmatprep.subr.mxu0 %v1308_v1  ;;  %1148 = vmatprep.subr.mxu1 %v1308_v1  ;;  %v260_v54 = vld [vmem:[%s1537_s9 + $0x2a8] sm:$0xff]  ;;  %v263_v58 = vld [vmem:[%s1537_s9 + $0x2c0] sm:$0xff]  ;;  %v262_v60 = vld [vmem:[%s1537_s9 + $0x2b8] sm:$0xff] }
  0x27   : > { %430 = vmatpush1.msra.mxu0 %v277_v10  ;;  %1180 = vmatpush1.msra.mxu1 %v277_v10  ;;  %v194_v61 = vld [vmem:[%s1537_s9 + $0x98] sm:$0xff]  ;;  %v193_v63 = vld [vmem:[%s1537_s9 + $0x90] sm:$0xff]  ;;  %v196_v3 = vld [vmem:[%s1537_s9 + $0xa8] sm:$0xff] }
  0x28   : > { %431 = vmatprep.subr.mxu0 %v1308_v1  ;;  %1149 = vmatprep.subr.mxu1 %v1308_v1  ;;  %v266_v62 = vld [vmem:[%s1537_s9 + $0x2d8] sm:$0xff]  ;;  %v265_v0 = vld [vmem:[%s1537_s9 + $0x2d0] sm:$0xff]  ;;  %v268_v4 = vld [vmem:[%s1537_s9 + $0x2e8] sm:$0xff] }
  0x29   : > { %432 = vmatpush1.msra.mxu0 %v276_v11  ;;  %1181 = vmatpush1.msra.mxu1 %v276_v11  ;;  %v269_v2 = vld [vmem:[%s1537_s9 + $0x2f0] sm:$0xff]  ;;  %v200_v5 = vld [vmem:[%s1537_s9 + $0xc8] sm:$0xff]  ;;  %v199_v7 = vld [vmem:[%s1537_s9 + $0xc0] sm:$0xff] }
  0x2a   : > { %433 = vmatprep.subr.mxu0 %v1308_v1  ;;  %1150 = vmatprep.subr.mxu1 %v1308_v1  ;;  %v177_v6 = vld [vmem:[%s1537_s9 + $0x10] sm:$0xff]  ;;  %v180_v8 = vld [vmem:[%s1537_s9 + $0x28] sm:$0xff]  ;;  %v203_v9 = vld [vmem:[%s1537_s9 + $0xe0] sm:$0xff] }
  0x2b   : > { %434 = vmatpush1.msra.mxu0 %v275_v12  ;;  %1182 = vmatpush1.msra.mxu1 %v275_v12  ;;  %v183_v10 = vld [vmem:[%s1537_s9 + $0x40] sm:$0xff]  ;;  %v202_v11 = vld [vmem:[%s1537_s9 + $0xd8] sm:$0xff] }
  0x2c   : > { %435 = vmatprep.subr.mxu0 %v1308_v1  ;;  %1151 = vmatprep.subr.mxu1 %v1308_v1  ;;  %v186_v12 = vld [vmem:[%s1537_s9 + $0x58] sm:$0xff] }
  0x2d   : > { %436 = vmatpush1.msra.mxu0 %v274_v13  ;;  %1183 = vmatpush1.msra.mxu1 %v274_v13  ;;  %v206_v13 = vld [vmem:[%s1537_s9 + $0xf8] sm:$0xff] }
  0x2e   : > { %437 = vmatprep.subr.mxu0 %v1308_v1  ;;  %1152 = vmatprep.subr.mxu1 %v1308_v1 }
  0x2f   : > { %438 = vmatpush1.msra.mxu0 %v273_v14  ;;  %1184 = vmatpush1.msra.mxu1 %v273_v14  ;;  %v189_v14 = vld [vmem:[%s1537_s9 + $0x70] sm:$0xff] }
  0x30   : > { %439 = vmatprep.subr.mxu0 %v1308_v1  ;;  %1153 = vmatprep.subr.mxu1 %v1308_v1 }
  0x31   : > { %440 = vmatpush1.msra.mxu0 %v272_v15  ;;  %1185 = vmatpush1.msra.mxu1 %v272_v15  ;;  %v205_v15 = vld [vmem:[%s1537_s9 + $0xf0] sm:$0xff] }
  0x32   : > { %441 = vmatprep.subr.mxu0 %v1308_v1  ;;  %1154 = vmatprep.subr.mxu1 %v1308_v1 }
  0x33   : > { %442 = vmatpush1.msra.mxu0 %v271_v16  ;;  %1186 = vmatpush1.msra.mxu1 %v271_v16  ;;  %v192_v16 = vld [vmem:[%s1537_s9 + $0x88] sm:$0xff] }
  0x34   : > { %443 = vmatprep.subr.mxu0 %v1308_v1  ;;  %1155 = vmatprep.subr.mxu1 %v1308_v1 }
  0x35   : > { %444 = vmatpush2.msra.mxu0 %v302_v17  ;;  %1187 = vmatpush2.msra.mxu1 %v302_v17  ;;  %v209_v17 = vld [vmem:[%s1537_s9 + $0x110] sm:$0xff] }
  0x36   : > { %445 = vmatprep.subr.mxu0 %v1308_v1  ;;  %1156 = vmatprep.subr.mxu1 %v1308_v1 }
  0x37   : > { %446 = vmatpush2.msra.mxu0 %v301_v18  ;;  %1188 = vmatpush2.msra.mxu1 %v301_v18  ;;  %v195_v18 = vld [vmem:[%s1537_s9 + $0xa0] sm:$0xff] }
  0x38   : > { %447 = vmatprep.subr.mxu0 %v1308_v1  ;;  %1157 = vmatprep.subr.mxu1 %v1308_v1 }
  0x39   : > { %448 = vmatpush2.msra.mxu0 %v300_v19  ;;  %1189 = vmatpush2.msra.mxu1 %v300_v19  ;;  %v208_v19 = vld [vmem:[%s1537_s9 + $0x108] sm:$0xff] }
  0x3a   : > { %449 = vmatprep.subr.mxu0 %v1308_v1  ;;  %1158 = vmatprep.subr.mxu1 %v1308_v1 }
  0x3b   : > { %450 = vmatpush2.msra.mxu0 %v299_v20  ;;  %1190 = vmatpush2.msra.mxu1 %v299_v20  ;;  %v198_v20 = vld [vmem:[%s1537_s9 + $0xb8] sm:$0xff] }
  0x3c   : > { %451 = vmatprep.subr.mxu0 %v1308_v1  ;;  %1159 = vmatprep.subr.mxu1 %v1308_v1 }
  0x3d   : > { %452 = vmatpush2.msra.mxu0 %v298_v21  ;;  %1191 = vmatpush2.msra.mxu1 %v298_v21  ;;  %v212_v21 = vld [vmem:[%s1537_s9 + $0x128] sm:$0xff] }
  0x3e   : > { %453 = vmatprep.subr.mxu0 %v1308_v1  ;;  %1160 = vmatprep.subr.mxu1 %v1308_v1 }
  0x3f   : > { %454 = vmatpush2.msra.mxu0 %v297_v22  ;;  %1192 = vmatpush2.msra.mxu1 %v297_v22  ;;  %v201_v22 = vld [vmem:[%s1537_s9 + $0xd0] sm:$0xff] }
  0x40   : > { %455 = vmatprep.subr.mxu0 %v1308_v1  ;;  %1161 = vmatprep.subr.mxu1 %v1308_v1 }
  0x41   : > { %456 = vmatpush2.msra.mxu0 %v296_v23  ;;  %1193 = vmatpush2.msra.mxu1 %v296_v23  ;;  %v211_v23 = vld [vmem:[%s1537_s9 + $0x120] sm:$0xff] }
  0x42   : > { %457 = vmatprep.subr.mxu0 %v1308_v1  ;;  %1162 = vmatprep.subr.mxu1 %v1308_v1 }
  0x43   : > { %458 = vmatpush2.msra.mxu0 %v295_v24  ;;  %1194 = vmatpush2.msra.mxu1 %v295_v24  ;;  %v204_v24 = vld [vmem:[%s1537_s9 + $0xe8] sm:$0xff] }
  0x44   : > { %459 = vmatprep.subr.mxu0 %v1308_v1  ;;  %1163 = vmatprep.subr.mxu1 %v1308_v1 }
  0x45   : > { %460 = vmatpush2.msra.mxu0 %v294_v25  ;;  %1195 = vmatpush2.msra.mxu1 %v294_v25  ;;  %v215_v25 = vld [vmem:[%s1537_s9 + $0x140] sm:$0xff] }
  0x46   : > { %461 = vmatprep.subr.mxu0 %v1308_v1  ;;  %1164 = vmatprep.subr.mxu1 %v1308_v1 }
  0x47   : > { %462 = vmatpush2.msra.mxu0 %v293_v26  ;;  %1196 = vmatpush2.msra.mxu1 %v293_v26  ;;  %v207_v26 = vld [vmem:[%s1537_s9 + $0x100] sm:$0xff] }
  0x48   : > { %463 = vmatprep.subr.mxu0 %v1308_v1  ;;  %1165 = vmatprep.subr.mxu1 %v1308_v1 }
  0x49   : > { %464 = vmatpush2.msra.mxu0 %v292_v27  ;;  %1197 = vmatpush2.msra.mxu1 %v292_v27  ;;  %v214_v27 = vld [vmem:[%s1537_s9 + $0x138] sm:$0xff] }
  0x4a   : > { %465 = vmatprep.subr.mxu0 %v1308_v1  ;;  %1166 = vmatprep.subr.mxu1 %v1308_v1 }
  0x4b   : > { %466 = vmatpush2.msra.mxu0 %v291_v28  ;;  %1198 = vmatpush2.msra.mxu1 %v291_v28  ;;  %v210_v28 = vld [vmem:[%s1537_s9 + $0x118] sm:$0xff] }
  0x4c   : > { %467 = vmatprep.subr.mxu0 %v1308_v1  ;;  %1167 = vmatprep.subr.mxu1 %v1308_v1 }
  0x4d   : > { %468 = vmatpush2.msra.mxu0 %v290_v29  ;;  %1199 = vmatpush2.msra.mxu1 %v290_v29  ;;  %v218_v29 = vld [vmem:[%s1537_s9 + $0x158] sm:$0xff] }
  0x4e   : > { %469 = vmatprep.subr.mxu0 %v1308_v1  ;;  %1168 = vmatprep.subr.mxu1 %v1308_v1 }
  0x4f   : > { %470 = vmatpush2.msra.mxu0 %v289_v30  ;;  %1200 = vmatpush2.msra.mxu1 %v289_v30  ;;  %v213_v30 = vld [vmem:[%s1537_s9 + $0x130] sm:$0xff] }
  0x50   : > { %471 = vmatprep.subr.mxu0 %v1308_v1  ;;  %1169 = vmatprep.subr.mxu1 %v1308_v1 }
  0x51   : > { %472 = vmatpush2.msra.mxu0 %v288_v31  ;;  %1201 = vmatpush2.msra.mxu1 %v288_v31  ;;  %v217_v31 = vld [vmem:[%s1537_s9 + $0x150] sm:$0xff] }
  0x52   : > { %473 = vmatprep.subr.mxu0 %v1308_v1  ;;  %1170 = vmatprep.subr.mxu1 %v1308_v1  ;;  %v197_v1 = vld [vmem:[%s1537_s9 + $0xb0] sm:$0xff] }
  0x53   : > { %474 = vmatpush2.msra.mxu0 %v287_v32  ;;  %1202 = vmatpush2.msra.mxu1 %v287_v32  ;;  %v216_v32 = vld [vmem:[%s1537_s9 + $0x148] sm:$0xff] }
  0x54   : > { %475 = vmatprep.mubr.f32.mxu0 %v176_v33  ;;  %595 = vmatprep.mubr.f32.mxu1 %v248_v34  ;;  %v221_v33 = vld [vmem:[%s1537_s9 + $0x170] sm:$0xff]  ;;  %v219_v34 = vld [vmem:[%s1537_s9 + $0x160] sm:$0xff] }
  0x55   : > { %476 = vmatmul.mubr.f32.vlgmr.msra.gmra.mxu0 %v175_v35  ;;  %596 = vmatmul.mubr.f32.vlgmr.msra.gmra.mxu1 %v247_v36  ;;  %v220_v35 = vld [vmem:[%s1537_s9 + $0x168] sm:$0xff]  ;;  %v222_v36 = vld [vmem:[%s1537_s9 + $0x178] sm:$0xff] }
  0x56   : > { %1083 = vmatprep.subr.mxu1 %v306_v37  ;;  %480 = vmatprep.mubr.f32.mxu0 %v179_v38  ;;  %v225_v38 = vld [vmem:[%s1537_s9 + $0x190] sm:$0xff] }
  0x57   : > { %1084 = vmatpush3.msra.mxu1 %v306_v37  ;;  %600 = vmatprep.mubr.f32.mxu1 %v251_v39  ;;  %v224_v37 = vld [vmem:[%s1537_s9 + $0x188] sm:$0xff]  ;;  %v223_v39 = vld [vmem:[%s1537_s9 + $0x180] sm:$0xff] }
  0x58   : > { %1085 = vmatprep.subr.mxu1 %v305_v40 }
  0x59   : > { %481 = vmatmul.mubr.f32.gmra.mxu0 %v178_v41  ;;  %601 = vmatmul.mubr.f32.gmra.mxu1 %v250_v42  ;;  %v227_v41 = vld [vmem:[%s1537_s9 + $0x1a0] sm:$0xff] }
  0x5a   : > { %485 = vmatprep.mubr.f32.mxu0 %v182_v43  ;;  %605 = vmatprep.mubr.f32.mxu1 %v254_v44  ;;  %v231_v42 = vld [vmem:[%s1537_s9 + $0x1c0] sm:$0xff]  ;;  %v226_v43 = vld [vmem:[%s1537_s9 + $0x198] sm:$0xff] }
  0x5b   : > { %1086 = vmatpush3.msra.mxu1 %v305_v40  ;;  %v228_v40 = vld [vmem:[%s1537_s9 + $0x1a8] sm:$0xff]  ;;  %v234_v44 = vld [vmem:[%s1537_s9 + $0x1d8] sm:$0xff] }
  0x5c   : > { %1087 = vmatprep.subr.mxu1 %v304_v45 }
  0x5d   : > { %486 = vmatmul.mubr.f32.gmra.mxu0 %v181_v46  ;;  %606 = vmatmul.mubr.f32.gmra.mxu1 %v253_v47  ;;  %v237_v46 = vld [vmem:[%s1537_s9 + $0x1f0] sm:$0xff] }
  0x5e   : > { %490 = vmatprep.mubr.f32.mxu0 %v185_v48  ;;  %610 = vmatprep.mubr.f32.mxu1 %v257_v49  ;;  %v229_v47 = vld [vmem:[%s1537_s9 + $0x1b0] sm:$0xff]  ;;  %v240_v48 = vld [vmem:[%s1537_s9 + $0x208] sm:$0xff] }
  0x5f   : > { %1088 = vmatpush3.msra.mxu1 %v304_v45  ;;  %v230_v45 = vld [vmem:[%s1537_s9 + $0x1b8] sm:$0xff]  ;;  %v233_v49 = vld [vmem:[%s1537_s9 + $0x1d0] sm:$0xff] }
  0x60   : > { %1089 = vmatprep.subr.mxu1 %v303_v50 }
  0x61   : > { %491 = vmatmul.mubr.f32.gmra.mxu0 %v184_v51  ;;  %611 = vmatmul.mubr.f32.gmra.mxu1 %v256_v52  ;;  %v232_v51 = vld [vmem:[%s1537_s9 + $0x1c8] sm:$0xff]  ;;  %v246_v52 = vld [vmem:[%s1537_s9 + $0x238] sm:$0xff] }
  0x62   : > { %495 = vmatprep.mubr.f32.mxu0 %v188_v53  ;;  %615 = vmatprep.mubr.f32.mxu1 %v260_v54  ;;  %v236_v53 = vld [vmem:[%s1537_s9 + $0x1e8] sm:$0xff]  ;;  %v249_v54 = vld [vmem:[%s1537_s9 + $0x250] sm:$0xff] }
  0x63   : > { %1090 = vmatpush3.msra.mxu1 %v303_v50  ;;  %v243_v50 = vld [vmem:[%s1537_s9 + $0x220] sm:$0xff] }
  0x65   : > { %496 = vmatmul.mubr.f32.gmra.mxu0 %v187_v55  ;;  %616 = vmatmul.mubr.f32.gmra.mxu1 %v259_v56  ;;  %v235_v55 = vld [vmem:[%s1537_s9 + $0x1e0] sm:$0xff]  ;;  %v252_v56 = vld [vmem:[%s1537_s9 + $0x268] sm:$0xff] }
  0x66   : > { %500 = vmatprep.mubr.f32.mxu0 %v191_v57  ;;  %620 = vmatprep.mubr.f32.mxu1 %v263_v58  ;;  %v239_v57 = vld [vmem:[%s1537_s9 + $0x200] sm:$0xff] }
  0x67   : > { %v255_v58 = vld [vmem:[%s1537_s9 + $0x280] sm:$0xff] }
  0x69   : > { %501 = vmatmul.mubr.f32.gmra.mxu0 %v190_v59  ;;  %621 = vmatmul.mubr.f32.gmra.mxu1 %v262_v60  ;;  %v238_v59 = vld [vmem:[%s1537_s9 + $0x1f8] sm:$0xff] }
  0x6a   : > { %505 = vmatprep.mubr.f32.mxu0 %v194_v61  ;;  %625 = vmatprep.mubr.f32.mxu1 %v266_v62  ;;  %v258_v60 = vld [vmem:[%s1537_s9 + $0x298] sm:$0xff]  ;;  %v261_v62 = vld [vmem:[%s1537_s9 + $0x2b0] sm:$0xff] }
  0x6b   : > { %v242_v61 = vld [vmem:[%s1537_s9 + $0x218] sm:$0xff] }
  0x6d   : > { %506 = vmatmul.mubr.f32.gmra.mxu0 %v193_v63  ;;  %626 = vmatmul.mubr.f32.gmra.mxu1 %v265_v0  ;;  %v241_v63 = vld [vmem:[%s1537_s9 + $0x210] sm:$0xff]  ;;  %v264_v0 = vld [vmem:[%s1537_s9 + $0x2c8] sm:$0xff] }
  0x6e   : > { %510 = vmatprep.mubr.f32.mxu0 %v197_v1  ;;  %630 = vmatprep.mubr.f32.mxu1 %v269_v2  ;;  %v245_v1 = vld [vmem:[%s1537_s9 + $0x230] sm:$0xff]  ;;  %v267_v2 = vld [vmem:[%s1537_s9 + $0x2e0] sm:$0xff] }
  0x71   : > { %511 = vmatmul.mubr.f32.gmra.mxu0 %v196_v3  ;;  %631 = vmatmul.mubr.f32.gmra.mxu1 %v268_v4  ;;  %v244_v3 = vld [vmem:[%s1537_s9 + $0x228] sm:$0xff]  ;;  %v270_v4 = vld [vmem:[%s1537_s9 + $0x2f8] sm:$0xff] }
  0x72   : > { %515 = vmatprep.mubr.f32.mxu0 %v200_v5  ;;  %1091 = vmatprep.mubr.msk.f32.mxu1 %vm314_vm0, %v177_v6 }
  0x75   : > { %516 = vmatmul.mubr.f32.gmra.mxu0 %v199_v7  ;;  %1092 = vmatmul.mubr.msk.f32.vlgmr.msra.gmra.mxu1 %vm314_vm0, %v180_v8 }
  0x76   : > { %520 = vmatprep.mubr.f32.mxu0 %v203_v9  ;;  %1094 = vmatprep.mubr.msk.f32.mxu1 %vm314_vm0, %v183_v10 }
  0x79   : > { %521 = vmatmul.mubr.f32.gmra.mxu0 %v202_v11  ;;  %1095 = vmatmul.mubr.msk.f32.gmra.mxu1 %vm314_vm0, %v186_v12 }
  0x7a   : > { %525 = vmatprep.mubr.f32.mxu0 %v206_v13  ;;  %1097 = vmatprep.mubr.msk.f32.mxu1 %vm314_vm0, %v189_v14 }
  0x7d   : > { %526 = vmatmul.mubr.f32.gmra.mxu0 %v205_v15  ;;  %1098 = vmatmul.mubr.msk.f32.gmra.mxu1 %vm314_vm0, %v192_v16 }
  0x7e   : > { %530 = vmatprep.mubr.f32.mxu0 %v209_v17  ;;  %1100 = vmatprep.mubr.msk.f32.mxu1 %vm314_vm0, %v195_v18 }
  0x81   : > { %531 = vmatmul.mubr.f32.gmra.mxu0 %v208_v19  ;;  %1101 = vmatmul.mubr.msk.f32.gmra.mxu1 %vm314_vm0, %v198_v20 }
  0x82   : > { %535 = vmatprep.mubr.f32.mxu0 %v212_v21  ;;  %1103 = vmatprep.mubr.msk.f32.mxu1 %vm314_vm0, %v201_v22 }
  0x85   : > { %536 = vmatmul.mubr.f32.gmra.mxu0 %v211_v23  ;;  %1104 = vmatmul.mubr.msk.f32.gmra.mxu1 %vm314_vm0, %v204_v24 }
  0x86   : > { %540 = vmatprep.mubr.f32.mxu0 %v215_v25  ;;  %1106 = vmatprep.mubr.msk.f32.mxu1 %vm314_vm0, %v207_v26 }
  0x89   : > { %541 = vmatmul.mubr.f32.gmra.mxu0 %v214_v27  ;;  %1107 = vmatmul.mubr.msk.f32.gmra.mxu1 %vm314_vm0, %v210_v28 }
  0x8a   : > { %545 = vmatprep.mubr.f32.mxu0 %v218_v29  ;;  %1109 = vmatprep.mubr.msk.f32.mxu1 %vm314_vm0, %v213_v30 }
  0x8d   : > { %546 = vmatmul.mubr.f32.gmra.mxu0 %v217_v31  ;;  %1110 = vmatmul.mubr.msk.f32.gmra.mxu1 %vm314_vm0, %v216_v32 }
  0x8e   : > { %550 = vmatprep.mubr.f32.mxu0 %v221_v33  ;;  %1112 = vmatprep.mubr.msk.f32.mxu1 %vm314_vm0, %v219_v34 }
  0x91   : > { %551 = vmatmul.mubr.f32.gmra.mxu0 %v220_v35  ;;  %1113 = vmatmul.mubr.msk.f32.gmra.mxu1 %vm314_vm0, %v222_v36  ;;  %v1706_v35 = vld [vmem:[%s1872_s2] ss:$0 sm:$0xff] }
  0x92   : > { %555 = vmatprep.mubr.f32.mxu0 %v224_v37  ;;  %1115 = vmatprep.mubr.msk.f32.mxu1 %vm314_vm0, %v225_v38 }
  0x95   : > { %556 = vmatmul.mubr.f32.gmra.mxu0 %v223_v39  ;;  %1116 = vmatmul.mubr.msk.f32.gmra.mxu1 %vm314_vm0, %v228_v40 }
  0x96   : > { %560 = vmatprep.mubr.f32.mxu0 %v227_v41  ;;  %1118 = vmatprep.mubr.msk.f32.mxu1 %vm314_vm0, %v231_v42 }
  0x99   : > { %561 = vmatmul.mubr.f32.gmra.mxu0 %v226_v43  ;;  %1119 = vmatmul.mubr.msk.f32.gmra.mxu1 %vm314_vm0, %v234_v44 }
  0x9a   : > { %565 = vmatprep.mubr.f32.mxu0 %v230_v45  ;;  %1121 = vmatprep.mubr.msk.f32.mxu1 %vm314_vm0, %v237_v46 }
  0x9d   : > { %566 = vmatmul.mubr.f32.gmra.mxu0 %v229_v47  ;;  %1122 = vmatmul.mubr.msk.f32.gmra.mxu1 %vm314_vm0, %v240_v48 }
  0x9e   : > { %570 = vmatprep.mubr.f32.mxu0 %v233_v49  ;;  %1124 = vmatprep.mubr.msk.f32.mxu1 %vm314_vm0, %v243_v50 }
  0xa1   : > { %571 = vmatmul.mubr.f32.gmra.mxu0 %v232_v51  ;;  %1125 = vmatmul.mubr.msk.f32.gmra.mxu1 %vm314_vm0, %v246_v52 }
  0xa2   : > { %575 = vmatprep.mubr.f32.mxu0 %v236_v53  ;;  %1127 = vmatprep.mubr.msk.f32.mxu1 %vm314_vm0, %v249_v54 }
  0xa5   : > { %576 = vmatmul.mubr.f32.gmra.mxu0 %v235_v55  ;;  %1128 = vmatmul.mubr.msk.f32.gmra.mxu1 %vm314_vm0, %v252_v56 }
  0xa6   : > { %580 = vmatprep.mubr.f32.mxu0 %v239_v57  ;;  %1130 = vmatprep.mubr.msk.f32.mxu1 %vm314_vm0, %v255_v58 }
  0xa9   : > { %581 = vmatmul.mubr.f32.gmra.mxu0 %v238_v59  ;;  %1131 = vmatmul.mubr.msk.f32.gmra.mxu1 %vm314_vm0, %v258_v60 }
  0xaa   : > { %585 = vmatprep.mubr.f32.mxu0 %v242_v61  ;;  %1133 = vmatprep.mubr.msk.f32.mxu1 %vm314_vm0, %v261_v62 }
  0xad   : > { %586 = vmatmul.mubr.f32.gmra.mxu0 %v241_v63  ;;  %1134 = vmatmul.mubr.msk.f32.gmra.mxu1 %vm314_vm0, %v264_v0 }
  0xae   : > { %590 = vmatprep.mubr.f32.mxu0 %v245_v1  ;;  %1136 = vmatprep.mubr.msk.f32.mxu1 %vm314_vm0, %v267_v2 }
  0xb1   : > { %591 = vmatmul.mubr.f32.gmra.mxu0 %v244_v3  ;;  %1137 = vmatmul.mubr.msk.f32.gmra.mxu1 %vm314_vm0, %v270_v4 }
 0x115   : > { %v477_v5 = vpop.f32.mrf.mxu0  ;;  %v1686_v6 = vpop.f32.mrf.mxu1 }
 0x116   : > { %v478_v41 = vadd.f32 %v1706_v35, %v477_v5 }
 0x117   : > { %v479_v7 = vpop.f32.mrf.mxu0  ;;  %v599_v8 = vpop.f32.mrf.mxu1 }
 0x119   : > { %v482_v9 = vpop.f32.mrf.mxu0  ;;  %v1688_v10 = vpop.f32.mrf.mxu1 }
 0x11a   : > { %v483_v38 = vadd.f32 %v1706_v35, %v482_v9 }
 0x11b   : > { %v484_v11 = vpop.f32.mrf.mxu0  ;;  %v604_v12 = vpop.f32.mrf.mxu1 }
 0x11d   : > { %v487_v13 = vpop.f32.mrf.mxu0  ;;  %v1690_v14 = vpop.f32.mrf.mxu1 }
 0x11e   : > { %v488_v50 = vadd.f32 %v1706_v35, %v487_v13 }
 0x11f   : > { %v489_v15 = vpop.f32.mrf.mxu0  ;;  %v609_v16 = vpop.f32.mrf.mxu1 }
 0x121   : > { %v492_v17 = vpop.f32.mrf.mxu0  ;;  %v1692_v18 = vpop.f32.mrf.mxu1 }
 0x122   : > { %v493_v45 = vadd.f32 %v1706_v35, %v492_v17 }
 0x123   : > { %v494_v19 = vpop.f32.mrf.mxu0  ;;  %v614_v20 = vpop.f32.mrf.mxu1 }
 0x125   : > { %v497_v21 = vpop.f32.mrf.mxu0  ;;  %v1694_v22 = vpop.f32.mrf.mxu1 }
 0x126   : > { %v498_v60 = vadd.f32 %v1706_v35, %v497_v21 }
 0x127   : > { %v499_v23 = vpop.f32.mrf.mxu0  ;;  %v619_v24 = vpop.f32.mrf.mxu1 }
 0x129   : > { %v502_v25 = vpop.f32.mrf.mxu0  ;;  %v1696_v26 = vpop.f32.mrf.mxu1 }
 0x12a   : > { %v503_v55 = vadd.f32 %v1706_v35, %v502_v25 }
 0x12b   : > { %v504_v27 = vpop.f32.mrf.mxu0  ;;  %v624_v28 = vpop.f32.mrf.mxu1 }
 0x12d   : > { %v507_v29 = vpop.f32.mrf.mxu0  ;;  %v1698_v30 = vpop.f32.mrf.mxu1 }
 0x12e   : > { %v508_v7 = vadd.f32 %v1706_v35, %v507_v29 }
 0x12f   : > { %v509_v31 = vpop.f32.mrf.mxu0  ;;  %v629_v32 = vpop.f32.mrf.mxu1 }
 0x131   : > { %v512_v33 = vpop.f32.mrf.mxu0  ;;  %v1700_v34 = vpop.f32.mrf.mxu1 }
 0x132   : > { %v513_v1 = vadd.f32 %v1706_v35, %v512_v33 }
 0x133   : > { %v514_v36 = vpop.f32.mrf.mxu0  ;;  %v634_v37 = vpop.f32.mrf.mxu1 }
 0x135   : > { %v517_v39 = vpop.f32.mrf.mxu0  ;;  %v1093_v40 = vpop.f32.mrf.mxu1 }
 0x136   : > { %v708_v42 = vadd.f32 %v1093_v40, %v483_v38  ;;  %v518_v20 = vadd.f32 %v1706_v35, %v517_v39 }
 0x137   : > { %v519_v43 = vpop.f32.mrf.mxu0  ;;  %v702_v44 = vpop.f32.mrf.mxu1 }
 0x138   : > { %v862_v46 = vmax.f32 %v708_v42, 0.0  ;;  %v703_v47 = vadd.f32 %v702_v44, %v478_v41 }
 0x139   : > { %v522_v48 = vpop.f32.mrf.mxu0  ;;  %v1096_v49 = vpop.f32.mrf.mxu1 }
 0x13a   : > { %894 = vst.msk [vmem:[%s1714_s6 + $0x8] sm:$0xff] %vm314_vm0, %v862_v46  ;;  %v861_v51 = vmax.f32 %v703_v47, 0.0  ;;  %v718_v52 = vadd.f32 %v1096_v49, %v493_v45  ;;  %v523_v13 = vadd.f32 %v1706_v35, %v522_v48 }
 0x13b   : > { %v524_v53 = vpop.f32.mrf.mxu0  ;;  %v712_v54 = vpop.f32.mrf.mxu1 }
 0x13c   : > { %893 = vst.msk [vmem:[%s1714_s6] sm:$0xff] %vm314_vm0, %v861_v51  ;;  %v864_v56 = vmax.f32 %v718_v52, 0.0  ;;  %v713_v57 = vadd.f32 %v712_v54, %v488_v50 }
 0x13d   : > { %v527_v58 = vpop.f32.mrf.mxu0  ;;  %v1099_v59 = vpop.f32.mrf.mxu1 }
 0x13e   : > { %896 = vst.msk [vmem:[%s1714_s6 + $0x18] sm:$0xff] %vm314_vm0, %v864_v56  ;;  %v863_v61 = vmax.f32 %v713_v57, 0.0  ;;  %v728_v62 = vadd.f32 %v1099_v59, %v503_v55  ;;  %v528_v33 = vadd.f32 %v1706_v35, %v527_v58 }
 0x13f   : > { %v529_v63 = vpop.f32.mrf.mxu0  ;;  %v722_v0 = vpop.f32.mrf.mxu1 }
 0x140   : > { %895 = vst.msk [vmem:[%s1714_s6 + $0x10] sm:$0xff] %vm314_vm0, %v863_v61  ;;  %v866_v2 = vmax.f32 %v728_v62, 0.0  ;;  %v723_v3 = vadd.f32 %v722_v0, %v498_v60 }
 0x141   : > { %v532_v4 = vpop.f32.mrf.mxu0  ;;  %v1102_v5 = vpop.f32.mrf.mxu1 }
 0x142   : > { %898 = vst.msk [vmem:[%s1714_s6 + $0x28] sm:$0xff] %vm314_vm0, %v866_v2  ;;  %v865_v8 = vmax.f32 %v723_v3, 0.0  ;;  %v738_v9 = vadd.f32 %v1102_v5, %v513_v1  ;;  %v533_v27 = vadd.f32 %v1706_v35, %v532_v4 }
 0x143   : > { %v534_v11 = vpop.f32.mrf.mxu0  ;;  %v732_v12 = vpop.f32.mrf.mxu1 }
 0x144   : > { %897 = vst.msk [vmem:[%s1714_s6 + $0x20] sm:$0xff] %vm314_vm0, %v865_v8  ;;  %v868_v15 = vmax.f32 %v738_v9, 0.0  ;;  %v733_v16 = vadd.f32 %v732_v12, %v508_v7 }
 0x145   : > { %v537_v17 = vpop.f32.mrf.mxu0  ;;  %v1105_v19 = vpop.f32.mrf.mxu1 }
 0x146   : > { %900 = vst.msk [vmem:[%s1714_s6 + $0x38] sm:$0xff] %vm314_vm0, %v868_v15  ;;  %v867_v21 = vmax.f32 %v733_v16, 0.0  ;;  %v748_v23 = vadd.f32 %v1105_v19, %v523_v13  ;;  %v538_v45 = vadd.f32 %v1706_v35, %v537_v17 }
 0x147   : > { %v539_v24 = vpop.f32.mrf.mxu0  ;;  %v742_v25 = vpop.f32.mrf.mxu1 }
 0x148   : > { %899 = vst.msk [vmem:[%s1714_s6 + $0x30] sm:$0xff] %vm314_vm0, %v867_v21  ;;  %v870_v28 = vmax.f32 %v748_v23, 0.0  ;;  %v743_v29 = vadd.f32 %v742_v25, %v518_v20 }
 0x149   : > { %v542_v31 = vpop.f32.mrf.mxu0  ;;  %v1108_v32 = vpop.f32.mrf.mxu1 }
 0x14a   : > { %902 = vst.msk [vmem:[%s1714_s6 + $0x48] sm:$0xff] %vm314_vm0, %v870_v28  ;;  %v869_v36 = vmax.f32 %v743_v29, 0.0  ;;  %v758_v37 = vadd.f32 %v1108_v32, %v533_v27  ;;  %v543_v40 = vadd.f32 %v1706_v35, %v542_v31  ;;  %v603_v32 = vadd.f32 %v1706_v35, %v1688_v10 }
 0x14b   : > { %v544_v38 = vpop.f32.mrf.mxu0  ;;  %v752_v39 = vpop.f32.mrf.mxu1 }
 0x14c   : > { %901 = vst.msk [vmem:[%s1714_s6 + $0x40] sm:$0xff] %vm314_vm0, %v869_v36  ;;  %v872_v41 = vmax.f32 %v758_v37, 0.0  ;;  %v753_v42 = vadd.f32 %v752_v39, %v528_v33  ;;  %v598_v38 = vadd.f32 %v1706_v35, %v1686_v6 }
 0x14d   : > { %v547_v43 = vpop.f32.mrf.mxu0  ;;  %v1111_v44 = vpop.f32.mrf.mxu1 }
 0x14e   : > { %904 = vst.msk [vmem:[%s1714_s6 + $0x58] sm:$0xff] %vm314_vm0, %v872_v41  ;;  %v871_v46 = vmax.f32 %v753_v42, 0.0  ;;  %v768_v47 = vadd.f32 %v1111_v44, %v543_v40  ;;  %v548_v54 = vadd.f32 %v1706_v35, %v547_v43  ;;  %v613_v44 = vadd.f32 %v1706_v35, %v1692_v18 }
 0x14f   : > { %v549_v48 = vpop.f32.mrf.mxu0  ;;  %v762_v49 = vpop.f32.mrf.mxu1 }
 0x150   : > { %903 = vst.msk [vmem:[%s1714_s6 + $0x50] sm:$0xff] %vm314_vm0, %v871_v46  ;;  %v874_v50 = vmax.f32 %v768_v47, 0.0  ;;  %v763_v51 = vadd.f32 %v762_v49, %v538_v45  ;;  %v608_v47 = vadd.f32 %v1706_v35, %v1690_v14 }
 0x151   : > { %v552_v52 = vpop.f32.mrf.mxu0  ;;  %v1114_v53 = vpop.f32.mrf.mxu1 }
 0x152   : > { %906 = vst.msk [vmem:[%s1714_s6 + $0x68] sm:$0xff] %vm314_vm0, %v874_v50  ;;  %v873_v55 = vmax.f32 %v763_v51, 0.0  ;;  %v553_v56 = vadd.f32 %v1706_v35, %v552_v52 }
 0x153   : > { %v554_v57 = vpop.f32.mrf.mxu0  ;;  %v772_v58 = vpop.f32.mrf.mxu1 }
 0x154   : > { %905 = vst.msk [vmem:[%s1714_s6 + $0x60] sm:$0xff] %vm314_vm0, %v873_v55  ;;  %v778_v59 = vadd.f32 %v1114_v53, %v553_v56  ;;  %v773_v60 = vadd.f32 %v772_v58, %v548_v54  ;;  %v623_v54 = vadd.f32 %v1706_v35, %v1696_v26  ;;  %v618_v57 = vadd.f32 %v1706_v35, %v1694_v22 }
 0x155   : > { %v557_v61 = vpop.f32.mrf.mxu0  ;;  %v1117_v62 = vpop.f32.mrf.mxu1 }
 0x156   : > { %v876_v63 = vmax.f32 %v778_v59, 0.0  ;;  %v875_v0 = vmax.f32 %v773_v60, 0.0  ;;  %v558_v1 = vadd.f32 %v1706_v35, %v557_v61 }
 0x157   : > { %v559_v2 = vpop.f32.mrf.mxu0  ;;  %v782_v3 = vpop.f32.mrf.mxu1 }
 0x158   : > { %908 = vst.msk [vmem:[%s1714_s6 + $0x78] sm:$0xff] %vm314_vm0, %v876_v63  ;;  %907 = vst.msk [vmem:[%s1714_s6 + $0x70] sm:$0xff] %vm314_vm0, %v875_v0  ;;  %v783_v4 = vadd.f32 %v782_v3, %v558_v1  ;;  %v633_v1 = vadd.f32 %v1706_v35, %v1700_v34 }
 0x159   : > { %v562_v5 = vpop.f32.mrf.mxu0  ;;  %v1120_v7 = vpop.f32.mrf.mxu1 }
 0x15a   : > { %v877_v8 = vmax.f32 %v783_v4, 0.0  ;;  %v563_v9 = vadd.f32 %v1706_v35, %v562_v5  ;;  %v628_v4 = vadd.f32 %v1706_v35, %v1698_v30 }
 0x15b   : > { %v564_v11 = vpop.f32.mrf.mxu0  ;;  %v792_v12 = vpop.f32.mrf.mxu1 }
 0x15c   : > { %909 = vst.msk [vmem:[%s1714_s6 + $0x80] sm:$0xff] %vm314_vm0, %v877_v8  ;;  %v788_v13 = vadd.f32 %v1117_v62, %v563_v9 }
 0x15d   : > { %v567_v15 = vpop.f32.mrf.mxu0  ;;  %v1123_v16 = vpop.f32.mrf.mxu1 }
 0x15e   : > { %v878_v17 = vmax.f32 %v788_v13, 0.0  ;;  %v568_v19 = vadd.f32 %v1706_v35, %v567_v15 }
 0x15f   : > { %v569_v20 = vpop.f32.mrf.mxu0  ;;  %v802_v21 = vpop.f32.mrf.mxu1 }
 0x160   : > { %910 = vst.msk [vmem:[%s1714_s6 + $0x88] sm:$0xff] %vm314_vm0, %v878_v17  ;;  %v793_v23 = vadd.f32 %v792_v12, %v568_v19 }
 0x161   : > { %v572_v24 = vpop.f32.mrf.mxu0  ;;  %v1767_v25 = vpop.f32.mrf.mxu1 }
 0x162   : > { %v879_v27 = vmax.f32 %v793_v23, 0.0  ;;  %v573_v28 = vadd.f32 %v1706_v35, %v572_v24 }
 0x163   : > { %v574_v29 = vpop.f32.mrf.mxu0  ;;  %v812_v31 = vpop.f32.mrf.mxu1 }
 0x164   : > { %911 = vst.msk [vmem:[%s1714_s6 + $0x90] sm:$0xff] %vm314_vm0, %v879_v27  ;;  %v798_v33 = vadd.f32 %v1120_v7, %v573_v28 }
 0x165   : > { %v577_v36 = vpop.f32.mrf.mxu0  ;;  %v1129_v37 = vpop.f32.mrf.mxu1 }
 0x166   : > { %v880_v39 = vmax.f32 %v798_v33, 0.0  ;;  %v578_v40 = vadd.f32 %v1706_v35, %v577_v36  ;;  %v828_v41 = vadd.f32 %v1129_v37, %v603_v32 }
 0x167   : > { %v579_v42 = vpop.f32.mrf.mxu0  ;;  %v822_v43 = vpop.f32.mrf.mxu1 }
 0x168   : > { %912 = vst.msk [vmem:[%s1714_s6 + $0x98] sm:$0xff] %vm314_vm0, %v880_v39  ;;  %v803_v10 = vadd.f32 %v802_v21, %v578_v40  ;;  %v886_v45 = vmax.f32 %v828_v41, 0.0  ;;  %v823_v46 = vadd.f32 %v822_v43, %v598_v38 }
 0x169   : > { %v582_v6 = vpop.f32.mrf.mxu0  ;;  %v1132_v48 = vpop.f32.mrf.mxu1 }
 0x16a   : > { %v881_v49 = vmax.f32 %v803_v10, 0.0  ;;  %918 = vst.msk [vmem:[%s1714_s6 + $0xc8] sm:$0xff] %vm314_vm0, %v886_v45  ;;  %v885_v50 = vmax.f32 %v823_v46, 0.0  ;;  %v583_v51 = vadd.f32 %v1706_v35, %v582_v6  ;;  %v838_v18 = vadd.f32 %v1132_v48, %v613_v44 }
 0x16b   : > { %v584_v52 = vpop.f32.mrf.mxu0  ;;  %v832_v53 = vpop.f32.mrf.mxu1 }
 0x16c   : > { %913 = vst.msk [vmem:[%s1714_s6 + $0xa0] sm:$0xff] %vm314_vm0, %v881_v49  ;;  %917 = vst.msk [vmem:[%s1714_s6 + $0xc0] sm:$0xff] %vm314_vm0, %v885_v50  ;;  %v808_v14 = vadd.f32 %v1123_v16, %v583_v51  ;;  %v888_v55 = vmax.f32 %v838_v18, 0.0  ;;  %v833_v56 = vadd.f32 %v832_v53, %v608_v47 }
 0x16d   : > { %v587_v58 = vpop.f32.mrf.mxu0  ;;  %v1135_v59 = vpop.f32.mrf.mxu1 }
 0x16e   : > { %v882_v60 = vmax.f32 %v808_v14, 0.0  ;;  %920 = vst.msk [vmem:[%s1714_s6 + $0xd8] sm:$0xff] %vm314_vm0, %v888_v55  ;;  %v887_v61 = vmax.f32 %v833_v56, 0.0  ;;  %v588_v26 = vadd.f32 %v1706_v35, %v587_v58  ;;  %v848_v62 = vadd.f32 %v1135_v59, %v623_v54 }
 0x16f   : > { %v589_v63 = vpop.f32.mrf.mxu0  ;;  %v842_v0 = vpop.f32.mrf.mxu1 }
 0x170   : > { %914 = vst.msk [vmem:[%s1714_s6 + $0xa8] sm:$0xff] %vm314_vm0, %v882_v60  ;;  %919 = vst.msk [vmem:[%s1714_s6 + $0xd0] sm:$0xff] %vm314_vm0, %v887_v61  ;;  %v813_v22 = vadd.f32 %v812_v31, %v588_v26  ;;  %v890_v2 = vmax.f32 %v848_v62, 0.0  ;;  %v843_v3 = vadd.f32 %v842_v0, %v618_v57 }
 0x171   : > { %v592_v5 = vpop.f32.mrf.mxu0  ;;  %v1138_v7 = vpop.f32.mrf.mxu1 }
 0x172   : > { %v883_v8 = vmax.f32 %v813_v22, 0.0  ;;  %922 = vst.msk [vmem:[%s1714_s6 + $0xe8] sm:$0xff] %vm314_vm0, %v890_v2  ;;  %v889_v9 = vmax.f32 %v843_v3, 0.0  ;;  %v593_v34 = vadd.f32 %v1706_v35, %v592_v5  ;;  %v858_v11 = vadd.f32 %v1138_v7, %v633_v1 }
 0x173   : > { %v594_v12 = vpop.f32.mrf.mxu0  ;;  %v852_v13 = vpop.f32.mrf.mxu1 }
 0x174   : > { %915 = vst.msk [vmem:[%s1714_s6 + $0xb0] sm:$0xff] %vm314_vm0, %v883_v8  ;;  %921 = vst.msk [vmem:[%s1714_s6 + $0xe0] sm:$0xff] %vm314_vm0, %v889_v9  ;;  %v818_v30 = vadd.f32 %v1767_v25, %v593_v34  ;;  %v892_v15 = vmax.f32 %v858_v11, 0.0  ;;  %v853_v16 = vadd.f32 %v852_v13, %v628_v4 }
 0x176   : > { %v884_v35 = vmax.f32 %v818_v30, 0.0  ;;  %924 = vst.msk [vmem:[%s1714_s6 + $0xf8] sm:$0xff] %vm314_vm0, %v892_v15  ;;  %v891_v17 = vmax.f32 %v853_v16, 0.0 }
 0x178   : > { %916 = vst.msk [vmem:[%s1714_s6 + $0xb8] sm:$0xff] %vm314_vm0, %v884_v35  ;;  %923 = vst.msk [vmem:[%s1714_s6 + $0xf0] sm:$0xff] %vm314_vm0, %v891_v17 }
 0x179   : > { %1259 = shalt.err (!%p1256_p3)
}
 0x17a   : > { %s1260_s25 = scalar_lea.hbm %s1818_s11, 4096  ;;  %s1264_s28 = scalar_lea.hbm %s1873_s3, 8192 }
 0x17b   : > { %p1261_p4 = scmp.ne.s32.totalorder %s1818_s11, %s1260_s25  ;;  %p1265_p9 = scmp.lt.s32.totalorder %s1818_s11, %s1873_s3 }
 0x17c   : > { %p1266_p10 = scmp.lt.s32.totalorder %s1264_s28, %s1260_s25 }
 0x17d   : > { %p1262_p7 = pnand %p1261_p4, %p1370_p5 }
 0x17e   : > { %p1267_p11 = por %p1266_p10, %p1265_p9 }
 0x17f   : > { %p1263_p8 = pneg %p1262_p7 }
 0x181   : > { %p1268_p12 = pnand %p1267_p11, %p1263_p8 }
 0x183   : > { %1271 = shalt.err (!%p1268_p12)
}
 0x184   : > { %s1310_s4 = smov 128   ;;  %s1311_s5 = smov 8  }
 0x185   : > { %1204 = dma.vmem_to_hbm [thread:$0]  (%p1370_p5), %s1820_s8, 4096, %s1818_s11, %s1830_s16, %s1310_s4, %s1310_s4, %s1311_s5  }
 0x186 PF: > { %p1210_p13 = scmp.ge.s32.totalorder %s1306_s15, 2  ;;  %s954_s6 = sand.u32 1, %s1294_s12  }
 0x187   : > { %s955_s7 = scalar_lea.sflag [#allocation3], %s954_s6 }
 0x188   : > { %p1207_p0 = pnand %p1210_p13, %p1374_p6 }
 0x18a   : > { %p1208_p1 = pneg %p1207_p0 }
 0x18c   : > { %1289 = dma.done.wait (%p1208_p1), %s955_s7, 4096  }
 0x18d   : > { %1291 = vsyncadd (%p1208_p1), %s955_s7, 4294963200  ;;  %p13_p2 = scmp.ge.s32.totalorder %s1357_s18, 4   ;;  %s1876_s12 = smov %s1298_s13 }
 0x18e   : > { %s1877_s13 = smov %s1302_s14  ;;  %s1878_s14 = smov %s1368_s21 }
 0x18f   : > { %s1879_s15 = smov %s1357_s18  ;;  %15 = sbr.rel (!%p13_p2) target bundleno = 3 (0x3), region = 67 }
 0x194   :  { %960 = vsyncpa [#allocation3], 1 }
 0x195   :  { %962 = vsyncpa [#allocation3 + $0x1], 1 }

// kernel: attention_layer_forward.4
= control target key start
LH: loop header
LB: loop body
LE: loop exit
PB: predicated region body
PF: predicated region fallthrough
CT: control target
= control target key end

     0   :  { %s3266_s29 = smov 0   ;;  %s4394_s0 = inlined_call_operand.vmem [shape: f32[2,256,32], index: 0, kind: input, shape index: {}]   ;;  %s4395_s1 = inlined_call_operand.vmem [shape: f32[32,8], index: 1, kind: input, shape index: {}]   ;;  %s4396_s2 = inlined_call_operand.vmem [shape: f32[1,8], index: 2, kind: input, shape index: {}]   ;;  %s4397_s3 = inlined_call_operand.vmem [shape: f32[32,8], index: 3, kind: input, shape index: {}]   ;;  %s4398_s4 = inlined_call_operand.vmem [shape: f32[1,8], index: 4, kind: input, shape index: {}]   ;;  %s4399_s5 = inlined_call_operand.vmem [shape: f32[32,32], index: 5, kind: input, shape index: {}]   ;;  %s4400_s6 = inlined_call_operand.vmem [shape: f32[1,32], index: 6, kind: input, shape index: {}]   ;;  %s4401_s7 = inlined_call_operand.<no memory space> [shape: f32[1], index: 7, kind: input, shape index: {}]   ;;  %s4402_s8 = inlined_call_operand.vmem [shape: f32[2,256,32], index: 8, kind: output, shape index: {}]  }
   0x1   :  { %13 = sst [smem:[#allocation2]] %s4401_s7 }
   0x2 LB: > { %s2420_s30 = sadd.s32 4294967295, %s3215_s29   ;;  %p2424_p0 = scmp.ge.s32.totalorder %s3215_s29, 1  ;;  %s3215_s29 = sphi %s3266_s29, %s19_s29  }
   0x3   : > { %p263_p1 = scmp.lt.s32.totalorder %s3215_s29, 3 }
   0x5   : > { %p264_p2 = pnand %p2424_p0, %p263_p1 }
   0x7   : > { %267 = sbr.rel (%p264_p2) target bundleno = 1051 (0x41b), region = 52 }
   0xc   : > { %v342_v0 = vld [vmem:[%s4395_s1 + $0x18] sm:$0xff]  ;;  %v341_v1 = vld [vmem:[%s4395_s1 + $0x10] sm:$0xff]  ;;  %p297_p3 = scmp.lt.s32.totalorder %s2420_s30, 1  ;;  %v340_v2 = vld [vmem:[%s4395_s1 + $0x8] sm:$0xff]  ;;  %vm350_vm0 = vcmask 261120   ;;  %vm1144_vm1 = vcmask 64512  }
   0xd   : > { %2968 = vmatprep.subr.mxu1 %v342_v0  ;;  %2800 = vmatprep.subr.mxu0 %v342_v0  ;;  %v339_v3 = vld [vmem:[%s4395_s1] sm:$0xff]  ;;  %v675_v6 = vld [vmem:[%s4397_s3 + $0x18] sm:$0xff]  ;;  %v674_v8 = vld [vmem:[%s4397_s3 + $0x10] sm:$0xff]  ;;  %s2267_s23 = sld [smem:[#allocation2]] }
   0xe   : > { %2972 = vmatpush3.msra.mxu1 %v342_v0  ;;  %s4443_s30 = smov (!%p297_p3, %s2420_s30), 1  ;;  %2801 = vmatpush3.msra.mxu0 %v342_v0  ;;  %v673_v10 = vld [vmem:[%s4397_s3 + $0x8] sm:$0xff]  ;;  %v672_v13 = vld [vmem:[%s4397_s3] sm:$0xff]  ;;  %v911_v61 = vld [vmem:[%s4399_s5 + $0x18] sm:$0xff] }
   0xf   : > { %2969 = vmatprep.subr.mxu1 %v341_v1  ;;  %2802 = vmatprep.subr.mxu0 %v341_v1  ;;  %s2594_s16 = sshll.u32 %s4443_s30, 8  ;;  %v3565_v54 = vld [vmem:[%s4396_s2] ss:$0 sm:$0xff]  ;;  %v910_v62 = vld [vmem:[%s4399_s5 + $0x10] sm:$0xff]  ;;  %v909_v0 = vld [vmem:[%s4399_s5 + $0x8] sm:$0xff] }
  0x10   : > { %2973 = vmatpush3.msra.mxu1 %v341_v1  ;;  %2803 = vmatpush3.msra.mxu0 %v341_v1  ;;  %s3294_s19 = scalar_lea.vmem %s4394_s0, %s2594_s16  ;;  %s4262_s26 = scalar_lea.vmem %s4402_s8, %s2594_s16 }
  0x11   : > { %2970 = vmatprep.subr.mxu1 %v340_v2  ;;  %2804 = vmatprep.subr.mxu0 %v340_v2  ;;  %v3297_v4 = vld [vmem:[%s3294_s19 + $0x80] sm:$0xff]  ;;  %v3300_v5 = vld [vmem:[%s3294_s19 + $0x88] sm:$0xff]  ;;  %v3308_v7 = vld [vmem:[%s3294_s19 + $0x90] sm:$0xff] }
  0x12   : > { %2974 = vmatpush3.msra.mxu1 %v340_v2  ;;  %2805 = vmatpush3.msra.mxu0 %v340_v2  ;;  %v3318_v9 = vld [vmem:[%s3294_s19 + $0x98] sm:$0xff]  ;;  %v3324_v11 = vld [vmem:[%s3294_s19 + $0xa0] sm:$0xff]  ;;  %v3339_v14 = vld [vmem:[%s3294_s19 + $0xa8] sm:$0xff] }
  0x13   : > { %2971 = vmatprep.subr.mxu1 %v339_v3  ;;  %2832 = vmatprep.mubr.msk.f32.mxu1 %vm350_vm0, %v3297_v4  ;;  %v3327_v12 = vld [vmem:[%s3294_s19] sm:$0xff]  ;;  %v3342_v15 = vld [vmem:[%s3294_s19 + $0x8] sm:$0xff]  ;;  %v3345_v16 = vld [vmem:[%s3294_s19 + $0xb0] sm:$0xff] }
  0x14   : > { %2975 = vmatpush3.msra.mxu1 %v339_v3  ;;  %2806 = vmatprep.subr.mxu0 %v339_v3  ;;  %v3348_v17 = vld [vmem:[%s3294_s19 + $0x10] sm:$0xff]  ;;  %v3359_v18 = vld [vmem:[%s3294_s19 + $0xb8] sm:$0xff]  ;;  %v3365_v20 = vld [vmem:[%s3294_s19 + $0xc0] sm:$0xff] }
  0x15   : > { %2833 = vmatmul.mubr.msk.f32.vlgmr.msra.gmra.mxu1 %vm350_vm0, %v3300_v5  ;;  %2856 = vmatprep.subr.mxu1 %v675_v6  ;;  %v3362_v19 = vld [vmem:[%s3294_s19 + $0x18] sm:$0xff]  ;;  %v3368_v21 = vld [vmem:[%s3294_s19 + $0x20] sm:$0xff]  ;;  %v3379_v22 = vld [vmem:[%s3294_s19 + $0xc8] sm:$0xff] }
  0x16   : > { %2857 = vmatpush3.msra.mxu1 %v675_v6  ;;  %2835 = vmatprep.mubr.msk.f32.mxu1 %vm350_vm0, %v3308_v7  ;;  %v3382_v23 = vld [vmem:[%s3294_s19 + $0x28] sm:$0xff]  ;;  %v3385_v24 = vld [vmem:[%s3294_s19 + $0xd0] sm:$0xff]  ;;  %v3399_v26 = vld [vmem:[%s3294_s19 + $0xd8] sm:$0xff] }
  0x17   : > { %2858 = vmatprep.subr.mxu1 %v674_v8  ;;  %2807 = vmatpush3.msra.mxu0 %v339_v3  ;;  %v3388_v25 = vld [vmem:[%s3294_s19 + $0x30] sm:$0xff]  ;;  %v3402_v27 = vld [vmem:[%s3294_s19 + $0x38] sm:$0xff]  ;;  %v3405_v28 = vld [vmem:[%s3294_s19 + $0xe0] sm:$0xff] }
  0x18   : > { %2859 = vmatpush3.msra.mxu1 %v674_v8  ;;  %2808 = vmatprep.mubr.msk.f32.mxu0 %vm350_vm0, %v3327_v12  ;;  %v3408_v29 = vld [vmem:[%s3294_s19 + $0x40] sm:$0xff]  ;;  %v3419_v30 = vld [vmem:[%s3294_s19 + $0xe8] sm:$0xff]  ;;  %v3425_v32 = vld [vmem:[%s3294_s19 + $0xf0] sm:$0xff] }
  0x19   : > { %2836 = vmatmul.mubr.msk.f32.gmra.mxu1 %vm350_vm0, %v3318_v9  ;;  %2860 = vmatprep.subr.mxu1 %v673_v10  ;;  %v3422_v31 = vld [vmem:[%s3294_s19 + $0x48] sm:$0xff]  ;;  %v3428_v33 = vld [vmem:[%s3294_s19 + $0x50] sm:$0xff]  ;;  %v3439_v34 = vld [vmem:[%s3294_s19 + $0xf8] sm:$0xff] }
  0x1a   : > { %2838 = vmatprep.mubr.msk.f32.mxu1 %vm350_vm0, %v3324_v11  ;;  %2861 = vmatpush3.msra.mxu1 %v673_v10  ;;  %v3442_v35 = vld [vmem:[%s3294_s19 + $0x58] sm:$0xff]  ;;  %v3445_v36 = vld [vmem:[%s3294_s19 + $0x60] sm:$0xff]  ;;  %v3456_v37 = vld [vmem:[%s3294_s19 + $0x68] sm:$0xff] }
  0x1b   : > { %2862 = vmatprep.subr.mxu1 %v672_v13  ;;  %2809 = vmatmul.mubr.msk.f32.vlgmr.msra.gmra.mxu0 %vm350_vm0, %v3342_v15  ;;  %v3459_v38 = vld [vmem:[%s3294_s19 + $0x70] sm:$0xff]  ;;  %v3470_v39 = vld [vmem:[%s3294_s19 + $0x78] sm:$0xff]  ;;  %v908_v2 = vld [vmem:[%s4399_s5] sm:$0xff] }
  0x1c   : > { %2863 = vmatpush3.msra.mxu1 %v672_v13  ;;  %2811 = vmatprep.mubr.msk.f32.mxu0 %vm350_vm0, %v3348_v17 }
  0x1d   : > { %2839 = vmatmul.mubr.msk.f32.gmra.mxu1 %vm350_vm0, %v3339_v14  ;;  %2912 = vmatprep.subr.mxu0 %v911_v61 }
  0x1e   : > { %2841 = vmatprep.mubr.msk.f32.mxu1 %vm350_vm0, %v3345_v16  ;;  %2913 = vmatpush3.msra.mxu0 %v911_v61 }
  0x1f   : > { %2812 = vmatmul.mubr.msk.f32.gmra.mxu0 %vm350_vm0, %v3362_v19  ;;  %2914 = vmatprep.subr.mxu0 %v910_v62 }
  0x20   : > { %2814 = vmatprep.mubr.msk.f32.mxu0 %vm350_vm0, %v3368_v21  ;;  %2915 = vmatpush3.msra.mxu0 %v910_v62 }
  0x21   : > { %2842 = vmatmul.mubr.msk.f32.gmra.mxu1 %vm350_vm0, %v3359_v18  ;;  %2916 = vmatprep.subr.mxu0 %v909_v0 }
  0x22   : > { %2844 = vmatprep.mubr.msk.f32.mxu1 %vm350_vm0, %v3365_v20  ;;  %2917 = vmatpush3.msra.mxu0 %v909_v0 }
  0x23   : > { %2815 = vmatmul.mubr.msk.f32.gmra.mxu0 %vm350_vm0, %v3382_v23  ;;  %2918 = vmatprep.subr.mxu0 %v908_v2 }
  0x24   : > { %2817 = vmatprep.mubr.msk.f32.mxu0 %vm350_vm0, %v3388_v25  ;;  %2919 = vmatpush3.msra.mxu0 %v908_v2 }
  0x25   : > { %2845 = vmatmul.mubr.msk.f32.gmra.mxu1 %vm350_vm0, %v3379_v22 }
  0x26   : > { %2847 = vmatprep.mubr.msk.f32.mxu1 %vm350_vm0, %v3385_v24 }
  0x27   : > { %2818 = vmatmul.mubr.msk.f32.gmra.mxu0 %vm350_vm0, %v3402_v27 }
  0x28   : > { %2820 = vmatprep.mubr.msk.f32.mxu0 %vm350_vm0, %v3408_v29 }
  0x29   : > { %2848 = vmatmul.mubr.msk.f32.gmra.mxu1 %vm350_vm0, %v3399_v26 }
  0x2a   : > { %2850 = vmatprep.mubr.msk.f32.mxu1 %vm350_vm0, %v3405_v28 }
  0x2b   : > { %2821 = vmatmul.mubr.msk.f32.gmra.mxu0 %vm350_vm0, %v3422_v31 }
  0x2c   : > { %2823 = vmatprep.mubr.msk.f32.mxu0 %vm350_vm0, %v3428_v33 }
  0x2d   : > { %2851 = vmatmul.mubr.msk.f32.gmra.mxu1 %vm350_vm0, %v3419_v30 }
  0x2e   : > { %2853 = vmatprep.mubr.msk.f32.mxu1 %vm350_vm0, %v3425_v32 }
  0x2f   : > { %2824 = vmatmul.mubr.msk.f32.gmra.mxu0 %vm350_vm0, %v3442_v35 }
  0x30   : > { %2826 = vmatprep.mubr.msk.f32.mxu0 %vm350_vm0, %v3445_v36 }
  0x31   : > { %2854 = vmatmul.mubr.msk.f32.gmra.mxu1 %vm350_vm0, %v3439_v34 }
  0x32   : > { %2864 = vmatprep.mubr.msk.f32.mxu1 %vm350_vm0, %v3327_v12 }
  0x33   : > { %2827 = vmatmul.mubr.msk.f32.gmra.mxu0 %vm350_vm0, %v3456_v37 }
  0x34   : > { %2829 = vmatprep.mubr.msk.f32.mxu0 %vm350_vm0, %v3459_v38 }
  0x35   : > { %2865 = vmatmul.mubr.msk.f32.vlgmr.msra.gmra.mxu1 %vm350_vm0, %v3342_v15 }
  0x36   : > { %2867 = vmatprep.mubr.msk.f32.mxu1 %vm350_vm0, %v3348_v17 }
  0x37   : > { %2830 = vmatmul.mubr.msk.f32.gmra.mxu0 %vm350_vm0, %v3470_v39 }
  0x38   : > { %2920 = vmatprep.mubr.msk.f32.mxu0 %vm350_vm0, %v3327_v12 }
  0x39   : > { %2868 = vmatmul.mubr.msk.f32.gmra.mxu1 %vm350_vm0, %v3362_v19 }
  0x3a   : > { %2870 = vmatprep.mubr.msk.f32.mxu1 %vm350_vm0, %v3368_v21 }
  0x3b   : > { %2921 = vmatmul.mubr.msk.f32.vlgmr.msra.gmra.mxu0 %vm350_vm0, %v3342_v15 }
  0x3c   : > { %2923 = vmatprep.mubr.msk.f32.mxu0 %vm350_vm0, %v3348_v17 }
  0x3d   : > { %2871 = vmatmul.mubr.msk.f32.gmra.mxu1 %vm350_vm0, %v3382_v23 }
  0x3e   : > { %2873 = vmatprep.mubr.msk.f32.mxu1 %vm350_vm0, %v3388_v25 }
  0x3f   : > { %2924 = vmatmul.mubr.msk.f32.gmra.mxu0 %vm350_vm0, %v3362_v19 }
  0x40   : > { %2926 = vmatprep.mubr.msk.f32.mxu0 %vm350_vm0, %v3368_v21 }
  0x41   : > { %2874 = vmatmul.mubr.msk.f32.gmra.mxu1 %vm350_vm0, %v3402_v27 }
  0x42   : > { %2876 = vmatprep.mubr.msk.f32.mxu1 %vm350_vm0, %v3408_v29 }
  0x43   : > { %2927 = vmatmul.mubr.msk.f32.gmra.mxu0 %vm350_vm0, %v3382_v23 }
  0x44   : > { %2929 = vmatprep.mubr.msk.f32.mxu0 %vm350_vm0, %v3388_v25 }
  0x45   : > { %2877 = vmatmul.mubr.msk.f32.gmra.mxu1 %vm350_vm0, %v3422_v31 }
  0x46   : > { %2879 = vmatprep.mubr.msk.f32.mxu1 %vm350_vm0, %v3428_v33 }
  0x47   : > { %2930 = vmatmul.mubr.msk.f32.gmra.mxu0 %vm350_vm0, %v3402_v27 }
  0x48   : > { %2932 = vmatprep.mubr.msk.f32.mxu0 %vm350_vm0, %v3408_v29 }
  0x49   : > { %2880 = vmatmul.mubr.msk.f32.gmra.mxu1 %vm350_vm0, %v3442_v35 }
  0x4a   : > { %2882 = vmatprep.mubr.msk.f32.mxu1 %vm350_vm0, %v3445_v36 }
  0x4b   : > { %2933 = vmatmul.mubr.msk.f32.gmra.mxu0 %vm350_vm0, %v3422_v31 }
  0x4c   : > { %2935 = vmatprep.mubr.msk.f32.mxu0 %vm350_vm0, %v3428_v33 }
  0x4d   : > { %2883 = vmatmul.mubr.msk.f32.gmra.mxu1 %vm350_vm0, %v3456_v37 }
  0x4e   : > { %2885 = vmatprep.mubr.msk.f32.mxu1 %vm350_vm0, %v3459_v38 }
  0x4f   : > { %2936 = vmatmul.mubr.msk.f32.gmra.mxu0 %vm350_vm0, %v3442_v35 }
  0x50   : > { %2938 = vmatprep.mubr.msk.f32.mxu0 %vm350_vm0, %v3445_v36 }
  0x51   : > { %2886 = vmatmul.mubr.msk.f32.gmra.mxu1 %vm350_vm0, %v3470_v39 }
  0x52   : > { %2888 = vmatprep.mubr.msk.f32.mxu1 %vm350_vm0, %v3297_v4 }
  0x53   : > { %2939 = vmatmul.mubr.msk.f32.gmra.mxu0 %vm350_vm0, %v3456_v37 }
  0x54   : > { %2941 = vmatprep.mubr.msk.f32.mxu0 %vm350_vm0, %v3459_v38 }
  0x55   : > { %2889 = vmatmul.mubr.msk.f32.gmra.mxu1 %vm350_vm0, %v3300_v5 }
  0x56   : > { %2891 = vmatprep.mubr.msk.f32.mxu1 %vm350_vm0, %v3308_v7 }
  0x57   : > { %2942 = vmatmul.mubr.msk.f32.gmra.mxu0 %vm350_vm0, %v3470_v39 }
  0x58   : > { %2944 = vmatprep.mubr.msk.f32.mxu0 %vm350_vm0, %v3297_v4 }
  0x59   : > { %2892 = vmatmul.mubr.msk.f32.gmra.mxu1 %vm350_vm0, %v3318_v9 }
  0x5a   : > { %2894 = vmatprep.mubr.msk.f32.mxu1 %vm350_vm0, %v3324_v11 }
  0x5b   : > { %2945 = vmatmul.mubr.msk.f32.gmra.mxu0 %vm350_vm0, %v3300_v5 }
  0x5c   : > { %2947 = vmatprep.mubr.msk.f32.mxu0 %vm350_vm0, %v3308_v7 }
  0x5d   : > { %2895 = vmatmul.mubr.msk.f32.gmra.mxu1 %vm350_vm0, %v3339_v14 }
  0x5e   : > { %2897 = vmatprep.mubr.msk.f32.mxu1 %vm350_vm0, %v3345_v16 }
  0x5f   : > { %2948 = vmatmul.mubr.msk.f32.gmra.mxu0 %vm350_vm0, %v3318_v9 }
  0x60   : > { %2950 = vmatprep.mubr.msk.f32.mxu0 %vm350_vm0, %v3324_v11 }
  0x61   : > { %2898 = vmatmul.mubr.msk.f32.gmra.mxu1 %vm350_vm0, %v3359_v18 }
  0x62   : > { %2900 = vmatprep.mubr.msk.f32.mxu1 %vm350_vm0, %v3365_v20 }
  0x63   : > { %2951 = vmatmul.mubr.msk.f32.gmra.mxu0 %vm350_vm0, %v3339_v14  ;;  %v3681_v14 = vld [vmem:[%s4398_s4] ss:$0 sm:$0xff] }
  0x64   : > { %2953 = vmatprep.mubr.msk.f32.mxu0 %vm350_vm0, %v3345_v16 }
  0x65   : > { %2901 = vmatmul.mubr.msk.f32.gmra.mxu1 %vm350_vm0, %v3379_v22 }
  0x66   : > { %2903 = vmatprep.mubr.msk.f32.mxu1 %vm350_vm0, %v3385_v24 }
  0x67   : > { %2954 = vmatmul.mubr.msk.f32.gmra.mxu0 %vm350_vm0, %v3359_v18 }
  0x68   : > { %2956 = vmatprep.mubr.msk.f32.mxu0 %vm350_vm0, %v3365_v20 }
  0x69   : > { %2904 = vmatmul.mubr.msk.f32.gmra.mxu1 %vm350_vm0, %v3399_v26 }
  0x6a   : > { %2906 = vmatprep.mubr.msk.f32.mxu1 %vm350_vm0, %v3405_v28 }
  0x6b   : > { %2957 = vmatmul.mubr.msk.f32.gmra.mxu0 %vm350_vm0, %v3379_v22 }
  0x6c   : > { %2959 = vmatprep.mubr.msk.f32.mxu0 %vm350_vm0, %v3385_v24 }
  0x6d   : > { %2907 = vmatmul.mubr.msk.f32.gmra.mxu1 %vm350_vm0, %v3419_v30 }
  0x6e   : > { %2909 = vmatprep.mubr.msk.f32.mxu1 %vm350_vm0, %v3425_v32 }
  0x6f   : > { %2960 = vmatmul.mubr.msk.f32.gmra.mxu0 %vm350_vm0, %v3399_v26 }
  0x70   : > { %2962 = vmatprep.mubr.msk.f32.mxu0 %vm350_vm0, %v3405_v28 }
  0x71   : > { %2910 = vmatmul.mubr.msk.f32.gmra.mxu1 %vm350_vm0, %v3439_v34 }
  0x73   : > { %2963 = vmatmul.mubr.msk.f32.gmra.mxu0 %vm350_vm0, %v3419_v30 }
  0x74   : > { %2965 = vmatprep.mubr.msk.f32.mxu0 %vm350_vm0, %v3425_v32 }
  0x77   : > { %2966 = vmatmul.mubr.msk.f32.gmra.mxu0 %vm350_vm0, %v3439_v34 }
  0xd5   : > { %v3534_v40 = vpop.f32.mrf.mxu1 }
  0xd7   : > { %v3536_v41 = vpop.f32.mrf.mxu1 }
  0xd9   : > { %v3538_v42 = vpop.f32.mrf.mxu1 }
  0xdb   : > { %v3540_v43 = vpop.f32.mrf.mxu1  ;;  %v3556_v51 = vpop.f32.mrf.mxu0 }
  0xdd   : > { %v3542_v44 = vpop.f32.mrf.mxu1  ;;  %v513_v55 = vpop.f32.mrf.mxu0 }
  0xde   : > { %v3570_v57 = vadd.f32 %v3565_v54, %v513_v55 }
  0xdf   : > { %v3544_v45 = vpop.f32.mrf.mxu1 }
  0xe0   : > { %2736 = vmatprep.mubr.msk.f32.mxu1 %vm1144_vm1, %v3570_v57 }
  0xe1   : > { %v3546_v46 = vpop.f32.mrf.mxu1 }
  0xe3   : > { %v3548_v47 = vpop.f32.mrf.mxu1 }
  0xe5   : > { %v3550_v48 = vpop.f32.mrf.mxu1 }
  0xe7   : > { %v3552_v49 = vpop.f32.mrf.mxu1 }
  0xe9   : > { %v3554_v50 = vpop.f32.mrf.mxu1 }
  0xeb   : > { %v3558_v52 = vpop.f32.mrf.mxu1 }
  0xed   : > { %v3560_v53 = vpop.f32.mrf.mxu1 }
  0xef   : > { %v3567_v56 = vpop.f32.mrf.mxu1 }
  0xf1   : > { %v3572_v58 = vpop.f32.mrf.mxu1 }
  0xf3   : > { %v3576_v59 = vpop.f32.mrf.mxu1 }
  0xf5   : > { %v3578_v60 = vpop.f32.mrf.mxu1 }
  0xf7   : > { %v3586_v63 = vpop.f32.mrf.mxu1 }
  0xf9   : > { %v3591_v1 = vpop.f32.mrf.mxu1 }
  0xfb   : > { %v3596_v3 = vpop.f32.mrf.mxu1 }
  0xfd   : > { %v3598_v6 = vpop.f32.mrf.mxu1 }
  0xff   : > { %v3602_v8 = vpop.f32.mrf.mxu1 }
 0x101   : > { %v3606_v10 = vpop.f32.mrf.mxu1 }
 0x103   : > { %v3610_v12 = vpop.f32.mrf.mxu1 }
 0x105   : > { %v3614_v13 = vpop.f32.mrf.mxu1 }
 0x107   : > { %v3618_v15 = vpop.f32.mrf.mxu1 }
 0x109   : > { %v3622_v17 = vpop.f32.mrf.mxu1 }
 0x10a   : > { %v805_v0 = vadd.f32 %v3622_v17, %v3681_v14 }
 0x10b   : > { %v3626_v19 = vpop.f32.mrf.mxu1 }
 0x10c   : > { %v800_v2 = vadd.f32 %v3681_v14, %v3626_v19 }
 0x10d   : > { %v2884_v21 = vpop.f32.mrf.mxu1 }
 0x10e   : > { %v815_v28 = vadd.f32 %v2884_v21, %v3681_v14 }
 0x10f   : > { %v809_v23 = vpop.f32.mrf.mxu1 }
 0x110   : > { %v810_v30 = vadd.f32 %v3681_v14, %v809_v23  ;;  %v795_v23 = vadd.f32 %v3614_v13, %v3681_v14 }
 0x111   : > { %v2887_v55 = vpop.f32.mrf.mxu1 }
 0x112   : > { %v825_v20 = vadd.f32 %v2887_v55, %v3681_v14  ;;  %v790_v55 = vadd.f32 %v3681_v14, %v3618_v15 }
 0x113   : > { %v819_v25 = vpop.f32.mrf.mxu1 }
 0x114   : > { %v820_v24 = vadd.f32 %v3681_v14, %v819_v25  ;;  %v785_v25 = vadd.f32 %v3606_v10, %v3681_v14 }
 0x115   : > { %v3638_v27 = vpop.f32.mrf.mxu1 }
 0x117   : > { %v3642_v29 = vpop.f32.mrf.mxu1 }
 0x119   : > { %v3646_v31 = vpop.f32.mrf.mxu1 }
 0x11b   : > { %v3650_v33 = vpop.f32.mrf.mxu1 }
 0x11d   : > { %v3654_v35 = vpop.f32.mrf.mxu1 }
 0x11e   : > { %v855_v15 = vadd.f32 %v3654_v35, %v3681_v14  ;;  %v845_v35 = vadd.f32 %v3646_v31, %v3681_v14  ;;  %v835_v31 = vadd.f32 %v3638_v27, %v3681_v14 }
 0x11f   : > { %v3658_v36 = vpop.f32.mrf.mxu1 }
 0x120   : > { %v850_v10 = vadd.f32 %v3681_v14, %v3658_v36  ;;  %v840_v36 = vadd.f32 %v3681_v14, %v3650_v33  ;;  %v830_v33 = vadd.f32 %v3681_v14, %v3642_v29 }
 0x121   : > { %v2899_v37 = vpop.f32.mrf.mxu1 }
 0x122   : > { %v865_v19 = vadd.f32 %v2899_v37, %v3681_v14  ;;  %v775_v37 = vadd.f32 %v3598_v6, %v3681_v14  ;;  %v765_v6 = vadd.f32 %v3591_v1, %v3681_v14  ;;  %v755_v1 = vadd.f32 %v3578_v60, %v3681_v14 }
 0x123   : > { %v859_v38 = vpop.f32.mrf.mxu1 }
 0x124   : > { %v860_v13 = vadd.f32 %v3681_v14, %v859_v38  ;;  %v2813_v38 = vpop.f32.mrf.mxu0 }
 0x125   : > { %v2902_v39 = vpop.f32.mrf.mxu1 }
 0x126   : > { %v875_v21 = vadd.f32 %v2902_v39, %v3681_v14  ;;  %v780_v39 = vadd.f32 %v3681_v14, %v3610_v12  ;;  %v770_v12 = vadd.f32 %v3681_v14, %v3602_v8  ;;  %v760_v8 = vadd.f32 %v3681_v14, %v3596_v3  ;;  %v523_v27 = vpop.f32.mrf.mxu0 }
 0x127   : > { %v869_v4 = vpop.f32.mrf.mxu1  ;;  %v750_v3 = vadd.f32 %v3681_v14, %v3586_v63  ;;  %v524_v60 = vadd.f32 %v3565_v54, %v523_v27  ;;  %v529_v63 = vadd.f32 %v2813_v38, %v3565_v54  ;;  %v649_v38 = vadd.f32 %v3554_v50, %v3565_v54 }
 0x128   : > { %v870_v17 = vadd.f32 %v3681_v14, %v869_v4  ;;  %v519_v4 = vadd.f32 %v3556_v51, %v3565_v54  ;;  %v2816_v29 = vpop.f32.mrf.mxu0  ;;  %v654_v50 = vadd.f32 %v3565_v54, %v3567_v56  ;;  %v659_v56 = vadd.f32 %v3560_v53, %v3565_v54 }
 0x129   : > { %v2905_v5 = vpop.f32.mrf.mxu1  ;;  %v664_v53 = vadd.f32 %v3565_v54, %v3576_v59  ;;  %v669_v59 = vadd.f32 %v3572_v58, %v3565_v54 }
 0x12a   : > { %v885_v32 = vadd.f32 %v2905_v5, %v3681_v14  ;;  %v533_v5 = vpop.f32.mrf.mxu0 }
 0x12b   : > { %v879_v7 = vpop.f32.mrf.mxu1  ;;  %v534_v51 = vadd.f32 %v3565_v54, %v533_v5 }
 0x12c   : > { %v880_v34 = vadd.f32 %v3681_v14, %v879_v7  ;;  %v2819_v7 = vpop.f32.mrf.mxu0 }
 0x12d   : > { %v2908_v9 = vpop.f32.mrf.mxu1 }
 0x12e   : > { %v895_v26 = vadd.f32 %v2908_v9, %v3681_v14  ;;  %v539_v9 = vadd.f32 %v2816_v29, %v3565_v54 }
 0x12f   : > { %v889_v11 = vpop.f32.mrf.mxu1 }
 0x130   : > { %v890_v62 = vadd.f32 %v3681_v14, %v889_v11 }
 0x131   : > { %v2911_v16 = vpop.f32.mrf.mxu1 }
 0x132   : > { %v905_v18 = vadd.f32 %v2911_v16, %v3681_v14 }
 0x133   : > { %v899_v61 = vpop.f32.mrf.mxu1 }
 0x134   : > { %v900_v22 = vadd.f32 %v3681_v14, %v899_v61  ;;  %2704 = vmatprep.subr.msk.mxu1 %vm1144_vm1, %v905_v18  ;;  %v549_v18 = vadd.f32 %v2819_v7, %v3565_v54 }
 0x135   : > { %2705 = vmatpush3.xpose.msk.msra.mxu1 %vm1144_vm1, %v825_v20 }
 0x136   : > { %2706 = vmatprep.subr.msk.mxu1 %vm1144_vm1, %v900_v22 }
 0x139   : > { %2707 = vmatpush3.xpose.msk.msra.mxu1 %vm1144_vm1, %v820_v24 }
 0x13a   : > { %2708 = vmatprep.subr.msk.mxu1 %vm1144_vm1, %v895_v26 }
 0x13d   : > { %2709 = vmatpush3.xpose.msk.msra.mxu1 %vm1144_vm1, %v815_v28 }
 0x13e   : > { %2710 = vmatprep.subr.msk.mxu1 %vm1144_vm1, %v890_v62 }
 0x141   : > { %2711 = vmatpush3.xpose.msk.msra.mxu1 %vm1144_vm1, %v810_v30 }
 0x142   : > { %2712 = vmatprep.subr.msk.mxu1 %vm1144_vm1, %v885_v32 }
 0x145   : > { %2713 = vmatpush3.xpose.msk.msra.mxu1 %vm1144_vm1, %v805_v0 }
 0x146   : > { %2714 = vmatprep.subr.msk.mxu1 %vm1144_vm1, %v880_v34 }
 0x149   : > { %2715 = vmatpush3.xpose.msk.msra.mxu1 %vm1144_vm1, %v800_v2 }
 0x14a   : > { %2716 = vmatprep.subr.msk.mxu1 %vm1144_vm1, %v875_v21 }
 0x14d   : > { %2717 = vmatpush3.xpose.msk.msra.mxu1 %vm1144_vm1, %v795_v23 }
 0x14e   : > { %2718 = vmatprep.subr.msk.mxu1 %vm1144_vm1, %v870_v17  ;;  %v594_v17 = vadd.f32 %v3565_v54, %v3536_v41  ;;  %v609_v41 = vadd.f32 %v3538_v42, %v3565_v54  ;;  %v619_v42 = vadd.f32 %v3542_v44, %v3565_v54  ;;  %v629_v44 = vadd.f32 %v3546_v46, %v3565_v54 }
 0x151   : > { %2719 = vmatpush3.xpose.msk.msra.mxu1 %vm1144_vm1, %v790_v55  ;;  %v599_v55 = vadd.f32 %v3534_v40, %v3565_v54  ;;  %v614_v40 = vadd.f32 %v3565_v54, %v3544_v45  ;;  %v624_v45 = vadd.f32 %v3565_v54, %v3548_v47  ;;  %v634_v47 = vadd.f32 %v3565_v54, %v3552_v49  ;;  %v3884_v49 = vld [vmem:[%s4400_s6] ss:$0 sm:$0xff] }
 0x152   : > { %2720 = vmatprep.subr.msk.mxu1 %vm1144_vm1, %v865_v19  ;;  %v604_v19 = vadd.f32 %v3565_v54, %v3540_v43 }
 0x155   : > { %2721 = vmatpush3.xpose.msk.msra.mxu1 %vm1144_vm1, %v785_v25 }
 0x156   : > { %2722 = vmatprep.subr.msk.mxu1 %vm1144_vm1, %v860_v13 }
 0x159   : > { %2723 = vmatpush3.xpose.msk.msra.mxu1 %vm1144_vm1, %v780_v39 }
 0x15a   : > { %2724 = vmatprep.subr.msk.mxu1 %vm1144_vm1, %v855_v15 }
 0x15d   : > { %2725 = vmatpush3.xpose.msk.msra.mxu1 %vm1144_vm1, %v775_v37 }
 0x15e   : > { %2726 = vmatprep.subr.msk.mxu1 %vm1144_vm1, %v850_v10 }
 0x161   : > { %2727 = vmatpush3.xpose.msk.msra.mxu1 %vm1144_vm1, %v770_v12 }
 0x162   : > { %2728 = vmatprep.subr.msk.mxu1 %vm1144_vm1, %v845_v35 }
 0x165   : > { %2729 = vmatpush3.xpose.msk.msra.mxu1 %vm1144_vm1, %v765_v6 }
 0x166   : > { %2730 = vmatprep.subr.msk.mxu1 %vm1144_vm1, %v840_v36 }
 0x169   : > { %2731 = vmatpush3.xpose.msk.msra.mxu1 %vm1144_vm1, %v760_v8  ;;  %v639_v8 = vadd.f32 %v3550_v48, %v3565_v54 }
 0x16a   : > { %2732 = vmatprep.subr.msk.mxu1 %vm1144_vm1, %v835_v31 }
 0x16d   : > { %2733 = vmatpush3.xpose.msk.msra.mxu1 %vm1144_vm1, %v755_v1  ;;  %v644_v1 = vadd.f32 %v3565_v54, %v3558_v52  ;;  %v3217_v52 = vmov 0.0  }
 0x16e   : > { %2734 = vmatprep.subr.msk.mxu1 %vm1144_vm1, %v830_v33  ;;  %1978 = vmatprep.subr.mxu0 %v3217_v52 }
 0x171   : > { %2735 = vmatpush3.xpose.msk.msra.mxu1 %vm1144_vm1, %v750_v3 }
 0x174   : > { %2737 = vmatmul.mubr.msk.f32.vlgmr.msra.gmra.mxu1 %vm1144_vm1, %v3570_v57  ;;  %v543_v57 = vpop.f32.mrf.mxu0 }
 0x175   : > { %2738 = vmatprep.mubr.msk.f32.mxu1 %vm1144_vm1, %v519_v4  ;;  %v544_v11 = vadd.f32 %v3565_v54, %v543_v57 }
 0x176   : > { %v2822_v14 = vpop.f32.mrf.mxu0 }
 0x177   : > { %v559_v24 = vadd.f32 %v2822_v14, %v3565_v54 }
 0x178   : > { %2739 = vmatmul.mubr.msk.f32.gmra.mxu1 %vm1144_vm1, %v519_v4  ;;  %v553_v16 = vpop.f32.mrf.mxu0 }
 0x179   : > { %2740 = vmatprep.mubr.msk.f32.mxu1 %vm1144_vm1, %v524_v60  ;;  %v554_v20 = vadd.f32 %v3565_v54, %v553_v16 }
 0x17a   : > { %v2825_v61 = vpop.f32.mrf.mxu0 }
 0x17b   : > { %v569_v30 = vadd.f32 %v2825_v61, %v3565_v54 }
 0x17c   : > { %2741 = vmatmul.mubr.msk.f32.gmra.mxu1 %vm1144_vm1, %v524_v60  ;;  %v563_v22 = vpop.f32.mrf.mxu0 }
 0x17d   : > { %2742 = vmatprep.mubr.msk.f32.mxu1 %vm1144_vm1, %v529_v63  ;;  %v564_v26 = vadd.f32 %v3565_v54, %v563_v22 }
 0x17e   : > { %v2828_v28 = vpop.f32.mrf.mxu0 }
 0x17f   : > { %v579_v2 = vadd.f32 %v2828_v28, %v3565_v54 }
 0x180   : > { %2743 = vmatmul.mubr.msk.f32.gmra.mxu1 %vm1144_vm1, %v529_v63  ;;  %v573_v62 = vpop.f32.mrf.mxu0 }
 0x181   : > { %2744 = vmatprep.mubr.msk.f32.mxu1 %vm1144_vm1, %v534_v51  ;;  %v574_v32 = vadd.f32 %v3565_v54, %v573_v62 }
 0x182   : > { %v2831_v0 = vpop.f32.mrf.mxu0 }
 0x183   : > { %v589_v23 = vadd.f32 %v2831_v0, %v3565_v54 }
 0x184   : > { %2745 = vmatmul.mubr.msk.f32.gmra.mxu1 %vm1144_vm1, %v534_v51  ;;  %v583_v34 = vpop.f32.mrf.mxu0 }
 0x185   : > { %2746 = vmatprep.mubr.msk.f32.mxu1 %vm1144_vm1, %v539_v9  ;;  %v584_v21 = vadd.f32 %v3565_v54, %v583_v34 }
 0x186   : > { %v3838_v25 = vpop.f32.mrf.mxu0 }
 0x187   : > { %v991_v34 = vadd.f32 %v3838_v25, %v3884_v49 }
 0x188   : > { %2747 = vmatmul.mubr.msk.f32.gmra.mxu1 %vm1144_vm1, %v539_v9  ;;  %v3843_v13 = vpop.f32.mrf.mxu0 }
 0x189   : > { %2748 = vmatprep.mubr.msk.f32.mxu1 %vm1144_vm1, %v544_v11 }
 0x18a   : > { %v3846_v43 = vpop.f32.mrf.mxu0 }
 0x18b   : > { %v1001_v62 = vadd.f32 %v3846_v43, %v3884_v49 }
 0x18c   : > { %2749 = vmatmul.mubr.msk.f32.gmra.mxu1 %vm1144_vm1, %v544_v11  ;;  %v3851_v39 = vpop.f32.mrf.mxu0 }
 0x18d   : > { %2750 = vmatprep.mubr.msk.f32.mxu1 %vm1144_vm1, %v549_v18 }
 0x18e   : > { %v3854_v15 = vpop.f32.mrf.mxu0 }
 0x190   : > { %2751 = vmatmul.mubr.msk.f32.gmra.mxu1 %vm1144_vm1, %v549_v18  ;;  %v3859_v37 = vpop.f32.mrf.mxu0 }
 0x191   : > { %2752 = vmatprep.mubr.msk.f32.mxu1 %vm1144_vm1, %v554_v20  ;;  %v1006_v54 = vadd.f32 %v3884_v49, %v3859_v37 }
 0x192   : > { %v3862_v10 = vpop.f32.mrf.mxu0 }
 0x194   : > { %2753 = vmatmul.mubr.msk.f32.gmra.mxu1 %vm1144_vm1, %v554_v20  ;;  %v3867_v12 = vpop.f32.mrf.mxu0  ;;  %v1021_v20 = vadd.f32 %v3862_v10, %v3884_v49 }
 0x195   : > { %2754 = vmatprep.mubr.msk.f32.mxu1 %vm1144_vm1, %v559_v24  ;;  %v1016_v22 = vadd.f32 %v3884_v49, %v3867_v12 }
 0x196   : > { %v2934_v35 = vpop.f32.mrf.mxu0 }
 0x197   : > { %v1031_v11 = vadd.f32 %v2934_v35, %v3884_v49 }
 0x198   : > { %2755 = vmatmul.mubr.msk.f32.gmra.mxu1 %vm1144_vm1, %v559_v24  ;;  %v1025_v6 = vpop.f32.mrf.mxu0 }
 0x199   : > { %2756 = vmatprep.mubr.msk.f32.mxu1 %vm1144_vm1, %v564_v26  ;;  %v1026_v16 = vadd.f32 %v3884_v49, %v1025_v6 }
 0x19a   : > { %v2937_v36 = vpop.f32.mrf.mxu0 }
 0x19b   : > { %v1041_v51 = vadd.f32 %v2937_v36, %v3884_v49 }
 0x19c   : > { %2757 = vmatmul.mubr.msk.f32.gmra.mxu1 %vm1144_vm1, %v564_v26  ;;  %v1035_v46 = vpop.f32.mrf.mxu0  ;;  %v1011_v26 = vadd.f32 %v3854_v15, %v3884_v49 }
 0x19d   : > { %2758 = vmatprep.mubr.msk.f32.mxu1 %vm1144_vm1, %v569_v30  ;;  %v1036_v57 = vadd.f32 %v3884_v49, %v1035_v46 }
 0x19e   : > { %v2940_v31 = vpop.f32.mrf.mxu0 }
 0x19f   : > { %v1051_v4 = vadd.f32 %v2940_v31, %v3884_v49 }
 0x1a0   : > { %2759 = vmatmul.mubr.msk.f32.gmra.mxu1 %vm1144_vm1, %v569_v30  ;;  %v1045_v33 = vpop.f32.mrf.mxu0 }
 0x1a1   : > { %2760 = vmatprep.mubr.msk.f32.mxu1 %vm1144_vm1, %v574_v32  ;;  %v1046_v5 = vadd.f32 %v3884_v49, %v1045_v33 }
 0x1a2   : > { %v2943_v48 = vpop.f32.mrf.mxu0 }
 0x1a3   : > { %v1061_v3 = vadd.f32 %v2943_v48, %v3884_v49 }
 0x1a4   : > { %2761 = vmatmul.mubr.msk.f32.gmra.mxu1 %vm1144_vm1, %v574_v32  ;;  %v1055_v27 = vpop.f32.mrf.mxu0  ;;  %v996_v32 = vadd.f32 %v3884_v49, %v3851_v39 }
 0x1a5   : > { %2762 = vmatprep.mubr.msk.f32.mxu1 %vm1144_vm1, %v579_v2  ;;  %v1056_v60 = vadd.f32 %v3884_v49, %v1055_v27  ;;  %1979 = vmatpush1.msra.mxu0 %v1061_v3 }
 0x1a6   : > { %v3895_v29 = vpop.f32.mrf.mxu0  ;;  %1980 = vmatprep.subr.mxu0 %v3217_v52 }
 0x1a7   : > { %1981 = vmatpush1.msra.mxu0 %v1056_v60  ;;  %v1071_v35 = vadd.f32 %v3895_v29, %v3884_v49 }
 0x1a8   : > { %2763 = vmatmul.mubr.msk.f32.gmra.mxu1 %vm1144_vm1, %v579_v2  ;;  %v3902_v63 = vpop.f32.mrf.mxu0  ;;  %1982 = vmatprep.subr.mxu0 %v3217_v52 }
 0x1a9   : > { %2764 = vmatprep.mubr.msk.f32.mxu1 %vm1144_vm1, %v584_v21  ;;  %1983 = vmatpush1.msra.mxu0 %v1051_v4 }
 0x1aa   : > { %v3907_v7 = vpop.f32.mrf.mxu0  ;;  %1984 = vmatprep.subr.mxu0 %v3217_v52 }
 0x1ab   : > { %1985 = vmatpush1.msra.mxu0 %v1046_v5 }
 0x1ac   : > { %2765 = vmatmul.mubr.msk.f32.gmra.mxu1 %vm1144_vm1, %v584_v21  ;;  %v3914_v9 = vpop.f32.mrf.mxu0  ;;  %1986 = vmatprep.subr.mxu0 %v3217_v52  ;;  %v986_v21 = vadd.f32 %v3884_v49, %v3843_v13 }
 0x1ad   : > { %2766 = vmatprep.mubr.msk.f32.mxu1 %vm1144_vm1, %v589_v23  ;;  %1987 = vmatpush1.msra.mxu0 %v1041_v51  ;;  %v1076_v12 = vadd.f32 %v3884_v49, %v3914_v9 }
 0x1ae   : > { %v3919_v14 = vpop.f32.mrf.mxu0  ;;  %1988 = vmatprep.subr.mxu0 %v3217_v52 }
 0x1af   : > { %1989 = vmatpush1.msra.mxu0 %v1036_v57  ;;  %v1091_v37 = vadd.f32 %v3919_v14, %v3884_v49 }
 0x1b0   : > { %2767 = vmatmul.mubr.msk.f32.gmra.mxu1 %vm1144_vm1, %v589_v23  ;;  %v3926_v18 = vpop.f32.mrf.mxu0  ;;  %1990 = vmatprep.subr.mxu0 %v3217_v52 }
 0x1b1   : > { %2768 = vmatprep.mubr.msk.f32.mxu1 %vm1144_vm1, %v594_v17  ;;  %1991 = vmatpush1.msra.mxu0 %v1031_v11  ;;  %v1086_v10 = vadd.f32 %v3884_v49, %v3926_v18 }
 0x1b2   : > { %v2955_v61 = vpop.f32.mrf.mxu0  ;;  %1992 = vmatprep.subr.mxu0 %v3217_v52 }
 0x1b3   : > { %1993 = vmatpush1.msra.mxu0 %v1026_v16  ;;  %v1101_v15 = vadd.f32 %v2955_v61, %v3884_v49 }
 0x1b4   : > { %2769 = vmatmul.mubr.msk.f32.gmra.mxu1 %vm1144_vm1, %v594_v17  ;;  %v1095_v24 = vpop.f32.mrf.mxu0  ;;  %1994 = vmatprep.subr.mxu0 %v3217_v52 }
 0x1b5   : > { %2770 = vmatprep.mubr.msk.f32.mxu1 %vm1144_vm1, %v599_v55  ;;  %1995 = vmatpush1.msra.mxu0 %v1021_v20 }
 0x1b6   : > { %v2958_v28 = vpop.f32.mrf.mxu0  ;;  %1996 = vmatprep.subr.mxu0 %v3217_v52 }
 0x1b7   : > { %1997 = vmatpush1.msra.mxu0 %v1016_v22 }
 0x1b8   : > { %2771 = vmatmul.mubr.msk.f32.gmra.mxu1 %vm1144_vm1, %v599_v55  ;;  %v1105_v58 = vpop.f32.mrf.mxu0  ;;  %1998 = vmatprep.subr.mxu0 %v3217_v52 }
 0x1b9   : > { %2772 = vmatprep.mubr.msk.f32.mxu1 %vm1144_vm1, %v604_v19  ;;  %1999 = vmatpush1.msra.mxu0 %v1011_v26  ;;  %v1106_v39 = vadd.f32 %v3884_v49, %v1105_v58 }
 0x1ba   : > { %v2961_v30 = vpop.f32.mrf.mxu0  ;;  %2000 = vmatprep.subr.mxu0 %v3217_v52 }
 0x1bb   : > { %2001 = vmatpush1.msra.mxu0 %v1006_v54  ;;  %v1121_v13 = vadd.f32 %v2961_v30, %v3884_v49 }
 0x1bc   : > { %2773 = vmatmul.mubr.msk.f32.gmra.mxu1 %vm1144_vm1, %v604_v19  ;;  %v1115_v0 = vpop.f32.mrf.mxu0  ;;  %2002 = vmatprep.subr.mxu0 %v3217_v52 }
 0x1bd   : > { %2774 = vmatprep.mubr.msk.f32.mxu1 %vm1144_vm1, %v609_v41  ;;  %2003 = vmatpush1.msra.mxu0 %v1001_v62  ;;  %v1116_v43 = vadd.f32 %v3884_v49, %v1115_v0 }
 0x1be   : > { %v2964_v2 = vpop.f32.mrf.mxu0  ;;  %2004 = vmatprep.subr.mxu0 %v3217_v52 }
 0x1bf   : > { %2005 = vmatpush1.msra.mxu0 %v996_v32 }
 0x1c0   : > { %2775 = vmatmul.mubr.msk.f32.gmra.mxu1 %vm1144_vm1, %v609_v41  ;;  %v1125_v23 = vpop.f32.mrf.mxu0  ;;  %2006 = vmatprep.subr.mxu0 %v3217_v52  ;;  %v1131_v41 = vadd.f32 %v2964_v2, %v3884_v49 }
 0x1c1   : > { %2776 = vmatprep.mubr.msk.f32.mxu1 %vm1144_vm1, %v614_v40  ;;  %2007 = vmatpush1.msra.mxu0 %v991_v34 }
 0x1c2   : > { %v2967_v17 = vpop.f32.mrf.mxu0  ;;  %2008 = vmatprep.subr.mxu0 %v3217_v52 }
 0x1c3   : > { %v1141_v55 = vadd.f32 %v2967_v17, %v3884_v49  ;;  %2009 = vmatpush1.msra.mxu0 %v986_v21 }
 0x1c4   : > { %2777 = vmatmul.mubr.msk.f32.gmra.mxu1 %vm1144_vm1, %v614_v40  ;;  %v1135_v19 = vpop.f32.mrf.mxu0  ;;  %2010 = vmatprep.subr.mxu0 %v3217_v52  ;;  %v1126_v40 = vadd.f32 %v3884_v49, %v1125_v23 }
 0x1c5   : > { %2778 = vmatprep.mubr.msk.f32.mxu1 %vm1144_vm1, %v619_v42  ;;  %v1136_v25 = vadd.f32 %v3884_v49, %v1135_v19  ;;  %2011 = vmatpush2.msra.mxu0 %v1141_v55 }
 0x1c6   : > { %2012 = vmatprep.subr.mxu0 %v3217_v52 }
 0x1c7   : > { %2013 = vmatpush2.msra.mxu0 %v1136_v25 }
 0x1c8   : > { %2779 = vmatmul.mubr.msk.f32.gmra.mxu1 %vm1144_vm1, %v619_v42  ;;  %2014 = vmatprep.subr.mxu0 %v3217_v52  ;;  %v1111_v42 = vadd.f32 %v2958_v28, %v3884_v49 }
 0x1c9   : > { %2780 = vmatprep.mubr.msk.f32.mxu1 %vm1144_vm1, %v624_v45  ;;  %2015 = vmatpush2.msra.mxu0 %v1131_v41 }
 0x1ca   : > { %2016 = vmatprep.subr.mxu0 %v3217_v52 }
 0x1cb   : > { %2017 = vmatpush2.msra.mxu0 %v1126_v40 }
 0x1cc   : > { %2781 = vmatmul.mubr.msk.f32.gmra.mxu1 %vm1144_vm1, %v624_v45  ;;  %2018 = vmatprep.subr.mxu0 %v3217_v52  ;;  %v1096_v45 = vadd.f32 %v3884_v49, %v1095_v24 }
 0x1cd   : > { %2782 = vmatprep.mubr.msk.f32.mxu1 %vm1144_vm1, %v629_v44  ;;  %2019 = vmatpush2.msra.mxu0 %v1121_v13 }
 0x1ce   : > { %2020 = vmatprep.subr.mxu0 %v3217_v52 }
 0x1cf   : > { %2021 = vmatpush2.msra.mxu0 %v1116_v43 }
 0x1d0   : > { %2783 = vmatmul.mubr.msk.f32.gmra.mxu1 %vm1144_vm1, %v629_v44  ;;  %2022 = vmatprep.subr.mxu0 %v3217_v52  ;;  %v1081_v44 = vadd.f32 %v3907_v7, %v3884_v49 }
 0x1d1   : > { %2784 = vmatprep.mubr.msk.f32.mxu1 %vm1144_vm1, %v634_v47  ;;  %2023 = vmatpush2.msra.mxu0 %v1111_v42 }
 0x1d2   : > { %2024 = vmatprep.subr.mxu0 %v3217_v52 }
 0x1d3   : > { %2025 = vmatpush2.msra.mxu0 %v1106_v39 }
 0x1d4   : > { %2785 = vmatmul.mubr.msk.f32.gmra.mxu1 %vm1144_vm1, %v634_v47  ;;  %2026 = vmatprep.subr.mxu0 %v3217_v52  ;;  %v1066_v47 = vadd.f32 %v3884_v49, %v3902_v63 }
 0x1d5   : > { %2786 = vmatprep.mubr.msk.f32.mxu1 %vm1144_vm1, %v639_v8  ;;  %2027 = vmatpush2.msra.mxu0 %v1101_v15 }
 0x1d6   : > { %2028 = vmatprep.subr.mxu0 %v3217_v52 }
 0x1d7   : > { %2029 = vmatpush2.msra.mxu0 %v1096_v45 }
 0x1d8   : > { %2787 = vmatmul.mubr.msk.f32.gmra.mxu1 %vm1144_vm1, %v639_v8  ;;  %2030 = vmatprep.subr.mxu0 %v3217_v52 }
 0x1d9   : > { %2788 = vmatprep.mubr.msk.f32.mxu1 %vm1144_vm1, %v644_v1  ;;  %2031 = vmatpush2.msra.mxu0 %v1091_v37 }
 0x1da   : > { %2032 = vmatprep.subr.mxu0 %v3217_v52 }
 0x1db   : > { %2033 = vmatpush2.msra.mxu0 %v1086_v10 }
 0x1dc   : > { %2789 = vmatmul.mubr.msk.f32.gmra.mxu1 %vm1144_vm1, %v644_v1  ;;  %2034 = vmatprep.subr.mxu0 %v3217_v52 }
 0x1dd   : > { %2790 = vmatprep.mubr.msk.f32.mxu1 %vm1144_vm1, %v649_v38  ;;  %2035 = vmatpush2.msra.mxu0 %v1081_v44 }
 0x1de   : > { %2036 = vmatprep.subr.mxu0 %v3217_v52 }
 0x1df   : > { %2037 = vmatpush2.msra.mxu0 %v1076_v12 }
 0x1e0   : > { %2791 = vmatmul.mubr.msk.f32.gmra.mxu1 %vm1144_vm1, %v649_v38  ;;  %2038 = vmatprep.subr.mxu0 %v3217_v52 }
 0x1e1   : > { %2792 = vmatprep.mubr.msk.f32.mxu1 %vm1144_vm1, %v654_v50  ;;  %2039 = vmatpush2.msra.mxu0 %v1071_v35 }
 0x1e2   : > { %2040 = vmatprep.subr.mxu0 %v3217_v52 }
 0x1e3   : > { %2041 = vmatpush2.msra.mxu0 %v1066_v47 }
 0x1e4   : > { %2793 = vmatmul.mubr.msk.f32.gmra.mxu1 %vm1144_vm1, %v654_v50 }
 0x1e5   : > { %2794 = vmatprep.mubr.msk.f32.mxu1 %vm1144_vm1, %v659_v56 }
 0x1e8   : > { %2795 = vmatmul.mubr.msk.f32.gmra.mxu1 %vm1144_vm1, %v659_v56 }
 0x1e9   : > { %2796 = vmatprep.mubr.msk.f32.mxu1 %vm1144_vm1, %v664_v53 }
 0x1ec   : > { %2797 = vmatmul.mubr.msk.f32.gmra.mxu1 %vm1144_vm1, %v664_v53 }
 0x1ed   : > { %2798 = vmatprep.mubr.msk.f32.mxu1 %vm1144_vm1, %v669_v59 }
 0x1f0   : > { %2799 = vmatmul.mubr.msk.f32.gmra.mxu1 %vm1144_vm1, %v669_v59 }
 0x234   : > { %v3998_v6 = vpop.f32.mrf.mxu1 }
 0x236   : > { %v4000_v36 = vpop.f32.mrf.mxu1 }
 0x237   : > { %v1594_v8 = vmax.f32 %v3998_v6, %v4000_v36 }
 0x238   : > { %v4004_v46 = vpop.f32.mrf.mxu1 }
 0x239   : > { %1595 = vmax.xlane.f32.xlu0 %v1594_v8 }
 0x23a   : > { %v4006_v31 = vpop.f32.mrf.mxu1 }
 0x23b   : > { %v1597_v1 = vmax.f32 %v4004_v46, %v4006_v31 }
 0x23c   : > { %v4010_v49 = vpop.f32.mrf.mxu1 }
 0x23d   : > { %1598 = vmax.xlane.f32.xlu0 %v1597_v1 }
 0x23e   : > { %v4012_v33 = vpop.f32.mrf.mxu1 }
 0x23f   : > { %v1600_v48 = vmax.f32 %v4010_v49, %v4012_v33 }
 0x240   : > { %v4016_v38 = vpop.f32.mrf.mxu1 }
 0x241   : > { %1601 = vmax.xlane.f32.xlu1 %v1600_v48 }
 0x242   : > { %v4018_v3 = vpop.f32.mrf.mxu1 }
 0x243   : > { %v1603_v27 = vmax.f32 %v4016_v38, %v4018_v3 }
 0x244   : > { %v4022_v52 = vpop.f32.mrf.mxu1 }
 0x245   : > { %1604 = vmax.xlane.f32.xlu1 %v1603_v27 }
 0x246   : > { %v4024_v4 = vpop.f32.mrf.mxu1 }
 0x247   : > { %v1606_v60 = vmax.f32 %v4022_v52, %v4024_v4 }
 0x248   : > { %v4028_v29 = vpop.f32.mrf.mxu1 }
 0x249   : > { %1607 = vmax.xlane.f32.xlu0 %v1606_v60 }
 0x24a   : > { %v4030_v50 = vpop.f32.mrf.mxu1 }
 0x24b   : > { %v1609_v5 = vmax.f32 %v4028_v29, %v4030_v50 }
 0x24c   : > { %v4034_v63 = vpop.f32.mrf.mxu1 }
 0x24d   : > { %1610 = vmax.xlane.f32.xlu1 %v1609_v5 }
 0x24e   : > { %v4036_v51 = vpop.f32.mrf.mxu1 }
 0x24f   : > { %v1612_v7 = vmax.f32 %v4034_v63, %v4036_v51 }
 0x250   : > { %v4040_v56 = vpop.f32.mrf.mxu1 }
 0x251   : > { %1613 = vmax.xlane.f32.xlu0 %v1612_v7 }
 0x252   : > { %v4042_v57 = vpop.f32.mrf.mxu1 }
 0x253   : > { %v1615_v9 = vmax.f32 %v4040_v56, %v4042_v57 }
 0x254   : > { %v4046_v11 = vpop.f32.mrf.mxu1 }
 0x255   : > { %1616 = vmax.xlane.f32.xlu1 %v1615_v9 }
 0x256   : > { %v4048_v14 = vpop.f32.mrf.mxu1 }
 0x257   : > { %v1618_v53 = vmax.f32 %v4046_v11, %v4048_v14 }
 0x258   : > { %v4052_v16 = vpop.f32.mrf.mxu1 }
 0x259   : > { %1619 = vmax.xlane.f32.xlu0 %v1618_v53 }
 0x25a   : > { %v4054_v18 = vpop.f32.mrf.mxu1 }
 0x25b   : > { %v1621_v20 = vmax.f32 %v4052_v16, %v4054_v18 }
 0x25c   : > { %v4058_v61 = vpop.f32.mrf.mxu1 }
 0x25d   : > { %1622 = vmax.xlane.f32.xlu1 %v1621_v20 }
 0x25e   : > { %v4060_v59 = vpop.f32.mrf.mxu1 }
 0x25f   : > { %v1624_v22 = vmax.f32 %v4058_v61, %v4060_v59 }
 0x260   : > { %v4064_v24 = vpop.f32.mrf.mxu1 }
 0x261   : > { %1625 = vmax.xlane.f32.xlu0 %v1624_v22 }
 0x262   : > { %v4066_v26 = vpop.f32.mrf.mxu1 }
 0x263   : > { %v1627_v28 = vmax.f32 %v4064_v24, %v4066_v26 }
 0x264   : > { %v4070_v54 = vpop.f32.mrf.mxu1 }
 0x265   : > { %1628 = vmax.xlane.f32.xlu1 %v1627_v28 }
 0x266   : > { %v4072_v58 = vpop.f32.mrf.mxu1 }
 0x267   : > { %v1630_v62 = vmax.f32 %v4070_v54, %v4072_v58 }
 0x268   : > { %v4076_v30 = vpop.f32.mrf.mxu1 }
 0x269   : > { %1631 = vmax.xlane.f32.xlu0 %v1630_v62 }
 0x26a   : > { %v4078_v32 = vpop.f32.mrf.mxu1 }
 0x26b   : > { %v1633_v0 = vmax.f32 %v4076_v30, %v4078_v32 }
 0x26c   : > { %v4082_v34 = vpop.f32.mrf.mxu1 }
 0x26d   : > { %1634 = vmax.xlane.f32.xlu1 %v1633_v0 }
 0x26e   : > { %v4084_v2 = vpop.f32.mrf.mxu1 }
 0x26f   : > { %v1636_v21 = vmax.f32 %v4082_v34, %v4084_v2 }
 0x270   : > { %v4088_v23 = vpop.f32.mrf.mxu1 }
 0x271   : > { %1637 = vmax.xlane.f32.xlu0 %v1636_v21 }
 0x272   : > { %v4090_v17 = vpop.f32.mrf.mxu1 }
 0x273   : > { %v1639_v55 = vmax.f32 %v4088_v23, %v4090_v17 }
 0x274   : > { %v4094_v19 = vpop.f32.mrf.mxu1 }
 0x275   : > { %1640 = vmax.xlane.f32.xlu1 %v1639_v55 }
 0x276   : > { %v4096_v41 = vpop.f32.mrf.mxu1 }
 0x277   : > { %v1642_v25 = vmax.f32 %v4094_v19, %v4096_v41 }
 0x278   : > { %v4100_v40 = vpop.f32.mrf.mxu1 }
 0x279   : > { %1643 = vmax.xlane.f32.xlu0 %v1642_v25 }
 0x27a   : > { %v4102_v13 = vpop.f32.mrf.mxu1 }
 0x27b   : > { %v1645_v43 = vmax.f32 %v4100_v40, %v4102_v13 }
 0x27c   : > { %v4106_v42 = vpop.f32.mrf.mxu1 }
 0x27d   : > { %1646 = vmax.xlane.f32.xlu1 %v1645_v43 }
 0x27e   : > { %v4108_v39 = vpop.f32.mrf.mxu1 }
 0x27f   : > { %v1648_v15 = vmax.f32 %v4106_v42, %v4108_v39 }
 0x280   : > { %v4112_v45 = vpop.f32.mrf.mxu1 }
 0x281   : > { %1649 = vmax.xlane.f32.xlu0 %v1648_v15 }
 0x282   : > { %v4114_v37 = vpop.f32.mrf.mxu1 }
 0x283   : > { %v1651_v10 = vmax.f32 %v4112_v45, %v4114_v37 }
 0x284   : > { %v4118_v44 = vpop.f32.mrf.mxu1 }
 0x285   : > { %1652 = vmax.xlane.f32.xlu1 %v1651_v10 }
 0x286   : > { %v4120_v12 = vpop.f32.mrf.mxu1 }
 0x287   : > { %v1654_v35 = vmax.f32 %v4118_v44, %v4120_v12 }
 0x288   : > { %v4124_v47 = vpop.f32.mrf.mxu1 }
 0x289   : > { %1655 = vmax.xlane.f32.xlu0 %v1654_v35 }
 0x28a   : > { %v4126_v8 = vpop.f32.mrf.mxu1 }
 0x28b   : > { %v1657_v1 = vmax.f32 %v4124_v47, %v4126_v8 }
 0x28c   : > { %v4130_v48 = vpop.f32.mrf.mxu1 }
 0x28d   : > { %1658 = vmax.xlane.f32.xlu1 %v1657_v1 }
 0x28e   : > { %v4132_v27 = vpop.f32.mrf.mxu1 }
 0x28f   : > { %v1660_v60 = vmax.f32 %v4130_v48, %v4132_v27 }
 0x290   : > { %v4136_v5 = vpop.f32.mrf.mxu1 }
 0x291   : > { %1661 = vmax.xlane.f32.xlu0 %v1660_v60 }
 0x292   : > { %v4138_v7 = vpop.f32.mrf.mxu1 }
 0x293   : > { %v1663_v9 = vmax.f32 %v4136_v5, %v4138_v7 }
 0x294   : > { %v4142_v53 = vpop.f32.mrf.mxu1 }
 0x295   : > { %1664 = vmax.xlane.f32.xlu1 %v1663_v9 }
 0x296   : > { %v4144_v20 = vpop.f32.mrf.mxu1 }
 0x297   : > { %v1666_v22 = vmax.f32 %v4142_v53, %v4144_v20 }
 0x298   : > { %v4148_v28 = vpop.f32.mrf.mxu1 }
 0x299   : > { %4416 = vst [vmem:[#allocation3_spill] sm:$0xff] %v4148_v28  ;;  %1667 = vmax.xlane.f32.xlu0 %v1666_v22 }
 0x29a   : > { %v4150_v62 = vpop.f32.mrf.mxu1 }
 0x29b   : > { %4417 = vst [vmem:[#allocation4_spill] sm:$0xff] %v4150_v62  ;;  %v1669_v0 = vmax.f32 %v4148_v28, %v4150_v62 }
 0x29c   : > { %v4154_v21 = vpop.f32.mrf.mxu1 }
 0x29d   : > { %4418 = vst [vmem:[#allocation5_spill] sm:$0xff] %v4154_v21  ;;  %1670 = vmax.xlane.f32.xlu1 %v1669_v0 }
 0x29e   : > { %v4156_v55 = vpop.f32.mrf.mxu1 }
 0x29f   : > { %4419 = vst [vmem:[#allocation6_spill] sm:$0xff] %v4156_v55  ;;  %v1672_v25 = vmax.f32 %v4154_v21, %v4156_v55 }
 0x2a0   : > { %v4160_v43 = vpop.f32.mrf.mxu1 }
 0x2a1   : > { %4420 = vst [vmem:[#allocation7_spill] sm:$0xff] %v4160_v43  ;;  %1673 = vmax.xlane.f32.xlu0 %v1672_v25 }
 0x2a2   : > { %v4162_v15 = vpop.f32.mrf.mxu1 }
 0x2a3   : > { %4421 = vst [vmem:[#allocation8_spill] sm:$0xff] %v4162_v15  ;;  %v1675_v10 = vmax.f32 %v4160_v43, %v4162_v15 }
 0x2a4   : > { %v4166_v35 = vpop.f32.mrf.mxu1 }
 0x2a5   : > { %4422 = vst [vmem:[#allocation9_spill] sm:$0xff] %v4166_v35  ;;  %1676 = vmax.xlane.f32.xlu1 %v1675_v10 }
 0x2a6   : > { %v4168_v1 = vpop.f32.mrf.mxu1 }
 0x2a7   : > { %4423 = vst [vmem:[#allocation10_spill] sm:$0xff] %v4168_v1  ;;  %v1678_v60 = vmax.f32 %v4166_v35, %v4168_v1 }
 0x2a8   : > { %v4172_v9 = vpop.f32.mrf.mxu1 }
 0x2a9   : > { %4424 = vst [vmem:[#allocation11_spill] sm:$0xff] %v4172_v9  ;;  %1679 = vmax.xlane.f32.xlu0 %v1678_v60 }
 0x2aa   : > { %v4174_v22 = vpop.f32.mrf.mxu1 }
 0x2ab   : > { %4425 = vst [vmem:[#allocation12_spill] sm:$0xff] %v4174_v22  ;;  %v1681_v0 = vmax.f32 %v4172_v9, %v4174_v22 }
 0x2ac   : > { %v4178_v25 = vpop.f32.mrf.mxu1 }
 0x2ad   : > { %4426 = vst [vmem:[#allocation13_spill] sm:$0xff] %v4178_v25  ;;  %1682 = vmax.xlane.f32.xlu1 %v1681_v0 }
 0x2ae   : > { %v4180_v15 = vpop.f32.mrf.mxu1 }
 0x2af   : > { %4427 = vst [vmem:[#allocation14_spill] sm:$0xff] %v4180_v15  ;;  %v1684_v10 = vmax.f32 %v4178_v25, %v4180_v15 }
 0x2b0   : > { %v4184_v43 = vpop.f32.mrf.mxu1 }
 0x2b1   : > { %1685 = vmax.xlane.f32.xlu0 %v1684_v10 }
 0x2b2   : > { %v4186_v1 = vpop.f32.mrf.mxu1 }
 0x2b3   : > { %4428 = vst [vmem:[#allocation15_spill] sm:$0xff] %v4186_v1  ;;  %v1687_v60 = vmax.f32 %v4184_v43, %v4186_v1 }
 0x2b5   : > { %1688 = vmax.xlane.f32.xlu1 %v1687_v60 }
 0x2c2   : > { %v1596_v35 = vpop.xlane.xlu0 %1595 }
 0x2c3   : > { %v1690_v22 = vsub.f32 %v3998_v6, %v1596_v35  ;;  %v1691_v9 = vsub.f32 %v4000_v36, %v1596_v35 }
 0x2c5   : > { %v1754_v0 = vmul.f32 1.442695, %v1690_v22  ;;  %v1756_v55 = vmul.f32 1.442695, %v1691_v9 }
 0x2c6   : > { %v1599_v21 = vpop.xlane.xlu0 %1598 }
 0x2c7   : > { %2985 = vpow2.f32 %v1754_v0  ;;  %v1692_v15 = vsub.f32 %v4004_v46, %v1599_v21  ;;  %v1693_v25 = vsub.f32 %v4006_v31, %v1599_v21 }
 0x2c8   : > { %2987 = vpow2.f32 %v1756_v55 }
 0x2c9   : > { %v1758_v10 = vmul.f32 1.442695, %v1692_v15  ;;  %v1760_v62 = vmul.f32 1.442695, %v1693_v25 }
 0x2ca   : > { %v1602_v28 = vpop.xlane.xlu1 %1601 }
 0x2cb   : > { %2989 = vpow2.f32 %v1758_v10  ;;  %v1694_v60 = vsub.f32 %v4010_v49, %v1602_v28  ;;  %v1695_v1 = vsub.f32 %v4012_v33, %v1602_v28 }
 0x2cc   : > { %2991 = vpow2.f32 %v1760_v62 }
 0x2cd   : > { %v1762_v6 = vmul.f32 1.442695, %v1694_v60  ;;  %v1764_v36 = vmul.f32 1.442695, %v1695_v1 }
 0x2ce   : > { %v1605_v35 = vpop.xlane.xlu1 %1604 }
 0x2cf   : > { %2993 = vpow2.f32 %v1762_v6  ;;  %v1696_v9 = vsub.f32 %v4016_v38, %v1605_v35  ;;  %v1697_v46 = vsub.f32 %v4018_v3, %v1605_v35 }
 0x2d0   : > { %2995 = vpow2.f32 %v1764_v36 }
 0x2d1   : > { %v1766_v31 = vmul.f32 1.442695, %v1696_v9  ;;  %v1768_v21 = vmul.f32 1.442695, %v1697_v46 }
 0x2d2   : > { %v1608_v55 = vpop.xlane.xlu0 %1607 }
 0x2d3   : > { %2997 = vpow2.f32 %v1766_v31  ;;  %v1698_v15 = vsub.f32 %v4022_v52, %v1608_v55  ;;  %v1699_v49 = vsub.f32 %v4024_v4, %v1608_v55 }
 0x2d4   : > { %v2986_v22 = vpop.eup %2985  ;;  %2999 = vpow2.f32 %v1768_v21 }
 0x2d5   : > { %v2988_v33 = vpop.eup %2987  ;;  %v1770_v28 = vmul.f32 1.442695, %v1698_v15  ;;  %v1772_v62 = vmul.f32 1.442695, %v1699_v49 }
 0x2d6   : > { %2042 = vmatprep.mubr.f32.mxu0 %v2988_v33  ;;  %v1611_v1 = vpop.xlane.xlu1 %1610  ;;  %v1882_v25 = vadd.f32 %v2988_v33, %v2986_v22 }
 0x2d7   : > { %3001 = vpow2.f32 %v1770_v28  ;;  %2043 = vmatmul.mubr.f32.vlgmr.msra.gmra.mxu0 %v2986_v22  ;;  %v1700_v38 = vsub.f32 %v4028_v29, %v1611_v1  ;;  %v1701_v3 = vsub.f32 %v4030_v50, %v1611_v1 }
 0x2d8   : > { %v2990_v0 = vpop.eup %2989  ;;  %3003 = vpow2.f32 %v1772_v62  ;;  %1883 = vadd.xlane.f32.xlu0 %v1882_v25 }
 0x2d9   : > { %v2992_v52 = vpop.eup %2991  ;;  %v1774_v10 = vmul.f32 1.442695, %v1700_v38  ;;  %v1776_v4 = vmul.f32 1.442695, %v1701_v3 }
 0x2da   : > { %2047 = vmatprep.mubr.f32.mxu0 %v2992_v52  ;;  %v1614_v60 = vpop.xlane.xlu0 %1613  ;;  %v1885_v6 = vadd.f32 %v2992_v52, %v2990_v0 }
 0x2db   : > { %3005 = vpow2.f32 %v1774_v10  ;;  %2048 = vmatmul.mubr.f32.gmra.mxu0 %v2990_v0  ;;  %v1702_v36 = vsub.f32 %v4034_v63, %v1614_v60  ;;  %v1703_v35 = vsub.f32 %v4036_v51, %v1614_v60 }
 0x2dc   : > { %v2994_v9 = vpop.eup %2993  ;;  %3007 = vpow2.f32 %v1776_v4  ;;  %1886 = vadd.xlane.f32.xlu1 %v1885_v6 }
 0x2dd   : > { %v2996_v29 = vpop.eup %2995  ;;  %v1778_v50 = vmul.f32 1.442695, %v1702_v36  ;;  %v1780_v46 = vmul.f32 1.442695, %v1703_v35 }
 0x2de   : > { %2052 = vmatprep.mubr.f32.mxu0 %v2996_v29  ;;  %v1617_v31 = vpop.xlane.xlu1 %1616  ;;  %v1888_v21 = vadd.f32 %v2996_v29, %v2994_v9 }
 0x2df   : > { %3009 = vpow2.f32 %v1778_v50  ;;  %2053 = vmatmul.mubr.f32.gmra.mxu0 %v2994_v9  ;;  %v1704_v55 = vsub.f32 %v4040_v56, %v1617_v31  ;;  %v1705_v15 = vsub.f32 %v4042_v57, %v1617_v31 }
 0x2e0   : > { %v2998_v49 = vpop.eup %2997  ;;  %3011 = vpow2.f32 %v1780_v46  ;;  %1889 = vadd.xlane.f32.xlu0 %v1888_v21 }
 0x2e1   : > { %v3000_v63 = vpop.eup %2999  ;;  %v1782_v51 = vmul.f32 1.442695, %v1704_v55  ;;  %v1784_v22 = vmul.f32 1.442695, %v1705_v15 }
 0x2e2   : > { %2057 = vmatprep.mubr.f32.mxu0 %v3000_v63  ;;  %v1620_v33 = vpop.xlane.xlu0 %1619  ;;  %v1891_v28 = vadd.f32 %v3000_v63, %v2998_v49 }
 0x2e3   : > { %3013 = vpow2.f32 %v1782_v51  ;;  %2058 = vmatmul.mubr.f32.gmra.mxu0 %v2998_v49  ;;  %v1706_v62 = vsub.f32 %v4046_v11, %v1620_v33  ;;  %v1707_v1 = vsub.f32 %v4048_v14, %v1620_v33 }
 0x2e4   : > { %v3002_v25 = vpop.eup %3001  ;;  %3015 = vpow2.f32 %v1784_v22  ;;  %1892 = vadd.xlane.f32.xlu1 %v1891_v28 }
 0x2e5   : > { %v3004_v56 = vpop.eup %3003  ;;  %v1786_v57 = vmul.f32 1.442695, %v1706_v62  ;;  %v1788_v38 = vmul.f32 1.442695, %v1707_v1 }
 0x2e6   : > { %2062 = vmatprep.mubr.f32.mxu0 %v3004_v56  ;;  %v1623_v3 = vpop.xlane.xlu1 %1622  ;;  %v1894_v0 = vadd.f32 %v3004_v56, %v3002_v25 }
 0x2e7   : > { %3017 = vpow2.f32 %v1786_v57  ;;  %2063 = vmatmul.mubr.f32.gmra.mxu0 %v3002_v25  ;;  %v1708_v52 = vsub.f32 %v4052_v16, %v1623_v3  ;;  %v1709_v10 = vsub.f32 %v4054_v18, %v1623_v3 }
 0x2e8   : > { %v3006_v4 = vpop.eup %3005  ;;  %3019 = vpow2.f32 %v1788_v38  ;;  %1895 = vadd.xlane.f32.xlu0 %v1894_v0 }
 0x2e9   : > { %v3008_v11 = vpop.eup %3007  ;;  %v1790_v14 = vmul.f32 1.442695, %v1708_v52  ;;  %v1792_v60 = vmul.f32 1.442695, %v1709_v10 }
 0x2ea   : > { %2067 = vmatprep.mubr.f32.mxu0 %v3008_v11  ;;  %v1626_v6 = vpop.xlane.xlu0 %1625  ;;  %v1897_v36 = vadd.f32 %v3008_v11, %v3006_v4 }
 0x2eb   : > { %3021 = vpow2.f32 %v1790_v14  ;;  %2068 = vmatmul.mubr.f32.gmra.mxu0 %v3006_v4  ;;  %v1710_v35 = vsub.f32 %v4058_v61, %v1626_v6  ;;  %v1711_v9 = vsub.f32 %v4060_v59, %v1626_v6 }
 0x2ec   : > { %v3010_v29 = vpop.eup %3009  ;;  %3023 = vpow2.f32 %v1792_v60  ;;  %1898 = vadd.xlane.f32.xlu1 %v1897_v36 }
 0x2ed   : > { %v3012_v16 = vpop.eup %3011  ;;  %v1794_v18 = vmul.f32 1.442695, %v1710_v35  ;;  %v1796_v50 = vmul.f32 1.442695, %v1711_v9 }
 0x2ee   : > { %2072 = vmatprep.mubr.f32.mxu0 %v3012_v16  ;;  %v1629_v46 = vpop.xlane.xlu1 %1628  ;;  %v1900_v31 = vadd.f32 %v3012_v16, %v3010_v29 }
 0x2ef   : > { %3025 = vpow2.f32 %v1794_v18  ;;  %2073 = vmatmul.mubr.f32.gmra.mxu0 %v3010_v29  ;;  %v1712_v21 = vsub.f32 %v4064_v24, %v1629_v46  ;;  %v1713_v55 = vsub.f32 %v4066_v26, %v1629_v46 }
 0x2f0   : > { %v3014_v15 = vpop.eup %3013  ;;  %3027 = vpow2.f32 %v1796_v50  ;;  %1901 = vadd.xlane.f32.xlu0 %v1900_v31 }
 0x2f1   : > { %v3016_v61 = vpop.eup %3015  ;;  %v1798_v59 = vmul.f32 1.442695, %v1712_v21  ;;  %v1800_v49 = vmul.f32 1.442695, %v1713_v55 }
 0x2f2   : > { %2077 = vmatprep.mubr.f32.mxu0 %v3016_v61  ;;  %v1632_v63 = vpop.xlane.xlu0 %1631  ;;  %v1903_v51 = vadd.f32 %v3016_v61, %v3014_v15 }
 0x2f3   : > { %3029 = vpow2.f32 %v1798_v59  ;;  %2078 = vmatmul.mubr.f32.gmra.mxu0 %v3014_v15  ;;  %v1714_v22 = vsub.f32 %v4070_v54, %v1632_v63  ;;  %v1715_v33 = vsub.f32 %v4072_v58, %v1632_v63 }
 0x2f4   : > { %v3018_v28 = vpop.eup %3017  ;;  %3031 = vpow2.f32 %v1800_v49  ;;  %1904 = vadd.xlane.f32.xlu1 %v1903_v51 }
 0x2f5   : > { %v3020_v24 = vpop.eup %3019  ;;  %v1802_v26 = vmul.f32 1.442695, %v1714_v22  ;;  %v1804_v62 = vmul.f32 1.442695, %v1715_v33 }
 0x2f6   : > { %2082 = vmatprep.mubr.f32.mxu0 %v3020_v24  ;;  %v1635_v1 = vpop.xlane.xlu1 %1634  ;;  %v1906_v25 = vadd.f32 %v3020_v24, %v3018_v28 }
 0x2f7   : > { %3033 = vpow2.f32 %v1802_v26  ;;  %2083 = vmatmul.mubr.f32.gmra.mxu0 %v3018_v28  ;;  %v1716_v56 = vsub.f32 %v4076_v30, %v1635_v1  ;;  %v1717_v57 = vsub.f32 %v4078_v32, %v1635_v1 }
 0x2f8   : > { %v3022_v38 = vpop.eup %3021  ;;  %3035 = vpow2.f32 %v1804_v62  ;;  %1907 = vadd.xlane.f32.xlu0 %v1906_v25 }
 0x2f9   : > { %v3024_v54 = vpop.eup %3023  ;;  %v1806_v58 = vmul.f32 1.442695, %v1716_v56  ;;  %v1808_v3 = vmul.f32 1.442695, %v1717_v57 }
 0x2fa   : > { %2087 = vmatprep.mubr.f32.mxu0 %v3024_v54  ;;  %v1638_v0 = vpop.xlane.xlu0 %1637  ;;  %v1909_v52 = vadd.f32 %v3024_v54, %v3022_v38 }
 0x2fb   : > { %3037 = vpow2.f32 %v1806_v58  ;;  %2088 = vmatmul.mubr.f32.gmra.mxu0 %v3022_v38  ;;  %v1718_v10 = vsub.f32 %v4082_v34, %v1638_v0  ;;  %v1719_v4 = vsub.f32 %v4084_v2, %v1638_v0 }
 0x2fc   : > { %v3026_v11 = vpop.eup %3025  ;;  %3039 = vpow2.f32 %v1808_v3  ;;  %1910 = vadd.xlane.f32.xlu1 %v1909_v52 }
 0x2fd   : > { %v3028_v30 = vpop.eup %3027  ;;  %v1810_v32 = vmul.f32 1.442695, %v1718_v10  ;;  %v1812_v14 = vmul.f32 1.442695, %v1719_v4 }
 0x2fe   : > { %2092 = vmatprep.mubr.f32.mxu0 %v3028_v30  ;;  %v1641_v60 = vpop.xlane.xlu1 %1640  ;;  %v1912_v6 = vadd.f32 %v3028_v30, %v3026_v11 }
 0x2ff   : > { %3041 = vpow2.f32 %v1810_v32  ;;  %2093 = vmatmul.mubr.f32.gmra.mxu0 %v3026_v11  ;;  %v1720_v36 = vsub.f32 %v4088_v23, %v1641_v60  ;;  %v1721_v35 = vsub.f32 %v4090_v17, %v1641_v60 }
 0x300   : > { %v3030_v9 = vpop.eup %3029  ;;  %3043 = vpow2.f32 %v1812_v14  ;;  %1913 = vadd.xlane.f32.xlu0 %v1912_v6 }
 0x301   : > { %v3032_v34 = vpop.eup %3031  ;;  %v1814_v2 = vmul.f32 1.442695, %v1720_v36  ;;  %v1816_v29 = vmul.f32 1.442695, %v1721_v35 }
 0x302   : > { %2097 = vmatprep.mubr.f32.mxu0 %v3032_v34  ;;  %v1644_v16 = vpop.xlane.xlu0 %1643  ;;  %v1915_v18 = vadd.f32 %v3032_v34, %v3030_v9 }
 0x303   : > { %3045 = vpow2.f32 %v1814_v2  ;;  %2098 = vmatmul.mubr.f32.gmra.mxu0 %v3030_v9  ;;  %v1722_v50 = vsub.f32 %v4094_v19, %v1644_v16  ;;  %v1723_v46 = vsub.f32 %v4096_v41, %v1644_v16 }
 0x304   : > { %v3034_v31 = vpop.eup %3033  ;;  %3047 = vpow2.f32 %v1816_v29  ;;  %1916 = vadd.xlane.f32.xlu1 %v1915_v18 }
 0x305   : > { %v3036_v23 = vpop.eup %3035  ;;  %v1818_v17 = vmul.f32 1.442695, %v1722_v50  ;;  %v1820_v21 = vmul.f32 1.442695, %v1723_v46 }
 0x306   : > { %2102 = vmatprep.mubr.f32.mxu0 %v3036_v23  ;;  %v1647_v55 = vpop.xlane.xlu1 %1646  ;;  %v1918_v15 = vadd.f32 %v3036_v23, %v3034_v31 }
 0x307   : > { %3049 = vpow2.f32 %v1818_v17  ;;  %2103 = vmatmul.mubr.f32.gmra.mxu0 %v3034_v31  ;;  %v1724_v61 = vsub.f32 %v4100_v40, %v1647_v55  ;;  %v1725_v59 = vsub.f32 %v4102_v13, %v1647_v55 }
 0x308   : > { %v3038_v49 = vpop.eup %3037  ;;  %3051 = vpow2.f32 %v1820_v21  ;;  %1919 = vadd.xlane.f32.xlu0 %v1918_v15 }
 0x309   : > { %v3040_v19 = vpop.eup %3039  ;;  %v1822_v41 = vmul.f32 1.442695, %v1724_v61  ;;  %v1824_v63 = vmul.f32 1.442695, %v1725_v59 }
 0x30a   : > { %2107 = vmatprep.mubr.f32.mxu0 %v3040_v19  ;;  %v1650_v51 = vpop.xlane.xlu0 %1649  ;;  %v1921_v22 = vadd.f32 %v3040_v19, %v3038_v49  ;;  %v4429_v19 = vld [vmem:[#allocation3_spill] sm:$0xff] }
 0x30b   : > { %3053 = vpow2.f32 %v1822_v41  ;;  %2108 = vmatmul.mubr.f32.gmra.mxu0 %v3038_v49  ;;  %v1726_v33 = vsub.f32 %v4106_v42, %v1650_v51  ;;  %v1727_v28 = vsub.f32 %v4108_v39, %v1650_v51 }
 0x30c   : > { %v3042_v24 = vpop.eup %3041  ;;  %3055 = vpow2.f32 %v1824_v63  ;;  %1922 = vadd.xlane.f32.xlu1 %v1921_v22  ;;  %v4430_v63 = vld [vmem:[#allocation4_spill] sm:$0xff] }
 0x30d   : > { %v3044_v40 = vpop.eup %3043  ;;  %v1826_v13 = vmul.f32 1.442695, %v1726_v33  ;;  %v1828_v26 = vmul.f32 1.442695, %v1727_v28 }
 0x30e   : > { %2112 = vmatprep.mubr.f32.mxu0 %v3044_v40  ;;  %v1653_v62 = vpop.xlane.xlu1 %1652  ;;  %v1924_v1 = vadd.f32 %v3044_v40, %v3042_v24  ;;  %v4431_v40 = vld [vmem:[#allocation5_spill] sm:$0xff] }
 0x30f   : > { %3057 = vpow2.f32 %v1826_v13  ;;  %2113 = vmatmul.mubr.f32.gmra.mxu0 %v3042_v24  ;;  %v1728_v25 = vsub.f32 %v4112_v45, %v1653_v62  ;;  %v1729_v56 = vsub.f32 %v4114_v37, %v1653_v62 }
 0x310   : > { %v3046_v57 = vpop.eup %3045  ;;  %3059 = vpow2.f32 %v1828_v26  ;;  %1925 = vadd.xlane.f32.xlu0 %v1924_v1  ;;  %v4432_v26 = vld [vmem:[#allocation6_spill] sm:$0xff] }
 0x311   : > { %v3048_v42 = vpop.eup %3047  ;;  %v1830_v39 = vmul.f32 1.442695, %v1728_v25  ;;  %v1832_v38 = vmul.f32 1.442695, %v1729_v56 }
 0x312   : > { %2117 = vmatprep.mubr.f32.mxu0 %v3048_v42  ;;  %v1656_v54 = vpop.xlane.xlu0 %1655  ;;  %v1927_v58 = vadd.f32 %v3048_v42, %v3046_v57 }
 0x313   : > { %3061 = vpow2.f32 %v1830_v39  ;;  %2118 = vmatmul.mubr.f32.gmra.mxu0 %v3046_v57  ;;  %v1730_v3 = vsub.f32 %v4118_v44, %v1656_v54  ;;  %v1731_v0 = vsub.f32 %v4120_v12, %v1656_v54 }
 0x314   : > { %v3050_v52 = vpop.eup %3049  ;;  %3063 = vpow2.f32 %v1832_v38  ;;  %1928 = vadd.xlane.f32.xlu1 %v1927_v58  ;;  %v4433_v38 = vld [vmem:[#allocation7_spill] sm:$0xff]  ;;  %v4434_v58 = vld [vmem:[#allocation8_spill] sm:$0xff] }
 0x315   : > { %v3052_v45 = vpop.eup %3051  ;;  %v1834_v37 = vmul.f32 1.442695, %v1730_v3  ;;  %v1836_v10 = vmul.f32 1.442695, %v1731_v0 }
 0x316   : > { %2122 = vmatprep.mubr.f32.mxu0 %v3052_v45  ;;  %v1659_v4 = vpop.xlane.xlu1 %1658  ;;  %v1930_v11 = vadd.f32 %v3052_v45, %v3050_v52 }
 0x317   : > { %3065 = vpow2.f32 %v1834_v37  ;;  %2123 = vmatmul.mubr.f32.gmra.mxu0 %v3050_v52  ;;  %v1732_v30 = vsub.f32 %v4124_v47, %v1659_v4  ;;  %v1733_v32 = vsub.f32 %v4126_v8, %v1659_v4 }
 0x318   : > { %v3054_v14 = vpop.eup %3053  ;;  %3067 = vpow2.f32 %v1836_v10  ;;  %1931 = vadd.xlane.f32.xlu0 %v1930_v11  ;;  %v4435_v11 = vld [vmem:[#allocation9_spill] sm:$0xff] }
 0x319   : > { %v3056_v44 = vpop.eup %3055  ;;  %v1838_v12 = vmul.f32 1.442695, %v1732_v30  ;;  %v1840_v60 = vmul.f32 1.442695, %v1733_v32  ;;  %v4436_v32 = vld [vmem:[#allocation10_spill] sm:$0xff] }
 0x31a   : > { %2127 = vmatprep.mubr.f32.mxu0 %v3056_v44  ;;  %v1662_v6 = vpop.xlane.xlu0 %1661  ;;  %v1933_v36 = vadd.f32 %v3056_v44, %v3054_v14 }
 0x31b   : > { %3069 = vpow2.f32 %v1838_v12  ;;  %2128 = vmatmul.mubr.f32.gmra.mxu0 %v3054_v14  ;;  %v1734_v35 = vsub.f32 %v4130_v48, %v1662_v6  ;;  %v1735_v9 = vsub.f32 %v4132_v27, %v1662_v6 }
 0x31c   : > { %v3058_v34 = vpop.eup %3057  ;;  %3071 = vpow2.f32 %v1840_v60  ;;  %1934 = vadd.xlane.f32.xlu1 %v1933_v36 }
 0x31d   : > { %v3060_v47 = vpop.eup %3059  ;;  %v1842_v8 = vmul.f32 1.442695, %v1734_v35  ;;  %v1844_v2 = vmul.f32 1.442695, %v1735_v9  ;;  %v4437_v9 = vld [vmem:[#allocation11_spill] sm:$0xff] }
 0x31e   : > { %2132 = vmatprep.mubr.f32.mxu0 %v3060_v47  ;;  %v1665_v29 = vpop.xlane.xlu1 %1664  ;;  %v1936_v16 = vadd.f32 %v3060_v47, %v3058_v34  ;;  %v4438_v47 = vld [vmem:[#allocation12_spill] sm:$0xff] }
 0x31f   : > { %3073 = vpow2.f32 %v1842_v8  ;;  %2133 = vmatmul.mubr.f32.gmra.mxu0 %v3058_v34  ;;  %v1736_v18 = vsub.f32 %v4136_v5, %v1665_v29  ;;  %v1737_v50 = vsub.f32 %v4138_v7, %v1665_v29 }
 0x320   : > { %v3062_v46 = vpop.eup %3061  ;;  %3075 = vpow2.f32 %v1844_v2  ;;  %1937 = vadd.xlane.f32.xlu0 %v1936_v16 }
 0x321   : > { %v3064_v48 = vpop.eup %3063  ;;  %v1846_v27 = vmul.f32 1.442695, %v1736_v18  ;;  %v1848_v31 = vmul.f32 1.442695, %v1737_v50 }
 0x322   : > { %2137 = vmatprep.mubr.f32.mxu0 %v3064_v48  ;;  %v1668_v23 = vpop.xlane.xlu0 %1667  ;;  %v1939_v17 = vadd.f32 %v3064_v48, %v3062_v46  ;;  %v4439_v48 = vld [vmem:[#allocation13_spill] sm:$0xff] }
 0x323   : > { %3077 = vpow2.f32 %v1846_v27  ;;  %2138 = vmatmul.mubr.f32.gmra.mxu0 %v3062_v46  ;;  %v1738_v21 = vsub.f32 %v4142_v53, %v1668_v23  ;;  %v1739_v55 = vsub.f32 %v4144_v20, %v1668_v23 }
 0x324   : > { %v3066_v15 = vpop.eup %3065  ;;  %3079 = vpow2.f32 %v1848_v31  ;;  %1940 = vadd.xlane.f32.xlu1 %v1939_v17  ;;  %v4440_v31 = vld [vmem:[#allocation14_spill] sm:$0xff] }
 0x325   : > { %v3068_v5 = vpop.eup %3067  ;;  %v1850_v7 = vmul.f32 1.442695, %v1738_v21  ;;  %v1852_v61 = vmul.f32 1.442695, %v1739_v55 }
 0x326   : > { %2142 = vmatprep.mubr.f32.mxu0 %v3068_v5  ;;  %v1671_v59 = vpop.xlane.xlu1 %1670  ;;  %v1942_v49 = vadd.f32 %v3068_v5, %v3066_v15 }
 0x327   : > { %3081 = vpow2.f32 %v1850_v7  ;;  %2143 = vmatmul.mubr.f32.gmra.mxu0 %v3066_v15  ;;  %v1740_v41 = vsub.f32 %v4429_v19, %v1671_v59  ;;  %v1741_v51 = vsub.f32 %v4430_v63, %v1671_v59  ;;  %v4441_v59 = vld [vmem:[#allocation15_spill] sm:$0xff] }
 0x328   : > { %v3070_v22 = vpop.eup %3069  ;;  %3083 = vpow2.f32 %v1852_v61  ;;  %1943 = vadd.xlane.f32.xlu0 %v1942_v49 }
 0x329   : > { %v3072_v53 = vpop.eup %3071  ;;  %v1854_v20 = vmul.f32 1.442695, %v1740_v41  ;;  %v1856_v33 = vmul.f32 1.442695, %v1741_v51 }
 0x32a   : > { %2147 = vmatprep.mubr.f32.mxu0 %v3072_v53  ;;  %v1674_v28 = vpop.xlane.xlu0 %1673  ;;  %v1945_v24 = vadd.f32 %v3072_v53, %v3070_v22 }
 0x32b   : > { %3085 = vpow2.f32 %v1854_v20  ;;  %2148 = vmatmul.mubr.f32.gmra.mxu0 %v3070_v22  ;;  %v1742_v13 = vsub.f32 %v4431_v40, %v1674_v28  ;;  %v1743_v62 = vsub.f32 %v4432_v26, %v1674_v28 }
 0x32c   : > { %v3074_v1 = vpop.eup %3073  ;;  %3087 = vpow2.f32 %v1856_v33  ;;  %1946 = vadd.xlane.f32.xlu1 %v1945_v24 }
 0x32d   : > { %v3076_v25 = vpop.eup %3075  ;;  %v1858_v56 = vmul.f32 1.442695, %v1742_v13  ;;  %v1860_v57 = vmul.f32 1.442695, %v1743_v62 }
 0x32e   : > { %2152 = vmatprep.mubr.f32.mxu0 %v3076_v25  ;;  %v1677_v42 = vpop.xlane.xlu1 %1676  ;;  %v1948_v39 = vadd.f32 %v3076_v25, %v3074_v1 }
 0x32f   : > { %3089 = vpow2.f32 %v1858_v56  ;;  %2153 = vmatmul.mubr.f32.gmra.mxu0 %v3074_v1  ;;  %v1744_v54 = vsub.f32 %v4433_v38, %v1677_v42  ;;  %v1745_v3 = vsub.f32 %v4434_v58, %v1677_v42 }
 0x330   : > { %v3078_v0 = vpop.eup %3077  ;;  %3091 = vpow2.f32 %v1860_v57  ;;  %1949 = vadd.xlane.f32.xlu0 %v1948_v39 }
 0x331   : > { %v3080_v52 = vpop.eup %3079  ;;  %v1862_v45 = vmul.f32 1.442695, %v1744_v54  ;;  %v1864_v37 = vmul.f32 1.442695, %v1745_v3  ;;  %v4254_v3 = vstv %s2267_s23 }
 0x332   : > { %2157 = vmatprep.mubr.f32.mxu0 %v3080_v52  ;;  %v1680_v10 = vpop.xlane.xlu0 %1679  ;;  %v1951_v4 = vadd.f32 %v3080_v52, %v3078_v0 }
 0x333   : > { %3093 = vpow2.f32 %v1862_v45  ;;  %2158 = vmatmul.mubr.f32.gmra.mxu0 %v3078_v0  ;;  %v1746_v30 = vsub.f32 %v4435_v11, %v1680_v10  ;;  %v1747_v14 = vsub.f32 %v4436_v32, %v1680_v10  ;;  %v3177_v11 = vld [vmem:[%s3294_s19] sm:$0xff] }
 0x334   : > { %v3082_v44 = vpop.eup %3081  ;;  %3095 = vpow2.f32 %v1864_v37  ;;  %1952 = vadd.xlane.f32.xlu1 %v1951_v4 }
 0x335   : > { %v3084_v12 = vpop.eup %3083  ;;  %v1866_v60 = vmul.f32 1.442695, %v1746_v30  ;;  %v1868_v6 = vmul.f32 1.442695, %v1747_v14 }
 0x336   : > { %2162 = vmatprep.mubr.f32.mxu0 %v3084_v12  ;;  %v1683_v36 = vpop.xlane.xlu1 %1682  ;;  %v1954_v35 = vadd.f32 %v3084_v12, %v3082_v44 }
 0x337   : > { %3097 = vpow2.f32 %v1866_v60  ;;  %2163 = vmatmul.mubr.f32.gmra.mxu0 %v3082_v44  ;;  %v1748_v34 = vsub.f32 %v4437_v9, %v1683_v36  ;;  %v1749_v8 = vsub.f32 %v4438_v47, %v1683_v36  ;;  %v3178_v36 = vld [vmem:[%s3294_s19 + $0x8] sm:$0xff] }
 0x338   : > { %v3086_v2 = vpop.eup %3085  ;;  %3099 = vpow2.f32 %v1868_v6  ;;  %1955 = vadd.xlane.f32.xlu0 %v1954_v35 }
 0x339   : > { %v3088_v29 = vpop.eup %3087  ;;  %v1870_v16 = vmul.f32 1.442695, %v1748_v34  ;;  %v1872_v18 = vmul.f32 1.442695, %v1749_v8 }
 0x33a   : > { %2167 = vmatprep.mubr.f32.mxu0 %v3088_v29  ;;  %v1686_v50 = vpop.xlane.xlu0 %1685  ;;  %v1957_v46 = vadd.f32 %v3088_v29, %v3086_v2 }
 0x33b   : > { %3101 = vpow2.f32 %v1870_v16  ;;  %2168 = vmatmul.mubr.f32.gmra.mxu0 %v3086_v2  ;;  %v1750_v27 = vsub.f32 %v4439_v48, %v1686_v50  ;;  %v1751_v23 = vsub.f32 %v4440_v31, %v1686_v50  ;;  %v3179_v16 = vld [vmem:[%s3294_s19 + $0x10] sm:$0xff] }
 0x33c   : > { %v3090_v17 = vpop.eup %3089  ;;  %3103 = vpow2.f32 %v1872_v18  ;;  %1958 = vadd.xlane.f32.xlu1 %v1957_v46 }
 0x33d   : > { %v3092_v21 = vpop.eup %3091  ;;  %v1874_v55 = vmul.f32 1.442695, %v1750_v27  ;;  %v1876_v15 = vmul.f32 1.442695, %v1751_v23 }
 0x33e   : > { %2172 = vmatprep.mubr.f32.mxu0 %v3092_v21  ;;  %v1689_v5 = vpop.xlane.xlu1 %1688  ;;  %v1960_v7 = vadd.f32 %v3092_v21, %v3090_v17 }
 0x33f   : > { %3105 = vpow2.f32 %v1874_v55  ;;  %2173 = vmatmul.mubr.f32.gmra.mxu0 %v3090_v17  ;;  %v1752_v61 = vsub.f32 %v4184_v43, %v1689_v5  ;;  %v1753_v49 = vsub.f32 %v4441_v59, %v1689_v5  ;;  %v3180_v17 = vld [vmem:[%s3294_s19 + $0x18] sm:$0xff] }
 0x340   : > { %v3094_v19 = vpop.eup %3093  ;;  %3107 = vpow2.f32 %v1876_v15  ;;  %1961 = vadd.xlane.f32.xlu0 %v1960_v7 }
 0x341   : > { %v3096_v41 = vpop.eup %3095  ;;  %v1878_v63 = vmul.f32 1.442695, %v1752_v61  ;;  %v1880_v51 = vmul.f32 1.442695, %v1753_v49  ;;  %v3181_v49 = vld [vmem:[%s3294_s19 + $0x20] sm:$0xff] }
 0x342   : > { %2177 = vmatprep.mubr.f32.mxu0 %v3096_v41  ;;  %v1963_v22 = vadd.f32 %v3096_v41, %v3094_v19 }
 0x343   : > { %3109 = vpow2.f32 %v1878_v63  ;;  %2178 = vmatmul.mubr.f32.gmra.mxu0 %v3094_v19 }
 0x344   : > { %v3098_v53 = vpop.eup %3097  ;;  %3111 = vpow2.f32 %v1880_v51  ;;  %1964 = vadd.xlane.f32.xlu1 %v1963_v22 }
 0x345   : > { %v3100_v20 = vpop.eup %3099 }
 0x346   : > { %2182 = vmatprep.mubr.f32.mxu0 %v3100_v20  ;;  %v1966_v33 = vadd.f32 %v3100_v20, %v3098_v53 }
 0x347   : > { %2183 = vmatmul.mubr.f32.gmra.mxu0 %v3098_v53 }
 0x348   : > { %v3102_v43 = vpop.eup %3101  ;;  %1967 = vadd.xlane.f32.xlu0 %v1966_v33  ;;  %v3182_v33 = vld [vmem:[%s3294_s19 + $0x28] sm:$0xff] }
 0x349   : > { %v3104_v28 = vpop.eup %3103 }
 0x34a   : > { %2187 = vmatprep.mubr.f32.mxu0 %v3104_v28  ;;  %v1969_v24 = vadd.f32 %v3104_v28, %v3102_v43 }
 0x34b   : > { %2188 = vmatmul.mubr.f32.gmra.mxu0 %v3102_v43 }
 0x34c   : > { %v3106_v40 = vpop.eup %3105  ;;  %1970 = vadd.xlane.f32.xlu1 %v1969_v24 }
 0x34d   : > { %v3108_v13 = vpop.eup %3107 }
 0x34e   : > { %2192 = vmatprep.mubr.f32.mxu0 %v3108_v13  ;;  %v1972_v26 = vadd.f32 %v3108_v13, %v3106_v40 }
 0x34f   : > { %2193 = vmatmul.mubr.f32.gmra.mxu0 %v3106_v40 }
 0x350   : > { %v3110_v62 = vpop.eup %3109  ;;  %1973 = vadd.xlane.f32.xlu0 %v1972_v26 }
 0x351   : > { %v3112_v1 = vpop.eup %3111 }
 0x352   : > { %2197 = vmatprep.mubr.f32.mxu0 %v3112_v1  ;;  %v1975_v25 = vadd.f32 %v3112_v1, %v3110_v62  ;;  %v3183_v1 = vld [vmem:[%s3294_s19 + $0x30] sm:$0xff] }
 0x353   : > { %2198 = vmatmul.mubr.f32.gmra.mxu0 %v3110_v62 }
 0x354   : > { %1976 = vadd.xlane.f32.xlu1 %v1975_v25 }
 0x361   : > { %v1884_v56 = vpop.xlane.xlu0 %1883 }
 0x362   : > { %3113 = vrcp.f32 %v1884_v56 }
 0x365   : > { %v1887_v57 = vpop.xlane.xlu1 %1886 }
 0x366   : > { %3115 = vrcp.f32 %v1887_v57 }
 0x369   : > { %v1890_v42 = vpop.xlane.xlu0 %1889 }
 0x36a   : > { %3117 = vrcp.f32 %v1890_v42 }
 0x36d   : > { %v1893_v39 = vpop.xlane.xlu1 %1892 }
 0x36e   : > { %3119 = vrcp.f32 %v1893_v39 }
 0x36f   : > { %v3114_v38 = vpop.eup %3113 }
 0x371   : > { %v1896_v54 = vpop.xlane.xlu0 %1895 }
 0x372   : > { %3121 = vrcp.f32 %v1896_v54 }
 0x373   : > { %v3116_v37 = vpop.eup %3115 }
 0x375   : > { %v1899_v10 = vpop.xlane.xlu1 %1898 }
 0x376   : > { %3123 = vrcp.f32 %v1899_v10 }
 0x377   : > { %v3118_v12 = vpop.eup %3117 }
 0x379   : > { %v1902_v60 = vpop.xlane.xlu0 %1901 }
 0x37a   : > { %3125 = vrcp.f32 %v1902_v60 }
 0x37b   : > { %v3120_v8 = vpop.eup %3119 }
 0x37d   : > { %v1905_v2 = vpop.xlane.xlu1 %1904 }
 0x37e   : > { %3127 = vrcp.f32 %v1905_v2 }
 0x37f   : > { %v3122_v27 = vpop.eup %3121 }
 0x381   : > { %v1908_v31 = vpop.xlane.xlu0 %1907 }
 0x382   : > { %3129 = vrcp.f32 %v1908_v31 }
 0x383   : > { %v3124_v7 = vpop.eup %3123 }
 0x385   : > { %v1911_v61 = vpop.xlane.xlu1 %1910 }
 0x386   : > { %3131 = vrcp.f32 %v1911_v61 }
 0x387   : > { %v3126_v22 = vpop.eup %3125 }
 0x389   : > { %v1914_v53 = vpop.xlane.xlu0 %1913 }
 0x38a   : > { %3133 = vrcp.f32 %v1914_v53 }
 0x38b   : > { %v3128_v13 = vpop.eup %3127 }
 0x38d   : > { %v1917_v26 = vpop.xlane.xlu1 %1916 }
 0x38e   : > { %3135 = vrcp.f32 %v1917_v26 }
 0x38f   : > { %v3130_v39 = vpop.eup %3129 }
 0x393   : > { %v3132_v10 = vpop.eup %3131 }
 0x397   : > { %v2044_v58 = vpop.f32.mrf.mxu0  ;;  %v3134_v60 = vpop.eup %3133 }
 0x398   : > { %v2204_v0 = vmul.f32 %v3114_v38, %v2044_v58  ;;  %v1920_v38 = vpop.xlane.xlu0 %1919  ;;  %v3184_v58 = vld [vmem:[%s3294_s19 + $0x38] sm:$0xff] }
 0x399   : > { %v2046_v52 = vpop.f32.mrf.mxu0  ;;  %3137 = vrcp.f32 %v1920_v38 }
 0x39a   : > { %v2269_v45 = vmul.f32 %v4254_v3, %v2204_v0 }
 0x39b   : > { %v2049_v4 = vpop.f32.mrf.mxu0  ;;  %v3136_v2 = vpop.eup %3135 }
 0x39c   : > { %v2301_v30 = vadd.f32 %v3177_v11, %v2269_v45  ;;  %v2206_v32 = vmul.f32 %v3116_v37, %v2049_v4  ;;  %v1923_v4 = vpop.xlane.xlu1 %1922 }
 0x39d   : > { %v2051_v14 = vpop.f32.mrf.mxu0  ;;  %3139 = vrcp.f32 %v1923_v4 }
 0x39e   : > { %2333 = vst.msk [vmem:[%s4262_s26] sm:$0xff] %vm350_vm0, %v2301_v30  ;;  %v2270_v44 = vmul.f32 %v4254_v3, %v2206_v32  ;;  %v3185_v30 = vld [vmem:[%s3294_s19 + $0x40] sm:$0xff] }
 0x39f   : > { %v2054_v6 = vpop.f32.mrf.mxu0 }
 0x3a0   : > { %v2302_v35 = vadd.f32 %v3178_v36, %v2270_v44  ;;  %v2208_v9 = vmul.f32 %v3118_v12, %v2054_v6  ;;  %v1926_v6 = vpop.xlane.xlu0 %1925 }
 0x3a1   : > { %v2056_v34 = vpop.f32.mrf.mxu0  ;;  %3141 = vrcp.f32 %v1926_v6 }
 0x3a2   : > { %2334 = vst.msk [vmem:[%s4262_s26 + $0x8] sm:$0xff] %vm350_vm0, %v2302_v35  ;;  %v2271_v47 = vmul.f32 %v4254_v3, %v2208_v9  ;;  %v3186_v35 = vld [vmem:[%s3294_s19 + $0x48] sm:$0xff] }
 0x3a3   : > { %v2059_v29 = vpop.f32.mrf.mxu0 }
 0x3a4   : > { %v2303_v18 = vadd.f32 %v3179_v16, %v2271_v47  ;;  %v2210_v50 = vmul.f32 %v3120_v8, %v2059_v29  ;;  %v1929_v29 = vpop.xlane.xlu1 %1928 }
 0x3a5   : > { %v2061_v46 = vpop.f32.mrf.mxu0  ;;  %3143 = vrcp.f32 %v1929_v29 }
 0x3a6   : > { %2335 = vst.msk [vmem:[%s4262_s26 + $0x10] sm:$0xff] %vm350_vm0, %v2303_v18  ;;  %v2272_v48 = vmul.f32 %v4254_v3, %v2210_v50  ;;  %v3187_v18 = vld [vmem:[%s3294_s19 + $0x50] sm:$0xff]  ;;  %v3138_v31 = vpop.eup %3137 }
 0x3a7   : > { %v2064_v23 = vpop.f32.mrf.mxu0 }
 0x3a8   : > { %v2304_v21 = vadd.f32 %v3180_v17, %v2272_v48  ;;  %v2212_v55 = vmul.f32 %v3122_v27, %v2064_v23  ;;  %v1932_v23 = vpop.xlane.xlu0 %1931 }
 0x3a9   : > { %v2066_v15 = vpop.f32.mrf.mxu0  ;;  %3145 = vrcp.f32 %v1932_v23 }
 0x3aa   : > { %2336 = vst.msk [vmem:[%s4262_s26 + $0x18] sm:$0xff] %vm350_vm0, %v2304_v21  ;;  %v2273_v5 = vmul.f32 %v4254_v3, %v2212_v55  ;;  %v3188_v21 = vld [vmem:[%s3294_s19 + $0x58] sm:$0xff]  ;;  %v3140_v61 = vpop.eup %3139 }
 0x3ab   : > { %v2069_v59 = vpop.f32.mrf.mxu0 }
 0x3ac   : > { %v2305_v19 = vadd.f32 %v3181_v49, %v2273_v5  ;;  %v2214_v41 = vmul.f32 %v3124_v7, %v2069_v59  ;;  %v1935_v59 = vpop.xlane.xlu1 %1934 }
 0x3ad   : > { %v2071_v63 = vpop.f32.mrf.mxu0  ;;  %3147 = vrcp.f32 %v1935_v59 }
 0x3ae   : > { %2337 = vst.msk [vmem:[%s4262_s26 + $0x20] sm:$0xff] %vm350_vm0, %v2305_v19  ;;  %v2274_v51 = vmul.f32 %v4254_v3, %v2214_v41  ;;  %v3189_v19 = vld [vmem:[%s3294_s19 + $0x60] sm:$0xff]  ;;  %v3142_v53 = vpop.eup %3141 }
 0x3af   : > { %v2074_v20 = vpop.f32.mrf.mxu0 }
 0x3b0   : > { %v2306_v43 = vadd.f32 %v3182_v33, %v2274_v51  ;;  %v2216_v28 = vmul.f32 %v3126_v22, %v2074_v20  ;;  %v1938_v20 = vpop.xlane.xlu0 %1937 }
 0x3b1   : > { %v2076_v24 = vpop.f32.mrf.mxu0  ;;  %3149 = vrcp.f32 %v1938_v20 }
 0x3b2   : > { %2338 = vst.msk [vmem:[%s4262_s26 + $0x28] sm:$0xff] %vm350_vm0, %v2306_v43  ;;  %v2275_v40 = vmul.f32 %v4254_v3, %v2216_v28  ;;  %v3190_v43 = vld [vmem:[%s3294_s19 + $0x68] sm:$0xff]  ;;  %v3144_v26 = vpop.eup %3143 }
 0x3b3   : > { %v2079_v62 = vpop.f32.mrf.mxu0 }
 0x3b4   : > { %v2307_v25 = vadd.f32 %v3183_v1, %v2275_v40  ;;  %v2218_v56 = vmul.f32 %v3128_v13, %v2079_v62  ;;  %v1941_v62 = vpop.xlane.xlu1 %1940 }
 0x3b5   : > { %v2081_v57 = vpop.f32.mrf.mxu0  ;;  %3151 = vrcp.f32 %v1941_v62 }
 0x3b6   : > { %2339 = vst.msk [vmem:[%s4262_s26 + $0x30] sm:$0xff] %vm350_vm0, %v2307_v25  ;;  %v2276_v42 = vmul.f32 %v4254_v3, %v2218_v56  ;;  %v3191_v25 = vld [vmem:[%s3294_s19 + $0x70] sm:$0xff]  ;;  %v3146_v38 = vpop.eup %3145 }
 0x3b7   : > { %v2084_v54 = vpop.f32.mrf.mxu0 }
 0x3b8   : > { %v2308_v0 = vadd.f32 %v3184_v58, %v2276_v42  ;;  %v2220_v52 = vmul.f32 %v3130_v39, %v2084_v54  ;;  %v1944_v54 = vpop.xlane.xlu0 %1943 }
 0x3b9   : > { %v2086_v45 = vpop.f32.mrf.mxu0  ;;  %3153 = vrcp.f32 %v1944_v54 }
 0x3ba   : > { %2340 = vst.msk [vmem:[%s4262_s26 + $0x38] sm:$0xff] %vm350_vm0, %v2308_v0  ;;  %v2277_v37 = vmul.f32 %v4254_v3, %v2220_v52  ;;  %v3192_v0 = vld [vmem:[%s3294_s19 + $0x78] sm:$0xff]  ;;  %v3148_v4 = vpop.eup %3147 }
 0x3bb   : > { %v2089_v11 = vpop.f32.mrf.mxu0 }
 0x3bc   : > { %v2309_v32 = vadd.f32 %v3185_v30, %v2277_v37  ;;  %v2222_v14 = vmul.f32 %v3132_v10, %v2089_v11  ;;  %v1947_v11 = vpop.xlane.xlu1 %1946 }
 0x3bd   : > { %v2091_v44 = vpop.f32.mrf.mxu0  ;;  %3155 = vrcp.f32 %v1947_v11 }
 0x3be   : > { %2341 = vst.msk [vmem:[%s4262_s26 + $0x40] sm:$0xff] %vm350_vm0, %v2309_v32  ;;  %v2278_v12 = vmul.f32 %v4254_v3, %v2222_v14  ;;  %v3193_v32 = vld [vmem:[%s3294_s19 + $0x80] sm:$0xff]  ;;  %v3150_v6 = vpop.eup %3149 }
 0x3bf   : > { %v2094_v36 = vpop.f32.mrf.mxu0 }
 0x3c0   : > { %v2310_v9 = vadd.f32 %v3186_v35, %v2278_v12  ;;  %v2224_v34 = vmul.f32 %v3134_v60, %v2094_v36  ;;  %v1950_v36 = vpop.xlane.xlu0 %1949 }
 0x3c1   : > { %v2096_v47 = vpop.f32.mrf.mxu0  ;;  %3157 = vrcp.f32 %v1950_v36 }
 0x3c2   : > { %2342 = vst.msk [vmem:[%s4262_s26 + $0x48] sm:$0xff] %vm350_vm0, %v2310_v9  ;;  %v2279_v8 = vmul.f32 %v4254_v3, %v2224_v34  ;;  %v3194_v9 = vld [vmem:[%s3294_s19 + $0x88] sm:$0xff]  ;;  %v3152_v29 = vpop.eup %3151 }
 0x3c3   : > { %v2099_v16 = vpop.f32.mrf.mxu0 }
 0x3c4   : > { %v2311_v50 = vadd.f32 %v3187_v18, %v2279_v8  ;;  %v2226_v46 = vmul.f32 %v3136_v2, %v2099_v16  ;;  %v1953_v16 = vpop.xlane.xlu1 %1952 }
 0x3c5   : > { %v2101_v48 = vpop.f32.mrf.mxu0  ;;  %3159 = vrcp.f32 %v1953_v16 }
 0x3c6   : > { %2343 = vst.msk [vmem:[%s4262_s26 + $0x50] sm:$0xff] %vm350_vm0, %v2311_v50  ;;  %v2280_v27 = vmul.f32 %v4254_v3, %v2226_v46  ;;  %v3195_v50 = vld [vmem:[%s3294_s19 + $0x90] sm:$0xff]  ;;  %v3154_v23 = vpop.eup %3153 }
 0x3c7   : > { %v2104_v17 = vpop.f32.mrf.mxu0 }
 0x3c8   : > { %v2312_v55 = vadd.f32 %v3188_v21, %v2280_v27  ;;  %v2228_v15 = vmul.f32 %v3138_v31, %v2104_v17  ;;  %v1956_v17 = vpop.xlane.xlu0 %1955 }
 0x3c9   : > { %v2106_v5 = vpop.f32.mrf.mxu0  ;;  %3161 = vrcp.f32 %v1956_v17 }
 0x3ca   : > { %2344 = vst.msk [vmem:[%s4262_s26 + $0x58] sm:$0xff] %vm350_vm0, %v2312_v55  ;;  %v2281_v7 = vmul.f32 %v4254_v3, %v2228_v15  ;;  %v3196_v55 = vld [vmem:[%s3294_s19 + $0x98] sm:$0xff]  ;;  %v3156_v59 = vpop.eup %3155 }
 0x3cb   : > { %v2109_v49 = vpop.f32.mrf.mxu0 }
 0x3cc   : > { %v2313_v41 = vadd.f32 %v3189_v19, %v2281_v7  ;;  %v2230_v63 = vmul.f32 %v3140_v61, %v2109_v49  ;;  %v1959_v49 = vpop.xlane.xlu1 %1958 }
 0x3cd   : > { %v2111_v51 = vpop.f32.mrf.mxu0  ;;  %3163 = vrcp.f32 %v1959_v49 }
 0x3ce   : > { %2345 = vst.msk [vmem:[%s4262_s26 + $0x60] sm:$0xff] %vm350_vm0, %v2313_v41  ;;  %v2282_v22 = vmul.f32 %v4254_v3, %v2230_v63  ;;  %v3197_v41 = vld [vmem:[%s3294_s19 + $0xa0] sm:$0xff]  ;;  %v3158_v20 = vpop.eup %3157 }
 0x3cf   : > { %v2114_v33 = vpop.f32.mrf.mxu0 }
 0x3d0   : > { %v2314_v28 = vadd.f32 %v3190_v43, %v2282_v22  ;;  %v2232_v24 = vmul.f32 %v3142_v53, %v2114_v33  ;;  %v1962_v33 = vpop.xlane.xlu0 %1961 }
 0x3d1   : > { %v2116_v40 = vpop.f32.mrf.mxu0  ;;  %3165 = vrcp.f32 %v1962_v33  ;;  %v3206_v33 = vld [vmem:[%s3294_s19 + $0xe8] sm:$0xff] }
 0x3d2   : > { %2346 = vst.msk [vmem:[%s4262_s26 + $0x68] sm:$0xff] %vm350_vm0, %v2314_v28  ;;  %v2283_v13 = vmul.f32 %v4254_v3, %v2232_v24  ;;  %v3198_v28 = vld [vmem:[%s3294_s19 + $0xa8] sm:$0xff]  ;;  %v3160_v62 = vpop.eup %3159 }
 0x3d3   : > { %v2119_v1 = vpop.f32.mrf.mxu0 }
 0x3d4   : > { %v2315_v56 = vadd.f32 %v3191_v25, %v2283_v13  ;;  %v2234_v57 = vmul.f32 %v3144_v26, %v2119_v1  ;;  %v1965_v1 = vpop.xlane.xlu1 %1964 }
 0x3d5   : > { %v2121_v42 = vpop.f32.mrf.mxu0  ;;  %3167 = vrcp.f32 %v1965_v1 }
 0x3d6   : > { %2347 = vst.msk [vmem:[%s4262_s26 + $0x70] sm:$0xff] %vm350_vm0, %v2315_v56  ;;  %v2284_v39 = vmul.f32 %v4254_v3, %v2234_v57  ;;  %v3199_v56 = vld [vmem:[%s3294_s19 + $0xb0] sm:$0xff]  ;;  %v3162_v54 = vpop.eup %3161 }
 0x3d7   : > { %v2124_v58 = vpop.f32.mrf.mxu0 }
 0x3d8   : > { %v2316_v52 = vadd.f32 %v3192_v0, %v2284_v39  ;;  %v2236_v45 = vmul.f32 %v3146_v38, %v2124_v58  ;;  %v1968_v58 = vpop.xlane.xlu0 %1967 }
 0x3d9   : > { %v2126_v37 = vpop.f32.mrf.mxu0  ;;  %3169 = vrcp.f32 %v1968_v58 }
 0x3da   : > { %2348 = vst.msk [vmem:[%s4262_s26 + $0x78] sm:$0xff] %vm350_vm0, %v2316_v52  ;;  %v2285_v10 = vmul.f32 %v4254_v3, %v2236_v45  ;;  %v3200_v52 = vld [vmem:[%s3294_s19 + $0xb8] sm:$0xff]  ;;  %v3164_v11 = vpop.eup %3163 }
 0x3db   : > { %v2129_v30 = vpop.f32.mrf.mxu0 }
 0x3dc   : > { %v2317_v14 = vadd.f32 %v3193_v32, %v2285_v10  ;;  %v2238_v44 = vmul.f32 %v3148_v4, %v2129_v30  ;;  %v1971_v30 = vpop.xlane.xlu1 %1970 }
 0x3dd   : > { %v2131_v12 = vpop.f32.mrf.mxu0  ;;  %3171 = vrcp.f32 %v1971_v30 }
 0x3de   : > { %2349 = vst.msk [vmem:[%s4262_s26 + $0x80] sm:$0xff] %vm350_vm0, %v2317_v14  ;;  %v2286_v60 = vmul.f32 %v4254_v3, %v2238_v44  ;;  %v3201_v14 = vld [vmem:[%s3294_s19 + $0xc0] sm:$0xff]  ;;  %v3166_v36 = vpop.eup %3165 }
 0x3df   : > { %v2134_v35 = vpop.f32.mrf.mxu0 }
 0x3e0   : > { %v2318_v34 = vadd.f32 %v3194_v9, %v2286_v60  ;;  %v2240_v47 = vmul.f32 %v3150_v6, %v2134_v35  ;;  %v1974_v35 = vpop.xlane.xlu0 %1973 }
 0x3e1   : > { %v2136_v8 = vpop.f32.mrf.mxu0  ;;  %3173 = vrcp.f32 %v1974_v35 }
 0x3e2   : > { %2350 = vst.msk [vmem:[%s4262_s26 + $0x88] sm:$0xff] %vm350_vm0, %v2318_v34  ;;  %v2287_v2 = vmul.f32 %v4254_v3, %v2240_v47  ;;  %v3202_v34 = vld [vmem:[%s3294_s19 + $0xc8] sm:$0xff]  ;;  %v3168_v16 = vpop.eup %3167 }
 0x3e3   : > { %v2139_v18 = vpop.f32.mrf.mxu0 }
 0x3e4   : > { %v2319_v46 = vadd.f32 %v3195_v50, %v2287_v2  ;;  %v2242_v48 = vmul.f32 %v3152_v29, %v2139_v18  ;;  %v1977_v18 = vpop.xlane.xlu1 %1976 }
 0x3e5   : > { %v2141_v27 = vpop.f32.mrf.mxu0  ;;  %3175 = vrcp.f32 %v1977_v18 }
 0x3e6   : > { %2351 = vst.msk [vmem:[%s4262_s26 + $0x90] sm:$0xff] %vm350_vm0, %v2319_v46  ;;  %v2288_v31 = vmul.f32 %v4254_v3, %v2242_v48  ;;  %v3203_v46 = vld [vmem:[%s3294_s19 + $0xd0] sm:$0xff]  ;;  %v3170_v17 = vpop.eup %3169 }
 0x3e7   : > { %v2144_v21 = vpop.f32.mrf.mxu0 }
 0x3e8   : > { %v2320_v15 = vadd.f32 %v3196_v55, %v2288_v31  ;;  %v2244_v5 = vmul.f32 %v3154_v23, %v2144_v21  ;;  %v3204_v55 = vld [vmem:[%s3294_s19 + $0xd8] sm:$0xff] }
 0x3e9   : > { %v2146_v7 = vpop.f32.mrf.mxu0 }
 0x3ea   : > { %2352 = vst.msk [vmem:[%s4262_s26 + $0x98] sm:$0xff] %vm350_vm0, %v2320_v15  ;;  %v2289_v61 = vmul.f32 %v4254_v3, %v2244_v5 }
 0x3eb   : > { %v2149_v19 = vpop.f32.mrf.mxu0 }
 0x3ec   : > { %v2321_v63 = vadd.f32 %v3197_v41, %v2289_v61  ;;  %v2246_v51 = vmul.f32 %v3156_v59, %v2149_v19  ;;  %v3172_v59 = vpop.eup %3171  ;;  %v3205_v19 = vld [vmem:[%s3294_s19 + $0xe0] sm:$0xff] }
 0x3ed   : > { %v2151_v22 = vpop.f32.mrf.mxu0 }
 0x3ee   : > { %2353 = vst.msk [vmem:[%s4262_s26 + $0xa0] sm:$0xff] %vm350_vm0, %v2321_v63  ;;  %v2290_v53 = vmul.f32 %v4254_v3, %v2246_v51 }
 0x3ef   : > { %v2154_v43 = vpop.f32.mrf.mxu0 }
 0x3f0   : > { %v2322_v24 = vadd.f32 %v3198_v28, %v2290_v53  ;;  %v2248_v40 = vmul.f32 %v3158_v20, %v2154_v43  ;;  %v3174_v53 = vpop.eup %3173 }
 0x3f1   : > { %v2156_v13 = vpop.f32.mrf.mxu0 }
 0x3f2   : > { %2354 = vst.msk [vmem:[%s4262_s26 + $0xa8] sm:$0xff] %vm350_vm0, %v2322_v24  ;;  %v2291_v26 = vmul.f32 %v4254_v3, %v2248_v40  ;;  %v3176_v13 = vpop.eup %3175 }
 0x3f3   : > { %v2159_v25 = vpop.f32.mrf.mxu0 }
 0x3f4   : > { %v2323_v57 = vadd.f32 %v3199_v56, %v2291_v26  ;;  %v2250_v42 = vmul.f32 %v3160_v62, %v2159_v25  ;;  %v3207_v62 = vld [vmem:[%s3294_s19 + $0xf0] sm:$0xff] }
 0x3f5   : > { %v2161_v39 = vpop.f32.mrf.mxu0 }
 0x3f6   : > { %2355 = vst.msk [vmem:[%s4262_s26 + $0xb0] sm:$0xff] %vm350_vm0, %v2323_v57  ;;  %v2292_v38 = vmul.f32 %v4254_v3, %v2250_v42  ;;  %v3208_v42 = vld [vmem:[%s3294_s19 + $0xf8] sm:$0xff] }
 0x3f7   : > { %v2164_v0 = vpop.f32.mrf.mxu0 }
 0x3f8   : > { %v2324_v45 = vadd.f32 %v3200_v52, %v2292_v38  ;;  %v2252_v37 = vmul.f32 %v3162_v54, %v2164_v0 }
 0x3f9   : > { %v2166_v10 = vpop.f32.mrf.mxu0 }
 0x3fa   : > { %2356 = vst.msk [vmem:[%s4262_s26 + $0xb8] sm:$0xff] %vm350_vm0, %v2324_v45  ;;  %v2293_v4 = vmul.f32 %v4254_v3, %v2252_v37 }
 0x3fb   : > { %v2169_v32 = vpop.f32.mrf.mxu0 }
 0x3fc   : > { %v2325_v44 = vadd.f32 %v3201_v14, %v2293_v4  ;;  %v2254_v12 = vmul.f32 %v3164_v11, %v2169_v32 }
 0x3fd   : > { %v2171_v60 = vpop.f32.mrf.mxu0 }
 0x3fe   : > { %2357 = vst.msk [vmem:[%s4262_s26 + $0xc0] sm:$0xff] %vm350_vm0, %v2325_v44  ;;  %v2294_v6 = vmul.f32 %v4254_v3, %v2254_v12 }
 0x3ff   : > { %v2174_v9 = vpop.f32.mrf.mxu0 }
 0x400   : > { %v2326_v47 = vadd.f32 %v3202_v34, %v2294_v6  ;;  %v2256_v8 = vmul.f32 %v3166_v36, %v2174_v9 }
 0x401   : > { %v2176_v2 = vpop.f32.mrf.mxu0 }
 0x402   : > { %2358 = vst.msk [vmem:[%s4262_s26 + $0xc8] sm:$0xff] %vm350_vm0, %v2326_v47  ;;  %v2295_v29 = vmul.f32 %v4254_v3, %v2256_v8 }
 0x403   : > { %v2179_v50 = vpop.f32.mrf.mxu0 }
 0x404   : > { %v2327_v48 = vadd.f32 %v3203_v46, %v2295_v29  ;;  %v2258_v27 = vmul.f32 %v3168_v16, %v2179_v50 }
 0x405   : > { %v2181_v31 = vpop.f32.mrf.mxu0 }
 0x406   : > { %2359 = vst.msk [vmem:[%s4262_s26 + $0xd0] sm:$0xff] %vm350_vm0, %v2327_v48  ;;  %v2296_v23 = vmul.f32 %v4254_v3, %v2258_v27 }
 0x407   : > { %v2184_v21 = vpop.f32.mrf.mxu0 }
 0x408   : > { %v2328_v15 = vadd.f32 %v3204_v55, %v2296_v23  ;;  %v2260_v5 = vmul.f32 %v3170_v17, %v2184_v21 }
 0x409   : > { %v2186_v7 = vpop.f32.mrf.mxu0 }
 0x40a   : > { %2360 = vst.msk [vmem:[%s4262_s26 + $0xd8] sm:$0xff] %vm350_vm0, %v2328_v15  ;;  %v2297_v61 = vmul.f32 %v4254_v3, %v2260_v5 }
 0x40b   : > { %v2189_v49 = vpop.f32.mrf.mxu0 }
 0x40c   : > { %v2329_v41 = vadd.f32 %v3205_v19, %v2297_v61  ;;  %v2262_v63 = vmul.f32 %v3172_v59, %v2189_v49 }
 0x40d   : > { %v2191_v51 = vpop.f32.mrf.mxu0 }
 0x40e   : > { %2361 = vst.msk [vmem:[%s4262_s26 + $0xe0] sm:$0xff] %vm350_vm0, %v2329_v41  ;;  %v2298_v22 = vmul.f32 %v4254_v3, %v2262_v63 }
 0x40f   : > { %v2194_v20 = vpop.f32.mrf.mxu0 }
 0x410   : > { %v2330_v43 = vadd.f32 %v3206_v33, %v2298_v22  ;;  %v2264_v28 = vmul.f32 %v3174_v53, %v2194_v20 }
 0x411   : > { %v2196_v24 = vpop.f32.mrf.mxu0 }
 0x412   : > { %2362 = vst.msk [vmem:[%s4262_s26 + $0xe8] sm:$0xff] %vm350_vm0, %v2330_v43  ;;  %v2299_v40 = vmul.f32 %v4254_v3, %v2264_v28 }
 0x413   : > { %v2199_v26 = vpop.f32.mrf.mxu0 }
 0x414   : > { %v2331_v1 = vadd.f32 %v3207_v62, %v2299_v40  ;;  %v2266_v25 = vmul.f32 %v3176_v13, %v2199_v26 }
 0x415   : > { %v2201_v56 = vpop.f32.mrf.mxu0 }
 0x416   : > { %2363 = vst.msk [vmem:[%s4262_s26 + $0xf0] sm:$0xff] %vm350_vm0, %v2331_v1  ;;  %v2300_v57 = vmul.f32 %v4254_v3, %v2266_v25 }
 0x418   : > { %v2332_v39 = vadd.f32 %v3208_v42, %v2300_v57 }
 0x41a   : > { %2364 = vst.msk [vmem:[%s4262_s26 + $0xf8] sm:$0xff] %vm350_vm0, %v2332_v39 }
 0x41b PF: > { %s19_s29 = sadd.s32 1, %s3215_s29  }
 0x41c   : > { %p16_p4 = scmp.ge.s32.totalorder %s19_s29, 4  }
 0x41e   :  { %18 = sbr.rel (!%p16_p4) target bundleno = 2 (0x2), region = 82 }

</bundles_post_ra>
